<compile_context>
chip_gen: v7x
topology: tpu7x:2x2x1
jax: 0.10.0
libtpu: 0.0.40
codegen_flags: <defaults>
</compile_context>

<pallas_src>
import jax
import jax.numpy as jnp
from jax import lax
from jax.experimental import pallas as pl
from jax.experimental.pallas import tpu as pltpu

LANE = 128


def _round_up(x, m):
    return ((x + m - 1) // m) * m


def _double_conv_kernel(x_ref, w1_ref, s1_ref, b1_ref, w2_ref, s2_ref, b2_ref,
                        out_ref, xpad_ref, mid_ref, patch_ref):
    """Fused DoubleConv for one image (one grid step).

    x_ref:     (1, H, W, Cin)      bf16 input image
    w*_ref:    (9*Cp, Cp)          bf16 im2col-packed conv weights (tap-major)
    s*/b*_ref: (1, Cp)             f32 folded BN scale / bias (conv bias folded in)
    out_ref:   (1, H, W, Cp)       f32 output (channel-padded, lane-dense)
    xpad_ref:  (H+2, W+2, Cp) f32  zero-halo'd, channel-padded input
    mid_ref:   (H+2, W+2, Cp) f32  zero-halo'd intermediate activation
    patch_ref: (RH*W, 9*Cp)  bf16  im2col patch for one row block
    """
    H, W = out_ref.shape[1], out_ref.shape[2]
    Cin = x_ref.shape[3]
    Cp = out_ref.shape[3]
    RH = patch_ref.shape[0] // W          # rows per in-kernel matmul block
    MB = RH * W

    # Fresh zero halos / channel padding every grid step (scratch persists
    # across iterations, and iterations may land on different cores under
    # "parallel" semantics, so no program_id==0 gating).
    xpad_ref[...] = jnp.zeros(xpad_ref.shape, xpad_ref.dtype)
    mid_ref[...] = jnp.zeros(mid_ref.shape, mid_ref.dtype)

    # Scatter the real input channels into the interior of the padded buffer.
    xpad_ref[1:H + 1, 1:W + 1, :Cin] = x_ref[0].astype(xpad_ref.dtype)

    def conv_stage(src_ref, w_ref, s_ref, b_ref, store_fn):
        # Row-block loop bounds the live accumulator to (RH*W, Cp).
        for c in range(H // RH):
            r0 = c * RH
            # im2col: 9 shifted tap slabs written to lane-aligned (k*Cp) columns,
            # then all taps contracted in a single K = 9*Cp MXU matmul.
            for dy in range(3):
                for dx in range(3):
                    k = dy * 3 + dx
                    tap = src_ref[r0 + dy:r0 + dy + RH, dx:dx + W, :]
                    patch_ref[:, k * Cp:(k + 1) * Cp] = (
                        tap.reshape(MB, Cp).astype(patch_ref.dtype))
            acc = jnp.dot(patch_ref[...], w_ref[...],
                          preferred_element_type=jnp.float32)
            y = jnp.maximum(acc * s_ref[...] + b_ref[...], 0.0)  # BN + ReLU (f32)
            store_fn(r0, y)

    def store_mid(r0, y):
        # Intermediate stays on-chip (f32 scratch); quantized to bf16 only when
        # it is re-read into the conv2 im2col patch.
        mid_ref[r0 + 1:r0 + 1 + RH, 1:W + 1, :] = y.reshape(RH, W, Cp)

    def store_out(r0, y):
        out_ref[:, r0:r0 + RH, :, :] = (
            y.reshape(1, RH, W, Cp).astype(out_ref.dtype))

    conv_stage(xpad_ref, w1_ref, s1_ref, b1_ref, store_mid)   # conv1 + BN1 + ReLU
    conv_stage(mid_ref, w2_ref, s2_ref, b2_ref, store_out)    # conv2 + BN2 + ReLU


def _pack_conv_weight(w_hwio, cp):
    """(3,3,Cin,Cout) HWIO -> (9*cp, cp) bf16, tap-major rows, zero-padded channels."""
    kh, kw, cin, cout = w_hwio.shape
    wp = jnp.zeros((kh, kw, cp, cp), jnp.float32)
    wp = wp.at[:, :, :cin, :cout].set(w_hwio.astype(jnp.float32))
    return wp.reshape(kh * kw * cp, cp).astype(jnp.bfloat16)


def _fold_bn(conv_bias, gamma, beta, mean, var, cp, eps=1e-5):
    """Fold conv bias + eval-mode BN into zero-padded (1, cp) f32 scale/bias."""
    scale = gamma / jnp.sqrt(var + eps)
    bias = beta + (conv_bias - mean) * scale
    c = scale.shape[0]
    sp = jnp.zeros((1, cp), jnp.float32).at[0, :c].set(scale)
    bp = jnp.zeros((1, cp), jnp.float32).at[0, :c].set(bias)
    return sp, bp


def in_conv_forward(x_nchw, p):
    """InConv forward. Input NCHW (PyTorch convention), output NCHW float32."""
    N, Cin, H, W = x_nchw.shape
    Cout = p["w1"].shape[-1]
    Cp = _round_up(Cout, LANE)
    assert Cin <= Cp, "in_ch must not exceed the padded channel width"

    x = jnp.transpose(x_nchw, (0, 2, 3, 1)).astype(jnp.bfloat16)   # NHWC, bf16 in HBM

    w1c = _pack_conv_weight(p["w1"], Cp)
    w2c = _pack_conv_weight(p["w2"], Cp)
    s1, b1 = _fold_bn(p["b1"], p["g1"], p["beta1"], p["mean1"], p["var1"], Cp)
    s2, b2 = _fold_bn(p["b2"], p["g2"], p["beta2"], p["mean2"], p["var2"], Cp)

    RH = 8 if H % 8 == 0 else H   # rows per in-kernel matmul block

    out = pl.pallas_call(
        _double_conv_kernel,
        out_shape=jax.ShapeDtypeStruct((N, H, W, Cp), jnp.float32),
        grid=(N,),
        in_specs=[
            pl.BlockSpec((1, H, W, Cin), lambda n: (n, 0, 0, 0)),
            pl.BlockSpec((9 * Cp, Cp), lambda n: (0, 0)),
            pl.BlockSpec((1, Cp), lambda n: (0, 0)),
            pl.BlockSpec((1, Cp), lambda n: (0, 0)),
            pl.BlockSpec((9 * Cp, Cp), lambda n: (0, 0)),
            pl.BlockSpec((1, Cp), lambda n: (0, 0)),
            pl.BlockSpec((1, Cp), lambda n: (0, 0)),
        ],
        out_specs=pl.BlockSpec((1, H, W, Cp), lambda n: (n, 0, 0, 0)),
        scratch_shapes=[
            pltpu.VMEM((H + 2, W + 2, Cp), jnp.float32),   # zero-halo'd input
            pltpu.VMEM((H + 2, W + 2, Cp), jnp.float32),   # intermediate activation
            pltpu.VMEM((RH * W, 9 * Cp), jnp.bfloat16),    # im2col patch (one row block)
        ],
        compiler_params=pltpu.CompilerParams(
            dimension_semantics=("parallel",),             # image axis -> megacore/2-TC
            vmem_limit_bytes=48 * 1024 * 1024),
    )(x, w1c, s1, b1, w2c, s2, b2)

    out = out[..., :Cout]                                  # drop channel padding
    return jnp.transpose(out, (0, 3, 1, 2))                # -> NCHW


def init_params(key, in_ch, out_ch):
    """Deterministic synthetic parameters with the same shapes as the PyTorch module."""
    ks = jax.random.split(key, 10)

    def conv_w(k, cin, cout):
        bound = 1.0 / jnp.sqrt(cin * 9.0)
        return jax.random.uniform(k, (3, 3, cin, cout), jnp.float32, -bound, bound)

    return {
        "w1": conv_w(ks[0], in_ch, out_ch),
        "b1": jax.random.uniform(ks[1], (out_ch,), jnp.float32, -0.1, 0.1),
        "g1": 1.0 + 0.1 * jax.random.normal(ks[2], (out_ch,)),
        "beta1": 0.1 * jax.random.normal(ks[3], (out_ch,)),
        "mean1": 0.05 * jax.random.normal(ks[4], (out_ch,)),
        "var1": 1.0 + 0.1 * jax.random.uniform(ks[5], (out_ch,)),
        "w2": conv_w(ks[6], out_ch, out_ch),
        "b2": jax.random.uniform(ks[7], (out_ch,), jnp.float32, -0.1, 0.1),
        "g2": 1.0 + 0.1 * jax.random.normal(ks[8], (out_ch,)),
        "beta2": 0.1 * jax.random.normal(ks[9], (out_ch,)),
        "mean2": jnp.zeros((out_ch,), jnp.float32),
        "var2": jnp.ones((out_ch,), jnp.float32),
    }


def in_conv_reference(x_nchw, p, eps=1e-5):
    """Pure-JAX reference (lax.conv) matching the kernel's mixed precision."""
    x = jnp.transpose(x_nchw, (0, 2, 3, 1)).astype(jnp.bfloat16).astype(jnp.float32)
    dn = ("NHWC", "HWIO", "NHWC")

    def block(x, w, b, g, beta, mean, var):
        w = w.astype(jnp.bfloat16).astype(jnp.float32)
        y = lax.conv_general_dilated(x, w, (1, 1), "SAME", dimension_numbers=dn,
                                     precision=lax.Precision.HIGHEST) + b
        y = g * (y - mean) / jnp.sqrt(var + eps) + beta
        return jnp.maximum(y, 0.0)

    y = block(x, p["w1"], p["b1"], p["g1"], p["beta1"], p["mean1"], p["var1"])
    y = y.astype(jnp.bfloat16).astype(jnp.float32)  # kernel feeds conv2 a bf16 activation
    y = block(y, p["w2"], p["b2"], p["g2"], p["beta2"], p["mean2"], p["var2"])
    return jnp.transpose(y, (0, 3, 1, 2))


if __name__ == "__main__":
    N, IN_CH, OUT_CH, H, W = 2, 4, 8, 16, 16

    key = jax.random.PRNGKey(0)
    k_x, k_p = jax.random.split(key)
    x = jax.random.normal(k_x, (N, IN_CH, H, W), jnp.float32)   # NCHW like PyTorch
    params = init_params(k_p, IN_CH, OUT_CH)

    out = jax.block_until_ready(in_conv_forward(x, params))
    ref = jax.block_until_ready(in_conv_reference(x, params))

    assert out.shape == (N, OUT_CH, H, W), out.shape
    max_err = float(jnp.max(jnp.abs(out - ref)))
    assert jnp.allclose(out, ref, atol=2e-3, rtol=2e-3), max_err

    print("KERNEL_OK")
</pallas_src>

<mosaic_0001>
module attributes {stable_mosaic.version = 11 : i64} {
  func.func @_double_conv_kernel(%arg0: i32, %arg1: memref<1x16x16x4xbf16, #tpu.memory_space<vmem>>, %arg2: memref<1152x128xbf16, #tpu.memory_space<vmem>>, %arg3: memref<1x128xf32, #tpu.memory_space<vmem>>, %arg4: memref<1x128xf32, #tpu.memory_space<vmem>>, %arg5: memref<1152x128xbf16, #tpu.memory_space<vmem>>, %arg6: memref<1x128xf32, #tpu.memory_space<vmem>>, %arg7: memref<1x128xf32, #tpu.memory_space<vmem>>, %arg8: memref<1x16x16x128xf32, #tpu.memory_space<vmem>>, %arg9: memref<18x18x128xf32, #tpu.memory_space<vmem>>, %arg10: memref<18x18x128xf32, #tpu.memory_space<vmem>>, %arg11: memref<128x1152xbf16, #tpu.memory_space<vmem>>) attributes {dimension_semantics = [#tpu.dimension_semantics<parallel>], iteration_bounds = array<i64: 2>, scalar_prefetch = 0 : i64, scratch_operands = 3 : i64, tpu.core_type = #tpu.core_type<tc>, window_params = [{transform_indices = @transform_0, window_bounds = array<i64: 1, 16, 16, 4>}, {pipeline_mode = #tpu.pipeline_mode<synchronous>, transform_indices = @transform_1, window_bounds = array<i64: 1152, 128>}, {pipeline_mode = #tpu.pipeline_mode<synchronous>, transform_indices = @transform_2, window_bounds = array<i64: 1, 128>}, {pipeline_mode = #tpu.pipeline_mode<synchronous>, transform_indices = @transform_3, window_bounds = array<i64: 1, 128>}, {pipeline_mode = #tpu.pipeline_mode<synchronous>, transform_indices = @transform_4, window_bounds = array<i64: 1152, 128>}, {pipeline_mode = #tpu.pipeline_mode<synchronous>, transform_indices = @transform_5, window_bounds = array<i64: 1, 128>}, {pipeline_mode = #tpu.pipeline_mode<synchronous>, transform_indices = @transform_6, window_bounds = array<i64: 1, 128>}, {transform_indices = @transform_7, window_bounds = array<i64: 1, 16, 16, 128>}]} {
    %cst = arith.constant 0.000000e+00 : f32
    %0 = vector.broadcast %cst : f32 to vector<18x18x128xf32>
    %c0 = arith.constant 0 : index
    %c0_0 = arith.constant 0 : index
    %c0_1 = arith.constant 0 : index
    %1 = vector.load %arg9[%c0, %c0_0, %c0_1] : memref<18x18x128xf32, #tpu.memory_space<vmem>>, vector<18x18x128xf32>
    tpu.vector_store %arg9[%c0, %c0_0, %c0_1], %0 {strides = array<i32>} : memref<18x18x128xf32, #tpu.memory_space<vmem>>, vector<18x18x128xf32>,
    %cst_2 = arith.constant 0.000000e+00 : f32
    %2 = vector.broadcast %cst_2 : f32 to vector<18x18x128xf32>
    %c0_3 = arith.constant 0 : index
    %c0_4 = arith.constant 0 : index
    %c0_5 = arith.constant 0 : index
    %3 = vector.load %arg10[%c0_3, %c0_4, %c0_5] : memref<18x18x128xf32, #tpu.memory_space<vmem>>, vector<18x18x128xf32>
    tpu.vector_store %arg10[%c0_3, %c0_4, %c0_5], %2 {strides = array<i32>} : memref<18x18x128xf32, #tpu.memory_space<vmem>>, vector<18x18x128xf32>,
    %c0_6 = arith.constant 0 : index
    %c0_7 = arith.constant 0 : index
    %c0_8 = arith.constant 0 : index
    %c0_9 = arith.constant 0 : index
    %4 = vector.load %arg1[%c0_6, %c0_7, %c0_8, %c0_9] : memref<1x16x16x4xbf16, #tpu.memory_space<vmem>>, vector<1x16x16x4xbf16>
    %5 = vector.shape_cast %4 : vector<1x16x16x4xbf16> to vector<16x16x4xbf16>
    %6 = arith.extf %5 : vector<16x16x4xbf16> to vector<16x16x4xf32>
    %c1 = arith.constant 1 : index
    %c1_10 = arith.constant 1 : index
    %c0_11 = arith.constant 0 : index
    %7 = vector.load %arg9[%c1, %c1_10, %c0_11] : memref<18x18x128xf32, #tpu.memory_space<vmem>>, vector<16x16x4xf32>
    tpu.vector_store %arg9[%c1, %c1_10, %c0_11], %6 {strides = array<i32>} : memref<18x18x128xf32, #tpu.memory_space<vmem>>, vector<16x16x4xf32>,
    %c0_12 = arith.constant 0 : index
    %c0_13 = arith.constant 0 : index
    %c0_14 = arith.constant 0 : index
    %8 = vector.load %arg9[%c0_12, %c0_13, %c0_14] : memref<18x18x128xf32, #tpu.memory_space<vmem>>, vector<8x16x128xf32>
    %9 = vector.shape_cast %8 : vector<8x16x128xf32> to vector<128x128xf32>
    %10 = arith.truncf %9 : vector<128x128xf32> to vector<128x128xbf16>
    %c0_15 = arith.constant 0 : index
    %c0_16 = arith.constant 0 : index
    %11 = vector.load %arg11[%c0_15, %c0_16] : memref<128x1152xbf16, #tpu.memory_space<vmem>>, vector<128x128xbf16>
    tpu.vector_store %arg11[%c0_15, %c0_16], %10 {strides = array<i32>} : memref<128x1152xbf16, #tpu.memory_space<vmem>>, vector<128x128xbf16>,
    %c0_17 = arith.constant 0 : index
    %c1_18 = arith.constant 1 : index
    %c0_19 = arith.constant 0 : index
    %12 = vector.load %arg9[%c0_17, %c1_18, %c0_19] : memref<18x18x128xf32, #tpu.memory_space<vmem>>, vector<8x16x128xf32>
    %13 = vector.shape_cast %12 : vector<8x16x128xf32> to vector<128x128xf32>
    %14 = arith.truncf %13 : vector<128x128xf32> to vector<128x128xbf16>
    %c0_20 = arith.constant 0 : index
    %c128 = arith.constant 128 : index
    %15 = vector.load %arg11[%c0_20, %c128] : memref<128x1152xbf16, #tpu.memory_space<vmem>>, vector<128x128xbf16>
    tpu.vector_store %arg11[%c0_20, %c128], %14 {strides = array<i32>} : memref<128x1152xbf16, #tpu.memory_space<vmem>>, vector<128x128xbf16>,
    %c0_21 = arith.constant 0 : index
    %c2 = arith.constant 2 : index
    %c0_22 = arith.constant 0 : index
    %16 = vector.load %arg9[%c0_21, %c2, %c0_22] : memref<18x18x128xf32, #tpu.memory_space<vmem>>, vector<8x16x128xf32>
    %17 = vector.shape_cast %16 : vector<8x16x128xf32> to vector<128x128xf32>
    %18 = arith.truncf %17 : vector<128x128xf32> to vector<128x128xbf16>
    %c0_23 = arith.constant 0 : index
    %c256 = arith.constant 256 : index
    %19 = vector.load %arg11[%c0_23, %c256] : memref<128x1152xbf16, #tpu.memory_space<vmem>>, vector<128x128xbf16>
    tpu.vector_store %arg11[%c0_23, %c256], %18 {strides = array<i32>} : memref<128x1152xbf16, #tpu.memory_space<vmem>>, vector<128x128xbf16>,
    %c1_24 = arith.constant 1 : index
    %c0_25 = arith.constant 0 : index
    %c0_26 = arith.constant 0 : index
    %20 = vector.load %arg9[%c1_24, %c0_25, %c0_26] : memref<18x18x128xf32, #tpu.memory_space<vmem>>, vector<8x16x128xf32>
    %21 = vector.shape_cast %20 : vector<8x16x128xf32> to vector<128x128xf32>
    %22 = arith.truncf %21 : vector<128x128xf32> to vector<128x128xbf16>
    %c0_27 = arith.constant 0 : index
    %c384 = arith.constant 384 : index
    %23 = vector.load %arg11[%c0_27, %c384] : memref<128x1152xbf16, #tpu.memory_space<vmem>>, vector<128x128xbf16>
    tpu.vector_store %arg11[%c0_27, %c384], %22 {strides = array<i32>} : memref<128x1152xbf16, #tpu.memory_space<vmem>>, vector<128x128xbf16>,
    %c1_28 = arith.constant 1 : index
    %c1_29 = arith.constant 1 : index
    %c0_30 = arith.constant 0 : index
    %24 = vector.load %arg9[%c1_28, %c1_29, %c0_30] : memref<18x18x128xf32, #tpu.memory_space<vmem>>, vector<8x16x128xf32>
    %25 = vector.shape_cast %24 : vector<8x16x128xf32> to vector<128x128xf32>
    %26 = arith.truncf %25 : vector<128x128xf32> to vector<128x128xbf16>
    %c0_31 = arith.constant 0 : index
    %c512 = arith.constant 512 : index
    %27 = vector.load %arg11[%c0_31, %c512] : memref<128x1152xbf16, #tpu.memory_space<vmem>>, vector<128x128xbf16>
    tpu.vector_store %arg11[%c0_31, %c512], %26 {strides = array<i32>} : memref<128x1152xbf16, #tpu.memory_space<vmem>>, vector<128x128xbf16>,
    %c1_32 = arith.constant 1 : index
    %c2_33 = arith.constant 2 : index
    %c0_34 = arith.constant 0 : index
    %28 = vector.load %arg9[%c1_32, %c2_33, %c0_34] : memref<18x18x128xf32, #tpu.memory_space<vmem>>, vector<8x16x128xf32>
    %29 = vector.shape_cast %28 : vector<8x16x128xf32> to vector<128x128xf32>
    %30 = arith.truncf %29 : vector<128x128xf32> to vector<128x128xbf16>
    %c0_35 = arith.constant 0 : index
    %c640 = arith.constant 640 : index
    %31 = vector.load %arg11[%c0_35, %c640] : memref<128x1152xbf16, #tpu.memory_space<vmem>>, vector<128x128xbf16>
    tpu.vector_store %arg11[%c0_35, %c640], %30 {strides = array<i32>} : memref<128x1152xbf16, #tpu.memory_space<vmem>>, vector<128x128xbf16>,
    %c2_36 = arith.constant 2 : index
    %c0_37 = arith.constant 0 : index
    %c0_38 = arith.constant 0 : index
    %32 = vector.load %arg9[%c2_36, %c0_37, %c0_38] : memref<18x18x128xf32, #tpu.memory_space<vmem>>, vector<8x16x128xf32>
    %33 = vector.shape_cast %32 : vector<8x16x128xf32> to vector<128x128xf32>
    %34 = arith.truncf %33 : vector<128x128xf32> to vector<128x128xbf16>
    %c0_39 = arith.constant 0 : index
    %c768 = arith.constant 768 : index
    %35 = vector.load %arg11[%c0_39, %c768] : memref<128x1152xbf16, #tpu.memory_space<vmem>>, vector<128x128xbf16>
    tpu.vector_store %arg11[%c0_39, %c768], %34 {strides = array<i32>} : memref<128x1152xbf16, #tpu.memory_space<vmem>>, vector<128x128xbf16>,
    %c2_40 = arith.constant 2 : index
    %c1_41 = arith.constant 1 : index
    %c0_42 = arith.constant 0 : index
    %36 = vector.load %arg9[%c2_40, %c1_41, %c0_42] : memref<18x18x128xf32, #tpu.memory_space<vmem>>, vector<8x16x128xf32>
    %37 = vector.shape_cast %36 : vector<8x16x128xf32> to vector<128x128xf32>
    %38 = arith.truncf %37 : vector<128x128xf32> to vector<128x128xbf16>
    %c0_43 = arith.constant 0 : index
    %c896 = arith.constant 896 : index
    %39 = vector.load %arg11[%c0_43, %c896] : memref<128x1152xbf16, #tpu.memory_space<vmem>>, vector<128x128xbf16>
    tpu.vector_store %arg11[%c0_43, %c896], %38 {strides = array<i32>} : memref<128x1152xbf16, #tpu.memory_space<vmem>>, vector<128x128xbf16>,
    %c2_44 = arith.constant 2 : index
    %c2_45 = arith.constant 2 : index
    %c0_46 = arith.constant 0 : index
    %40 = vector.load %arg9[%c2_44, %c2_45, %c0_46] : memref<18x18x128xf32, #tpu.memory_space<vmem>>, vector<8x16x128xf32>
    %41 = vector.shape_cast %40 : vector<8x16x128xf32> to vector<128x128xf32>
    %42 = arith.truncf %41 : vector<128x128xf32> to vector<128x128xbf16>
    %c0_47 = arith.constant 0 : index
    %c1024 = arith.constant 1024 : index
    %43 = vector.load %arg11[%c0_47, %c1024] : memref<128x1152xbf16, #tpu.memory_space<vmem>>, vector<128x128xbf16>
    tpu.vector_store %arg11[%c0_47, %c1024], %42 {strides = array<i32>} : memref<128x1152xbf16, #tpu.memory_space<vmem>>, vector<128x128xbf16>,
    %c0_48 = arith.constant 0 : index
    %c0_49 = arith.constant 0 : index
    %44 = vector.load %arg11[%c0_48, %c0_49] : memref<128x1152xbf16, #tpu.memory_space<vmem>>, vector<128x1152xbf16>
    %c0_50 = arith.constant 0 : index
    %c0_51 = arith.constant 0 : index
    %45 = vector.load %arg2[%c0_50, %c0_51] : memref<1152x128xbf16, #tpu.memory_space<vmem>>, vector<1152x128xbf16>
    %cst_52 = arith.constant dense<0.000000e+00> : vector<128x128xf32>
    %46 = tpu.matmul %44, %45, %cst_52 {dimension_numbers = #tpu.dot_dimension_numbers<[1], [0], [0], [1], [0, 0, 1, 1], [], []>} : vector<128x1152xbf16>, vector<1152x128xbf16>, vector<128x128xf32> -> vector<128x128xf32>
    %c0_53 = arith.constant 0 : index
    %c0_54 = arith.constant 0 : index
    %47 = vector.load %arg3[%c0_53, %c0_54] : memref<1x128xf32, #tpu.memory_space<vmem>>, vector<1x128xf32>
    %48 = vector.broadcast %47 : vector<1x128xf32> to vector<128x128xf32>
    %49 = arith.mulf %46, %48 : vector<128x128xf32>
    %c0_55 = arith.constant 0 : index
    %c0_56 = arith.constant 0 : index
    %50 = vector.load %arg4[%c0_55, %c0_56] : memref<1x128xf32, #tpu.memory_space<vmem>>, vector<1x128xf32>
    %51 = vector.broadcast %50 : vector<1x128xf32> to vector<128x128xf32>
    %52 = arith.addf %49, %51 : vector<128x128xf32>
    %cst_57 = arith.constant 0.000000e+00 : f32
    %53 = vector.broadcast %cst_57 : f32 to vector<128x128xf32>
    %54 = arith.maximumf %52, %53 : vector<128x128xf32>
    %55 = vector.shape_cast %54 : vector<128x128xf32> to vector<8x16x128xf32>
    %c1_58 = arith.constant 1 : index
    %c1_59 = arith.constant 1 : index
    %c0_60 = arith.constant 0 : index
    %56 = vector.load %arg10[%c1_58, %c1_59, %c0_60] : memref<18x18x128xf32, #tpu.memory_space<vmem>>, vector<8x16x128xf32>
    tpu.vector_store %arg10[%c1_58, %c1_59, %c0_60], %55 {strides = array<i32>} : memref<18x18x128xf32, #tpu.memory_space<vmem>>, vector<8x16x128xf32>,
    %c8 = arith.constant 8 : index
    %c0_61 = arith.constant 0 : index
    %c0_62 = arith.constant 0 : index
    %57 = vector.load %arg9[%c8, %c0_61, %c0_62] : memref<18x18x128xf32, #tpu.memory_space<vmem>>, vector<8x16x128xf32>
    %58 = vector.shape_cast %57 : vector<8x16x128xf32> to vector<128x128xf32>
    %59 = arith.truncf %58 : vector<128x128xf32> to vector<128x128xbf16>
    %c0_63 = arith.constant 0 : index
    %c0_64 = arith.constant 0 : index
    %60 = vector.load %arg11[%c0_63, %c0_64] : memref<128x1152xbf16, #tpu.memory_space<vmem>>, vector<128x128xbf16>
    tpu.vector_store %arg11[%c0_63, %c0_64], %59 {strides = array<i32>} : memref<128x1152xbf16, #tpu.memory_space<vmem>>, vector<128x128xbf16>,
    %c8_65 = arith.constant 8 : index
    %c1_66 = arith.constant 1 : index
    %c0_67 = arith.constant 0 : index
    %61 = vector.load %arg9[%c8_65, %c1_66, %c0_67] : memref<18x18x128xf32, #tpu.memory_space<vmem>>, vector<8x16x128xf32>
    %62 = vector.shape_cast %61 : vector<8x16x128xf32> to vector<128x128xf32>
    %63 = arith.truncf %62 : vector<128x128xf32> to vector<128x128xbf16>
    %c0_68 = arith.constant 0 : index
    %c128_69 = arith.constant 128 : index
    %64 = vector.load %arg11[%c0_68, %c128_69] : memref<128x1152xbf16, #tpu.memory_space<vmem>>, vector<128x128xbf16>
    tpu.vector_store %arg11[%c0_68, %c128_69], %63 {strides = array<i32>} : memref<128x1152xbf16, #tpu.memory_space<vmem>>, vector<128x128xbf16>,
    %c8_70 = arith.constant 8 : index
    %c2_71 = arith.constant 2 : index
    %c0_72 = arith.constant 0 : index
    %65 = vector.load %arg9[%c8_70, %c2_71, %c0_72] : memref<18x18x128xf32, #tpu.memory_space<vmem>>, vector<8x16x128xf32>
    %66 = vector.shape_cast %65 : vector<8x16x128xf32> to vector<128x128xf32>
    %67 = arith.truncf %66 : vector<128x128xf32> to vector<128x128xbf16>
    %c0_73 = arith.constant 0 : index
    %c256_74 = arith.constant 256 : index
    %68 = vector.load %arg11[%c0_73, %c256_74] : memref<128x1152xbf16, #tpu.memory_space<vmem>>, vector<128x128xbf16>
    tpu.vector_store %arg11[%c0_73, %c256_74], %67 {strides = array<i32>} : memref<128x1152xbf16, #tpu.memory_space<vmem>>, vector<128x128xbf16>,
    %c9 = arith.constant 9 : index
    %c0_75 = arith.constant 0 : index
    %c0_76 = arith.constant 0 : index
    %69 = vector.load %arg9[%c9, %c0_75, %c0_76] : memref<18x18x128xf32, #tpu.memory_space<vmem>>, vector<8x16x128xf32>
    %70 = vector.shape_cast %69 : vector<8x16x128xf32> to vector<128x128xf32>
    %71 = arith.truncf %70 : vector<128x128xf32> to vector<128x128xbf16>
    %c0_77 = arith.constant 0 : index
    %c384_78 = arith.constant 384 : index
    %72 = vector.load %arg11[%c0_77, %c384_78] : memref<128x1152xbf16, #tpu.memory_space<vmem>>, vector<128x128xbf16>
    tpu.vector_store %arg11[%c0_77, %c384_78], %71 {strides = array<i32>} : memref<128x1152xbf16, #tpu.memory_space<vmem>>, vector<128x128xbf16>,
    %c9_79 = arith.constant 9 : index
    %c1_80 = arith.constant 1 : index
    %c0_81 = arith.constant 0 : index
    %73 = vector.load %arg9[%c9_79, %c1_80, %c0_81] : memref<18x18x128xf32, #tpu.memory_space<vmem>>, vector<8x16x128xf32>
    %74 = vector.shape_cast %73 : vector<8x16x128xf32> to vector<128x128xf32>
    %75 = arith.truncf %74 : vector<128x128xf32> to vector<128x128xbf16>
    %c0_82 = arith.constant 0 : index
    %c512_83 = arith.constant 512 : index
    %76 = vector.load %arg11[%c0_82, %c512_83] : memref<128x1152xbf16, #tpu.memory_space<vmem>>, vector<128x128xbf16>
    tpu.vector_store %arg11[%c0_82, %c512_83], %75 {strides = array<i32>} : memref<128x1152xbf16, #tpu.memory_space<vmem>>, vector<128x128xbf16>,
    %c9_84 = arith.constant 9 : index
    %c2_85 = arith.constant 2 : index
    %c0_86 = arith.constant 0 : index
    %77 = vector.load %arg9[%c9_84, %c2_85, %c0_86] : memref<18x18x128xf32, #tpu.memory_space<vmem>>, vector<8x16x128xf32>
    %78 = vector.shape_cast %77 : vector<8x16x128xf32> to vector<128x128xf32>
    %79 = arith.truncf %78 : vector<128x128xf32> to vector<128x128xbf16>
    %c0_87 = arith.constant 0 : index
    %c640_88 = arith.constant 640 : index
    %80 = vector.load %arg11[%c0_87, %c640_88] : memref<128x1152xbf16, #tpu.memory_space<vmem>>, vector<128x128xbf16>
    tpu.vector_store %arg11[%c0_87, %c640_88], %79 {strides = array<i32>} : memref<128x1152xbf16, #tpu.memory_space<vmem>>, vector<128x128xbf16>,
    %c10 = arith.constant 10 : index
    %c0_89 = arith.constant 0 : index
    %c0_90 = arith.constant 0 : index
    %81 = vector.load %arg9[%c10, %c0_89, %c0_90] : memref<18x18x128xf32, #tpu.memory_space<vmem>>, vector<8x16x128xf32>
    %82 = vector.shape_cast %81 : vector<8x16x128xf32> to vector<128x128xf32>
    %83 = arith.truncf %82 : vector<128x128xf32> to vector<128x128xbf16>
    %c0_91 = arith.constant 0 : index
    %c768_92 = arith.constant 768 : index
    %84 = vector.load %arg11[%c0_91, %c768_92] : memref<128x1152xbf16, #tpu.memory_space<vmem>>, vector<128x128xbf16>
    tpu.vector_store %arg11[%c0_91, %c768_92], %83 {strides = array<i32>} : memref<128x1152xbf16, #tpu.memory_space<vmem>>, vector<128x128xbf16>,
    %c10_93 = arith.constant 10 : index
    %c1_94 = arith.constant 1 : index
    %c0_95 = arith.constant 0 : index
    %85 = vector.load %arg9[%c10_93, %c1_94, %c0_95] : memref<18x18x128xf32, #tpu.memory_space<vmem>>, vector<8x16x128xf32>
    %86 = vector.shape_cast %85 : vector<8x16x128xf32> to vector<128x128xf32>
    %87 = arith.truncf %86 : vector<128x128xf32> to vector<128x128xbf16>
    %c0_96 = arith.constant 0 : index
    %c896_97 = arith.constant 896 : index
    %88 = vector.load %arg11[%c0_96, %c896_97] : memref<128x1152xbf16, #tpu.memory_space<vmem>>, vector<128x128xbf16>
    tpu.vector_store %arg11[%c0_96, %c896_97], %87 {strides = array<i32>} : memref<128x1152xbf16, #tpu.memory_space<vmem>>, vector<128x128xbf16>,
    %c10_98 = arith.constant 10 : index
    %c2_99 = arith.constant 2 : index
    %c0_100 = arith.constant 0 : index
    %89 = vector.load %arg9[%c10_98, %c2_99, %c0_100] : memref<18x18x128xf32, #tpu.memory_space<vmem>>, vector<8x16x128xf32>
    %90 = vector.shape_cast %89 : vector<8x16x128xf32> to vector<128x128xf32>
    %91 = arith.truncf %90 : vector<128x128xf32> to vector<128x128xbf16>
    %c0_101 = arith.constant 0 : index
    %c1024_102 = arith.constant 1024 : index
    %92 = vector.load %arg11[%c0_101, %c1024_102] : memref<128x1152xbf16, #tpu.memory_space<vmem>>, vector<128x128xbf16>
    tpu.vector_store %arg11[%c0_101, %c1024_102], %91 {strides = array<i32>} : memref<128x1152xbf16, #tpu.memory_space<vmem>>, vector<128x128xbf16>,
    %c0_103 = arith.constant 0 : index
    %c0_104 = arith.constant 0 : index
    %93 = vector.load %arg11[%c0_103, %c0_104] : memref<128x1152xbf16, #tpu.memory_space<vmem>>, vector<128x1152xbf16>
    %c0_105 = arith.constant 0 : index
    %c0_106 = arith.constant 0 : index
    %94 = vector.load %arg2[%c0_105, %c0_106] : memref<1152x128xbf16, #tpu.memory_space<vmem>>, vector<1152x128xbf16>
    %cst_107 = arith.constant dense<0.000000e+00> : vector<128x128xf32>
    %95 = tpu.matmul %93, %94, %cst_107 {dimension_numbers = #tpu.dot_dimension_numbers<[1], [0], [0], [1], [0, 0, 1, 1], [], []>} : vector<128x1152xbf16>, vector<1152x128xbf16>, vector<128x128xf32> -> vector<128x128xf32>
    %c0_108 = arith.constant 0 : index
    %c0_109 = arith.constant 0 : index
    %96 = vector.load %arg3[%c0_108, %c0_109] : memref<1x128xf32, #tpu.memory_space<vmem>>, vector<1x128xf32>
    %97 = vector.broadcast %96 : vector<1x128xf32> to vector<128x128xf32>
    %98 = arith.mulf %95, %97 : vector<128x128xf32>
    %c0_110 = arith.constant 0 : index
    %c0_111 = arith.constant 0 : index
    %99 = vector.load %arg4[%c0_110, %c0_111] : memref<1x128xf32, #tpu.memory_space<vmem>>, vector<1x128xf32>
    %100 = vector.broadcast %99 : vector<1x128xf32> to vector<128x128xf32>
    %101 = arith.addf %98, %100 : vector<128x128xf32>
    %cst_112 = arith.constant 0.000000e+00 : f32
    %102 = vector.broadcast %cst_112 : f32 to vector<128x128xf32>
    %103 = arith.maximumf %101, %102 : vector<128x128xf32>
    %104 = vector.shape_cast %103 : vector<128x128xf32> to vector<8x16x128xf32>
    %c9_113 = arith.constant 9 : index
    %c1_114 = arith.constant 1 : index
    %c0_115 = arith.constant 0 : index
    %105 = vector.load %arg10[%c9_113, %c1_114, %c0_115] : memref<18x18x128xf32, #tpu.memory_space<vmem>>, vector<8x16x128xf32>
    tpu.vector_store %arg10[%c9_113, %c1_114, %c0_115], %104 {strides = array<i32>} : memref<18x18x128xf32, #tpu.memory_space<vmem>>, vector<8x16x128xf32>,
    %c0_116 = arith.constant 0 : index
    %c0_117 = arith.constant 0 : index
    %c0_118 = arith.constant 0 : index
    %106 = vector.load %arg10[%c0_116, %c0_117, %c0_118] : memref<18x18x128xf32, #tpu.memory_space<vmem>>, vector<8x16x128xf32>
    %107 = vector.shape_cast %106 : vector<8x16x128xf32> to vector<128x128xf32>
    %108 = arith.truncf %107 : vector<128x128xf32> to vector<128x128xbf16>
    %c0_119 = arith.constant 0 : index
    %c0_120 = arith.constant 0 : index
    %109 = vector.load %arg11[%c0_119, %c0_120] : memref<128x1152xbf16, #tpu.memory_space<vmem>>, vector<128x128xbf16>
    tpu.vector_store %arg11[%c0_119, %c0_120], %108 {strides = array<i32>} : memref<128x1152xbf16, #tpu.memory_space<vmem>>, vector<128x128xbf16>,
    %c0_121 = arith.constant 0 : index
    %c1_122 = arith.constant 1 : index
    %c0_123 = arith.constant 0 : index
    %110 = vector.load %arg10[%c0_121, %c1_122, %c0_123] : memref<18x18x128xf32, #tpu.memory_space<vmem>>, vector<8x16x128xf32>
    %111 = vector.shape_cast %110 : vector<8x16x128xf32> to vector<128x128xf32>
    %112 = arith.truncf %111 : vector<128x128xf32> to vector<128x128xbf16>
    %c0_124 = arith.constant 0 : index
    %c128_125 = arith.constant 128 : index
    %113 = vector.load %arg11[%c0_124, %c128_125] : memref<128x1152xbf16, #tpu.memory_space<vmem>>, vector<128x128xbf16>
    tpu.vector_store %arg11[%c0_124, %c128_125], %112 {strides = array<i32>} : memref<128x1152xbf16, #tpu.memory_space<vmem>>, vector<128x128xbf16>,
    %c0_126 = arith.constant 0 : index
    %c2_127 = arith.constant 2 : index
    %c0_128 = arith.constant 0 : index
    %114 = vector.load %arg10[%c0_126, %c2_127, %c0_128] : memref<18x18x128xf32, #tpu.memory_space<vmem>>, vector<8x16x128xf32>
    %115 = vector.shape_cast %114 : vector<8x16x128xf32> to vector<128x128xf32>
    %116 = arith.truncf %115 : vector<128x128xf32> to vector<128x128xbf16>
    %c0_129 = arith.constant 0 : index
    %c256_130 = arith.constant 256 : index
    %117 = vector.load %arg11[%c0_129, %c256_130] : memref<128x1152xbf16, #tpu.memory_space<vmem>>, vector<128x128xbf16>
    tpu.vector_store %arg11[%c0_129, %c256_130], %116 {strides = array<i32>} : memref<128x1152xbf16, #tpu.memory_space<vmem>>, vector<128x128xbf16>,
    %c1_131 = arith.constant 1 : index
    %c0_132 = arith.constant 0 : index
    %c0_133 = arith.constant 0 : index
    %118 = vector.load %arg10[%c1_131, %c0_132, %c0_133] : memref<18x18x128xf32, #tpu.memory_space<vmem>>, vector<8x16x128xf32>
    %119 = vector.shape_cast %118 : vector<8x16x128xf32> to vector<128x128xf32>
    %120 = arith.truncf %119 : vector<128x128xf32> to vector<128x128xbf16>
    %c0_134 = arith.constant 0 : index
    %c384_135 = arith.constant 384 : index
    %121 = vector.load %arg11[%c0_134, %c384_135] : memref<128x1152xbf16, #tpu.memory_space<vmem>>, vector<128x128xbf16>
    tpu.vector_store %arg11[%c0_134, %c384_135], %120 {strides = array<i32>} : memref<128x1152xbf16, #tpu.memory_space<vmem>>, vector<128x128xbf16>,
    %c1_136 = arith.constant 1 : index
    %c1_137 = arith.constant 1 : index
    %c0_138 = arith.constant 0 : index
    %122 = vector.load %arg10[%c1_136, %c1_137, %c0_138] : memref<18x18x128xf32, #tpu.memory_space<vmem>>, vector<8x16x128xf32>
    %123 = vector.shape_cast %122 : vector<8x16x128xf32> to vector<128x128xf32>
    %124 = arith.truncf %123 : vector<128x128xf32> to vector<128x128xbf16>
    %c0_139 = arith.constant 0 : index
    %c512_140 = arith.constant 512 : index
    %125 = vector.load %arg11[%c0_139, %c512_140] : memref<128x1152xbf16, #tpu.memory_space<vmem>>, vector<128x128xbf16>
    tpu.vector_store %arg11[%c0_139, %c512_140], %124 {strides = array<i32>} : memref<128x1152xbf16, #tpu.memory_space<vmem>>, vector<128x128xbf16>,
    %c1_141 = arith.constant 1 : index
    %c2_142 = arith.constant 2 : index
    %c0_143 = arith.constant 0 : index
    %126 = vector.load %arg10[%c1_141, %c2_142, %c0_143] : memref<18x18x128xf32, #tpu.memory_space<vmem>>, vector<8x16x128xf32>
    %127 = vector.shape_cast %126 : vector<8x16x128xf32> to vector<128x128xf32>
    %128 = arith.truncf %127 : vector<128x128xf32> to vector<128x128xbf16>
    %c0_144 = arith.constant 0 : index
    %c640_145 = arith.constant 640 : index
    %129 = vector.load %arg11[%c0_144, %c640_145] : memref<128x1152xbf16, #tpu.memory_space<vmem>>, vector<128x128xbf16>
    tpu.vector_store %arg11[%c0_144, %c640_145], %128 {strides = array<i32>} : memref<128x1152xbf16, #tpu.memory_space<vmem>>, vector<128x128xbf16>,
    %c2_146 = arith.constant 2 : index
    %c0_147 = arith.constant 0 : index
    %c0_148 = arith.constant 0 : index
    %130 = vector.load %arg10[%c2_146, %c0_147, %c0_148] : memref<18x18x128xf32, #tpu.memory_space<vmem>>, vector<8x16x128xf32>
    %131 = vector.shape_cast %130 : vector<8x16x128xf32> to vector<128x128xf32>
    %132 = arith.truncf %131 : vector<128x128xf32> to vector<128x128xbf16>
    %c0_149 = arith.constant 0 : index
    %c768_150 = arith.constant 768 : index
    %133 = vector.load %arg11[%c0_149, %c768_150] : memref<128x1152xbf16, #tpu.memory_space<vmem>>, vector<128x128xbf16>
    tpu.vector_store %arg11[%c0_149, %c768_150], %132 {strides = array<i32>} : memref<128x1152xbf16, #tpu.memory_space<vmem>>, vector<128x128xbf16>,
    %c2_151 = arith.constant 2 : index
    %c1_152 = arith.constant 1 : index
    %c0_153 = arith.constant 0 : index
    %134 = vector.load %arg10[%c2_151, %c1_152, %c0_153] : memref<18x18x128xf32, #tpu.memory_space<vmem>>, vector<8x16x128xf32>
    %135 = vector.shape_cast %134 : vector<8x16x128xf32> to vector<128x128xf32>
    %136 = arith.truncf %135 : vector<128x128xf32> to vector<128x128xbf16>
    %c0_154 = arith.constant 0 : index
    %c896_155 = arith.constant 896 : index
    %137 = vector.load %arg11[%c0_154, %c896_155] : memref<128x1152xbf16, #tpu.memory_space<vmem>>, vector<128x128xbf16>
    tpu.vector_store %arg11[%c0_154, %c896_155], %136 {strides = array<i32>} : memref<128x1152xbf16, #tpu.memory_space<vmem>>, vector<128x128xbf16>,
    %c2_156 = arith.constant 2 : index
    %c2_157 = arith.constant 2 : index
    %c0_158 = arith.constant 0 : index
    %138 = vector.load %arg10[%c2_156, %c2_157, %c0_158] : memref<18x18x128xf32, #tpu.memory_space<vmem>>, vector<8x16x128xf32>
    %139 = vector.shape_cast %138 : vector<8x16x128xf32> to vector<128x128xf32>
    %140 = arith.truncf %139 : vector<128x128xf32> to vector<128x128xbf16>
    %c0_159 = arith.constant 0 : index
    %c1024_160 = arith.constant 1024 : index
    %141 = vector.load %arg11[%c0_159, %c1024_160] : memref<128x1152xbf16, #tpu.memory_space<vmem>>, vector<128x128xbf16>
    tpu.vector_store %arg11[%c0_159, %c1024_160], %140 {strides = array<i32>} : memref<128x1152xbf16, #tpu.memory_space<vmem>>, vector<128x128xbf16>,
    %c0_161 = arith.constant 0 : index
    %c0_162 = arith.constant 0 : index
    %142 = vector.load %arg11[%c0_161, %c0_162] : memref<128x1152xbf16, #tpu.memory_space<vmem>>, vector<128x1152xbf16>
    %c0_163 = arith.constant 0 : index
    %c0_164 = arith.constant 0 : index
    %143 = vector.load %arg5[%c0_163, %c0_164] : memref<1152x128xbf16, #tpu.memory_space<vmem>>, vector<1152x128xbf16>
    %cst_165 = arith.constant dense<0.000000e+00> : vector<128x128xf32>
    %144 = tpu.matmul %142, %143, %cst_165 {dimension_numbers = #tpu.dot_dimension_numbers<[1], [0], [0], [1], [0, 0, 1, 1], [], []>} : vector<128x1152xbf16>, vector<1152x128xbf16>, vector<128x128xf32> -> vector<128x128xf32>
    %c0_166 = arith.constant 0 : index
    %c0_167 = arith.constant 0 : index
    %145 = vector.load %arg6[%c0_166, %c0_167] : memref<1x128xf32, #tpu.memory_space<vmem>>, vector<1x128xf32>
    %146 = vector.broadcast %145 : vector<1x128xf32> to vector<128x128xf32>
    %147 = arith.mulf %144, %146 : vector<128x128xf32>
    %c0_168 = arith.constant 0 : index
    %c0_169 = arith.constant 0 : index
    %148 = vector.load %arg7[%c0_168, %c0_169] : memref<1x128xf32, #tpu.memory_space<vmem>>, vector<1x128xf32>
    %149 = vector.broadcast %148 : vector<1x128xf32> to vector<128x128xf32>
    %150 = arith.addf %147, %149 : vector<128x128xf32>
    %cst_170 = arith.constant 0.000000e+00 : f32
    %151 = vector.broadcast %cst_170 : f32 to vector<128x128xf32>
    %152 = arith.maximumf %150, %151 : vector<128x128xf32>
    %153 = vector.shape_cast %152 : vector<128x128xf32> to vector<1x8x16x128xf32>
    %c0_171 = arith.constant 0 : index
    %c0_172 = arith.constant 0 : index
    %c0_173 = arith.constant 0 : index
    %c0_174 = arith.constant 0 : index
    %154 = vector.load %arg8[%c0_171, %c0_172, %c0_173, %c0_174] : memref<1x16x16x128xf32, #tpu.memory_space<vmem>>, vector<1x8x16x128xf32>
    tpu.vector_store %arg8[%c0_171, %c0_172, %c0_173, %c0_174], %153 {strides = array<i32>} : memref<1x16x16x128xf32, #tpu.memory_space<vmem>>, vector<1x8x16x128xf32>,
    %c8_175 = arith.constant 8 : index
    %c0_176 = arith.constant 0 : index
    %c0_177 = arith.constant 0 : index
    %155 = vector.load %arg10[%c8_175, %c0_176, %c0_177] : memref<18x18x128xf32, #tpu.memory_space<vmem>>, vector<8x16x128xf32>
    %156 = vector.shape_cast %155 : vector<8x16x128xf32> to vector<128x128xf32>
    %157 = arith.truncf %156 : vector<128x128xf32> to vector<128x128xbf16>
    %c0_178 = arith.constant 0 : index
    %c0_179 = arith.constant 0 : index
    %158 = vector.load %arg11[%c0_178, %c0_179] : memref<128x1152xbf16, #tpu.memory_space<vmem>>, vector<128x128xbf16>
    tpu.vector_store %arg11[%c0_178, %c0_179], %157 {strides = array<i32>} : memref<128x1152xbf16, #tpu.memory_space<vmem>>, vector<128x128xbf16>,
    %c8_180 = arith.constant 8 : index
    %c1_181 = arith.constant 1 : index
    %c0_182 = arith.constant 0 : index
    %159 = vector.load %arg10[%c8_180, %c1_181, %c0_182] : memref<18x18x128xf32, #tpu.memory_space<vmem>>, vector<8x16x128xf32>
    %160 = vector.shape_cast %159 : vector<8x16x128xf32> to vector<128x128xf32>
    %161 = arith.truncf %160 : vector<128x128xf32> to vector<128x128xbf16>
    %c0_183 = arith.constant 0 : index
    %c128_184 = arith.constant 128 : index
    %162 = vector.load %arg11[%c0_183, %c128_184] : memref<128x1152xbf16, #tpu.memory_space<vmem>>, vector<128x128xbf16>
    tpu.vector_store %arg11[%c0_183, %c128_184], %161 {strides = array<i32>} : memref<128x1152xbf16, #tpu.memory_space<vmem>>, vector<128x128xbf16>,
    %c8_185 = arith.constant 8 : index
    %c2_186 = arith.constant 2 : index
    %c0_187 = arith.constant 0 : index
    %163 = vector.load %arg10[%c8_185, %c2_186, %c0_187] : memref<18x18x128xf32, #tpu.memory_space<vmem>>, vector<8x16x128xf32>
    %164 = vector.shape_cast %163 : vector<8x16x128xf32> to vector<128x128xf32>
    %165 = arith.truncf %164 : vector<128x128xf32> to vector<128x128xbf16>
    %c0_188 = arith.constant 0 : index
    %c256_189 = arith.constant 256 : index
    %166 = vector.load %arg11[%c0_188, %c256_189] : memref<128x1152xbf16, #tpu.memory_space<vmem>>, vector<128x128xbf16>
    tpu.vector_store %arg11[%c0_188, %c256_189], %165 {strides = array<i32>} : memref<128x1152xbf16, #tpu.memory_space<vmem>>, vector<128x128xbf16>,
    %c9_190 = arith.constant 9 : index
    %c0_191 = arith.constant 0 : index
    %c0_192 = arith.constant 0 : index
    %167 = vector.load %arg10[%c9_190, %c0_191, %c0_192] : memref<18x18x128xf32, #tpu.memory_space<vmem>>, vector<8x16x128xf32>
    %168 = vector.shape_cast %167 : vector<8x16x128xf32> to vector<128x128xf32>
    %169 = arith.truncf %168 : vector<128x128xf32> to vector<128x128xbf16>
    %c0_193 = arith.constant 0 : index
    %c384_194 = arith.constant 384 : index
    %170 = vector.load %arg11[%c0_193, %c384_194] : memref<128x1152xbf16, #tpu.memory_space<vmem>>, vector<128x128xbf16>
    tpu.vector_store %arg11[%c0_193, %c384_194], %169 {strides = array<i32>} : memref<128x1152xbf16, #tpu.memory_space<vmem>>, vector<128x128xbf16>,
    %c9_195 = arith.constant 9 : index
    %c1_196 = arith.constant 1 : index
    %c0_197 = arith.constant 0 : index
    %171 = vector.load %arg10[%c9_195, %c1_196, %c0_197] : memref<18x18x128xf32, #tpu.memory_space<vmem>>, vector<8x16x128xf32>
    %172 = vector.shape_cast %171 : vector<8x16x128xf32> to vector<128x128xf32>
    %173 = arith.truncf %172 : vector<128x128xf32> to vector<128x128xbf16>
    %c0_198 = arith.constant 0 : index
    %c512_199 = arith.constant 512 : index
    %174 = vector.load %arg11[%c0_198, %c512_199] : memref<128x1152xbf16, #tpu.memory_space<vmem>>, vector<128x128xbf16>
    tpu.vector_store %arg11[%c0_198, %c512_199], %173 {strides = array<i32>} : memref<128x1152xbf16, #tpu.memory_space<vmem>>, vector<128x128xbf16>,
    %c9_200 = arith.constant 9 : index
    %c2_201 = arith.constant 2 : index
    %c0_202 = arith.constant 0 : index
    %175 = vector.load %arg10[%c9_200, %c2_201, %c0_202] : memref<18x18x128xf32, #tpu.memory_space<vmem>>, vector<8x16x128xf32>
    %176 = vector.shape_cast %175 : vector<8x16x128xf32> to vector<128x128xf32>
    %177 = arith.truncf %176 : vector<128x128xf32> to vector<128x128xbf16>
    %c0_203 = arith.constant 0 : index
    %c640_204 = arith.constant 640 : index
    %178 = vector.load %arg11[%c0_203, %c640_204] : memref<128x1152xbf16, #tpu.memory_space<vmem>>, vector<128x128xbf16>
    tpu.vector_store %arg11[%c0_203, %c640_204], %177 {strides = array<i32>} : memref<128x1152xbf16, #tpu.memory_space<vmem>>, vector<128x128xbf16>,
    %c10_205 = arith.constant 10 : index
    %c0_206 = arith.constant 0 : index
    %c0_207 = arith.constant 0 : index
    %179 = vector.load %arg10[%c10_205, %c0_206, %c0_207] : memref<18x18x128xf32, #tpu.memory_space<vmem>>, vector<8x16x128xf32>
    %180 = vector.shape_cast %179 : vector<8x16x128xf32> to vector<128x128xf32>
    %181 = arith.truncf %180 : vector<128x128xf32> to vector<128x128xbf16>
    %c0_208 = arith.constant 0 : index
    %c768_209 = arith.constant 768 : index
    %182 = vector.load %arg11[%c0_208, %c768_209] : memref<128x1152xbf16, #tpu.memory_space<vmem>>, vector<128x128xbf16>
    tpu.vector_store %arg11[%c0_208, %c768_209], %181 {strides = array<i32>} : memref<128x1152xbf16, #tpu.memory_space<vmem>>, vector<128x128xbf16>,
    %c10_210 = arith.constant 10 : index
    %c1_211 = arith.constant 1 : index
    %c0_212 = arith.constant 0 : index
    %183 = vector.load %arg10[%c10_210, %c1_211, %c0_212] : memref<18x18x128xf32, #tpu.memory_space<vmem>>, vector<8x16x128xf32>
    %184 = vector.shape_cast %183 : vector<8x16x128xf32> to vector<128x128xf32>
    %185 = arith.truncf %184 : vector<128x128xf32> to vector<128x128xbf16>
    %c0_213 = arith.constant 0 : index
    %c896_214 = arith.constant 896 : index
    %186 = vector.load %arg11[%c0_213, %c896_214] : memref<128x1152xbf16, #tpu.memory_space<vmem>>, vector<128x128xbf16>
    tpu.vector_store %arg11[%c0_213, %c896_214], %185 {strides = array<i32>} : memref<128x1152xbf16, #tpu.memory_space<vmem>>, vector<128x128xbf16>,
    %c10_215 = arith.constant 10 : index
    %c2_216 = arith.constant 2 : index
    %c0_217 = arith.constant 0 : index
    %187 = vector.load %arg10[%c10_215, %c2_216, %c0_217] : memref<18x18x128xf32, #tpu.memory_space<vmem>>, vector<8x16x128xf32>
    %188 = vector.shape_cast %187 : vector<8x16x128xf32> to vector<128x128xf32>
    %189 = arith.truncf %188 : vector<128x128xf32> to vector<128x128xbf16>
    %c0_218 = arith.constant 0 : index
    %c1024_219 = arith.constant 1024 : index
    %190 = vector.load %arg11[%c0_218, %c1024_219] : memref<128x1152xbf16, #tpu.memory_space<vmem>>, vector<128x128xbf16>
    tpu.vector_store %arg11[%c0_218, %c1024_219], %189 {strides = array<i32>} : memref<128x1152xbf16, #tpu.memory_space<vmem>>, vector<128x128xbf16>,
    %c0_220 = arith.constant 0 : index
    %c0_221 = arith.constant 0 : index
    %191 = vector.load %arg11[%c0_220, %c0_221] : memref<128x1152xbf16, #tpu.memory_space<vmem>>, vector<128x1152xbf16>
    %c0_222 = arith.constant 0 : index
    %c0_223 = arith.constant 0 : index
    %192 = vector.load %arg5[%c0_222, %c0_223] : memref<1152x128xbf16, #tpu.memory_space<vmem>>, vector<1152x128xbf16>
    %cst_224 = arith.constant dense<0.000000e+00> : vector<128x128xf32>
    %193 = tpu.matmul %191, %192, %cst_224 {dimension_numbers = #tpu.dot_dimension_numbers<[1], [0], [0], [1], [0, 0, 1, 1], [], []>} : vector<128x1152xbf16>, vector<1152x128xbf16>, vector<128x128xf32> -> vector<128x128xf32>
    %c0_225 = arith.constant 0 : index
    %c0_226 = arith.constant 0 : index
    %194 = vector.load %arg6[%c0_225, %c0_226] : memref<1x128xf32, #tpu.memory_space<vmem>>, vector<1x128xf32>
    %195 = vector.broadcast %194 : vector<1x128xf32> to vector<128x128xf32>
    %196 = arith.mulf %193, %195 : vector<128x128xf32>
    %c0_227 = arith.constant 0 : index
    %c0_228 = arith.constant 0 : index
    %197 = vector.load %arg7[%c0_227, %c0_228] : memref<1x128xf32, #tpu.memory_space<vmem>>, vector<1x128xf32>
    %198 = vector.broadcast %197 : vector<1x128xf32> to vector<128x128xf32>
    %199 = arith.addf %196, %198 : vector<128x128xf32>
    %cst_229 = arith.constant 0.000000e+00 : f32
    %200 = vector.broadcast %cst_229 : f32 to vector<128x128xf32>
    %201 = arith.maximumf %199, %200 : vector<128x128xf32>
    %202 = vector.shape_cast %201 : vector<128x128xf32> to vector<1x8x16x128xf32>
    %c0_230 = arith.constant 0 : index
    %c8_231 = arith.constant 8 : index
    %c0_232 = arith.constant 0 : index
    %c0_233 = arith.constant 0 : index
    %203 = vector.load %arg8[%c0_230, %c8_231, %c0_232, %c0_233] : memref<1x16x16x128xf32, #tpu.memory_space<vmem>>, vector<1x8x16x128xf32>
    tpu.vector_store %arg8[%c0_230, %c8_231, %c0_232, %c0_233], %202 {strides = array<i32>} : memref<1x16x16x128xf32, #tpu.memory_space<vmem>>, vector<1x8x16x128xf32>,
    return
  }
  func.func @transform_0(%arg0: i32) -> (i32, i32, i32, i32) {
    %c0_i32 = arith.constant 0 : i32
    %c0_i32_0 = arith.constant 0 : i32
    %c0_i32_1 = arith.constant 0 : i32
    %c0_i32_2 = arith.constant 0 : i32
    return %arg0, %c0_i32, %c0_i32_0, %c0_i32_1 : i32, i32, i32, i32
  }
  func.func @transform_1(%arg0: i32) -> (i32, i32) {
    %c0_i32 = arith.constant 0 : i32
    %c0_i32_0 = arith.constant 0 : i32
    %c0_i32_1 = arith.constant 0 : i32
    return %c0_i32, %c0_i32_0 : i32, i32
  }
  func.func @transform_2(%arg0: i32) -> (i32, i32) {
    %c0_i32 = arith.constant 0 : i32
    %c0_i32_0 = arith.constant 0 : i32
    %c0_i32_1 = arith.constant 0 : i32
    return %c0_i32, %c0_i32_0 : i32, i32
  }
  func.func @transform_3(%arg0: i32) -> (i32, i32) {
    %c0_i32 = arith.constant 0 : i32
    %c0_i32_0 = arith.constant 0 : i32
    %c0_i32_1 = arith.constant 0 : i32
    return %c0_i32, %c0_i32_0 : i32, i32
  }
  func.func @transform_4(%arg0: i32) -> (i32, i32) {
    %c0_i32 = arith.constant 0 : i32
    %c0_i32_0 = arith.constant 0 : i32
    %c0_i32_1 = arith.constant 0 : i32
    return %c0_i32, %c0_i32_0 : i32, i32
  }
  func.func @transform_5(%arg0: i32) -> (i32, i32) {
    %c0_i32 = arith.constant 0 : i32
    %c0_i32_0 = arith.constant 0 : i32
    %c0_i32_1 = arith.constant 0 : i32
    return %c0_i32, %c0_i32_0 : i32, i32
  }
  func.func @transform_6(%arg0: i32) -> (i32, i32) {
    %c0_i32 = arith.constant 0 : i32
    %c0_i32_0 = arith.constant 0 : i32
    %c0_i32_1 = arith.constant 0 : i32
    return %c0_i32, %c0_i32_0 : i32, i32
  }
  func.func @transform_7(%arg0: i32) -> (i32, i32, i32, i32) {
    %c0_i32 = arith.constant 0 : i32
    %c0_i32_0 = arith.constant 0 : i32
    %c0_i32_1 = arith.constant 0 : i32
    %c0_i32_2 = arith.constant 0 : i32
    return %arg0, %c0_i32, %c0_i32_0, %c0_i32_1 : i32, i32, i32, i32
  }
}

</mosaic_0001>

<bundles_post_ra>
// kernel: tpu_custom_call.1
= control target key start
LH: loop header
LB: loop body
LE: loop exit
PB: predicated region body
PF: predicated region fallthrough
CT: control target
= control target key end

     0   :  { %12 = vsyncpa [#allocation6], 0  ;;  %s10226_s0 = inlined_call_operand.vmem [shape: bf16[2,16,16,4], index: 0, kind: input, shape index: {}]   ;;  %s10227_s1 = inlined_call_operand.hbm [shape: bf16[1152,128], index: 1, kind: input, shape index: {}]   ;;  %s10228_s2 = inlined_call_operand.vmem [shape: f32[1,128], index: 2, kind: input, shape index: {}]   ;;  %s10229_s3 = inlined_call_operand.vmem [shape: f32[1,128], index: 3, kind: input, shape index: {}]   ;;  %s10230_s4 = inlined_call_operand.hbm [shape: bf16[1152,128], index: 4, kind: input, shape index: {}]   ;;  %s10231_s5 = inlined_call_operand.vmem [shape: f32[1,128], index: 5, kind: input, shape index: {}]   ;;  %s10232_s6 = inlined_call_operand.vmem [shape: f32[1,128], index: 6, kind: input, shape index: {}]   ;;  %s10233_s7 = inlined_call_operand.hbm [shape: f32[2,16,16,128], index: 7, kind: output, shape index: {}]  }
   0x1   :  { %13 = vsyncpa [#allocation9], 0 }
   0x2   :  { %14 = vsyncpa [#allocation7], 0 }
   0x3   :  { %16 = vsyncpa [#allocation7 + $0x1], 0  ;;  %s8775_s24 = smov 0   ;;  %s8777_s25 = smov 0  }
   0x4   :  { %s8779_s26 = smov 0   ;;  %s8781_s27 = smov 0  }
   0x5 LB: > { %s8796_s28 = sadd.s32 4294967295, %s8724_s27   ;;  %s6618_s29 = sadd.s32 4294967294, %s8724_s27   ;;  %s8724_s27 = sphi %s8781_s27, %s10253_s27   ;;  %s8720_s26 = sphi %s8779_s26, %s10252_s26   ;;  %s8716_s25 = sphi %s8777_s25, %s10251_s25   ;;  %s8712_s24 = sphi %s8775_s24, %s10250_s24  }
   0x6   : > { %s8800_s30 = sadd.s32 1, %s8724_s27   ;;  %s181_s8 = sadd.s32 1, %s8720_s26 }
   0x7   : > { %s178_s9 = ssub.s32 %s8724_s27, %s8800_s30  ;;  %p191_p0 = scmp.ne.s32.totalorder %s8720_s26, %s8716_s25 }
   0x8   : > { %p179_p1 = scmp.eq.s32.totalorder %s178_s9, 0  ;;  %p192_p2 = scmp.eq.s32.totalorder %s8796_s28, 1 }
   0x9   : > { %p197_p3 = scmp.ne.s32.totalorder %s8716_s25, %s8712_s24  ;;  %p198_p4 = scmp.eq.s32.totalorder %s6618_s29, 1 }
   0xa   : > { %s8811_s10 = scalar_select %p179_p1, %s8720_s26, %s181_s8  }
   0xb   : > { %p8813_p5 = por %p192_p2, %p191_p0  ;;  %p8817_p6 = por %p198_p4, %p197_p3 }
   0xc   : > { %10237 = sst [smem:[#allocation14_spill]] %s8811_s10  ;;  %p6619_p7 = scmp.ge.s32.totalorder %s8724_s27, 1 }
   0xd   : > { %s10238_s11 = scalar_select %p8813_p5, 1, 0 }
   0xe   : > { %s10239_s12 = scalar_select %p8817_p6, 1, 0 }
   0xf   : > { %p205_p8 = scmp.lt.s32.totalorder %s8724_s27, 3  ;;  %p10234_p9 = scmp.eq.s32.totalorder %s8796_s28, 0 }
  0x10   : > { %s8726_s14 = smov [#allocation5]   ;;  %s8727_s17 = smov [#allocation8]  }
  0x11   : > { %p8824_p10 = pnand %p6619_p7, %p205_p8  ;;  %s217_s15 = sshll.u32 %s8726_s14, 4  ;;  %s218_s15 = int_to_ptr.vmem [resolvable:$true] %s217_s15 }
  0x12   : > { %s236_s18 = sshll.u32 %s8727_s17, 4  ;;  %s8598_s21 = scalar_lea.hbm %s10227_s1, 9216  ;;  %s8836_s18 = int_to_ptr.vmem [resolvable:$true] %s236_s18 }
  0x13   : > { %s10240_s13 = scalar_select %p8824_p10, 1, 0 }
  0x14   : > { %p8253_p11 = pneg %p8824_p10  ;;  %p8599_p13 = scmp.ne.s32.totalorder %s10227_s1, %s8598_s21 }
  0x15   : > { %p8605_p3 = scmp.lt.u32.totalorder %s8598_s21, %s10227_s1 }
  0x16   : > { %p8832_p12 = pnand %p10234_p9, %p8253_p11 }
  0x18   : > { %p8600_p0 = pneg %p8832_p12 }
  0x1a   : > { %p8601_p1 = pnand %p8600_p0, %p8599_p13 }
  0x1c   : > { %p8602_p2 = pneg %p8601_p1 }
  0x1e   : > { %p8607_p4 = pnand %p8605_p3, %p8602_p2 }
  0x20   : > { %8610 = shalt.err (!%p8607_p4)
}
  0x21   : > { %s8611_s9 = scalar_lea.vmem %s218_s15, 9216  ;;  %p8619_p9 = scmp.lt.s32.totalorder %s218_s15, %s218_s15 }
  0x22   : > { %p8612_p7 = scmp.ne.s32.totalorder %s218_s15, %s8611_s9  ;;  %p8620_p6 = scmp.lt.s32.totalorder %s8611_s9, %s8611_s9 }
  0x24   : > { %p8614_p8 = pnand %p8612_p7, %p8600_p0  ;;  %p8621_p5 = por %p8620_p6, %p8619_p9 }
  0x26   : > { %p8615_p11 = pneg %p8614_p8 }
  0x28   : > { %p8622_p10 = pnand %p8621_p5, %p8615_p11 }
  0x2a   : > { %8625 = shalt.err (!%p8622_p10)
}
  0x2b   : > { %s8728_s14 = smov 64   ;;  %s8729_s17 = smov 4  }
  0x2c   : > { %8256 = dma.hbm_to_vmem [thread:$0]  (!%p8832_p12), %s10227_s1, 9216, %s218_s15, [#allocation6], %s8728_s14, %s8728_s14, %s8729_s17  }
  0x2d   : > { %s8626_s23 = scalar_lea.hbm %s10230_s4, 9216 }
  0x2e   : > { %p8627_p13 = scmp.ne.s32.totalorder %s10230_s4, %s8626_s23  ;;  %p8633_p9 = scmp.lt.u32.totalorder %s8626_s23, %s10230_s4 }
  0x30   : > { %p8629_p5 = pnand %p8627_p13, %p8600_p0 }
  0x32   : > { %p8630_p6 = pneg %p8629_p5 }
  0x34   : > { %p8635_p10 = pnand %p8633_p9, %p8630_p6 }
  0x36   : > { %8638 = shalt.err (!%p8635_p10)
}
  0x37   : > { %s8639_s15 = scalar_lea.vmem %s8836_s18, 9216  ;;  %p8647_p4 = scmp.lt.s32.totalorder %s8836_s18, %s8836_s18 }
  0x38   : > { %p8640_p1 = scmp.ne.s32.totalorder %s8836_s18, %s8639_s15  ;;  %p8648_p7 = scmp.lt.s32.totalorder %s8639_s15, %s8639_s15 }
  0x3a   : > { %p8642_p2 = pnand %p8640_p1, %p8600_p0  ;;  %p8649_p8 = por %p8648_p7, %p8647_p4 }
  0x3c   : > { %p8643_p3 = pneg %p8642_p2 }
  0x3e   : > { %p8650_p11 = pnand %p8649_p8, %p8643_p3 }
  0x40   : > { %8653 = shalt.err (!%p8650_p11)
}
  0x41   : > { %8259 = dma.hbm_to_vmem [thread:$0]  (!%p8832_p12), %s10230_s4, 9216, %s8836_s18, [#allocation9], %s8728_s14, %s8728_s14, %s8729_s17  }
  0x42   : > { %p10242_p13 = scmp.ne.s32.totalorder %s10240_s13, 0 }
  0x43   : > { %p10243_p5 = scmp.eq.s32.totalorder (!%p10242_p13), %s8796_s28, 0 }
  0x44   : > { %266 = sbr.rel (%p10242_p13) target bundleno = 1033 (0x409), region = 48 }
  0x4b   : > { %8699 = dma.done.wait (%p10243_p5), [#allocation6], 9216   ;;  %p10244_p0 = pmov %p10243_p5 }
  0x4d   : > { %8701 = vsyncadd (%p10244_p0), [#allocation6], 4294958080  ;;  %p10245_p6 = pmov %p10244_p0 }
  0x4e   : > { %p10246_p9 = pmov %p10244_p0 }
  0x4f   : > { %8703 = dma.done.wait (%p10245_p6), [#allocation9], 9216  }
  0x50   : > { %8705 = vsyncadd (%p10246_p9), [#allocation9], 4294958080  ;;  %v8730_v0 = vmov 0.0   ;;  %v8308_v1 = vld [vmem:[#allocation5 + $0x40] sm:$0xff]   ;;  %v8312_v5 = vld [vmem:[#allocation5 + $0x48] sm:$0xff]   ;;  %p302_p12 = scmp.lt.s32.totalorder %s8796_s28, 1 }
  0x51   : > { %308 = vst [vmem:[#allocation2] sm:$0xff] %v8730_v0  ;;  %309 = vst [vmem:[#allocation2 + $0x8] sm:$0xff] %v8730_v0  ;;  %v8309_v2 = vld [vmem:[#allocation5 + $0xc0] sm:$0xff]   ;;  %7027 = vmatprep.subr.bf16.mxu0 %v8308_v1  ;;  %v8313_v6 = vld [vmem:[#allocation5 + $0xc8] sm:$0xff]   ;;  %vm481_vm0 = vcmask 31744   ;;  %v8731_v41 = vmov 0.0|0.0  }
  0x52   : > { %310 = vst [vmem:[#allocation2 + $0x10] sm:$0x3] %v8730_v0  ;;  %311 = vst [vmem:[#allocation2 + $0x18] sm:$0xff] %v8730_v0  ;;  %v8310_v3 = vld [vmem:[#allocation5] sm:$0xff]   ;;  %7091 = vmatprep.subr.bf16.mxu1 %v8309_v2  ;;  %v8314_v7 = vld [vmem:[#allocation5 + $0x8] sm:$0xff]   ;;  %s303_s13 = scalar_select %p302_p12, %s8796_s28, 1 }
  0x53   : > { %312 = vst [vmem:[#allocation2 + $0x20] sm:$0xff] %v8730_v0  ;;  %313 = vst [vmem:[#allocation2 + $0x28] sm:$0x3] %v8730_v0  ;;  %v8311_v4 = vld [vmem:[#allocation5 + $0x80] sm:$0xff]   ;;  %7028 = vmatpush3.bf16.msra.mxu0 %v8310_v3  ;;  %v8315_v8 = vld [vmem:[#allocation5 + $0x88] sm:$0xff]   ;;  %s299_s10 = sand.u32 1, %s8716_s25  }
  0x54   : > { %314 = vst [vmem:[#allocation2 + $0x30] sm:$0xff] %v8730_v0  ;;  %315 = vst [vmem:[#allocation2 + $0x38] sm:$0xff] %v8730_v0  ;;  %7092 = vmatpush3.bf16.msra.mxu1 %v8311_v4  ;;  %7029 = vmatprep.subr.bf16.mxu0 %v8312_v5  ;;  %v8316_v9 = vld [vmem:[#allocation5 + $0x50] sm:$0xff]   ;;  %v8320_v13 = vld [vmem:[#allocation5 + $0x58] sm:$0xff]   ;;  %s6946_s16 = sshll.u32 %s303_s13, 7  ;;  %s6626_s14 = sshll.u32 %s299_s10, 8 }
  0x55   : > { %316 = vst [vmem:[#allocation2 + $0x40] sm:$0x3] %v8730_v0  ;;  %317 = vst [vmem:[#allocation2 + $0x48] sm:$0xff] %v8730_v0  ;;  %7093 = vmatprep.subr.bf16.mxu1 %v8313_v6  ;;  %v8317_v10 = vld [vmem:[#allocation5 + $0xd0] sm:$0xff]   ;;  %v8321_v14 = vld [vmem:[#allocation5 + $0xd8] sm:$0xff]   ;;  %s9008_s17 = scalar_lea.vmem %s10226_s0, %s6946_s16  ;;  %s6947_s20 = sshll.u32 %s8796_s28, 12 }
  0x56   : > { %318 = vst [vmem:[#allocation2 + $0x50] sm:$0xff] %v8730_v0  ;;  %319 = vst [vmem:[#allocation2 + $0x58] sm:$0x3] %v8730_v0  ;;  %v8318_v11 = vld [vmem:[#allocation5 + $0x10] sm:$0xff]   ;;  %v8322_v15 = vld [vmem:[#allocation5 + $0x18] sm:$0xff]   ;;  %s10176_s29 = scalar_lea.hbm %s10233_s7, %s6947_s20  ;;  %s10185_s28 = scalar_lea.sflag [#allocation7], %s299_s10 }
  0x57   : > { %320 = vst [vmem:[#allocation2 + $0x60] sm:$0xff] %v8730_v0  ;;  %321 = vst [vmem:[#allocation2 + $0x68] sm:$0xff] %v8730_v0  ;;  %7030 = vmatpush3.bf16.msra.mxu0 %v8314_v7  ;;  %v8319_v12 = vld [vmem:[#allocation5 + $0x90] sm:$0xff]   ;;  %v8323_v16 = vld [vmem:[#allocation5 + $0x98] sm:$0xff]   ;;  %p10247_p1 = scmp.ne.s32.totalorder %s10238_s11, 0  ;;  %s8732_s9 = smov [#allocation10]  }
  0x58   : > { %322 = vst [vmem:[#allocation2 + $0x70] sm:$0x3] %v8730_v0  ;;  %323 = vst [vmem:[#allocation2 + $0x78] sm:$0xff] %v8730_v0  ;;  %7094 = vmatpush3.bf16.msra.mxu1 %v8315_v8  ;;  %7031 = vmatprep.subr.bf16.mxu0 %v8316_v9  ;;  %v8324_v17 = vld [vmem:[#allocation5 + $0x60] sm:$0xff]   ;;  %v8328_v21 = vld [vmem:[#allocation5 + $0x68] sm:$0xff]   ;;  %s8658_s15 = sshll.u32 %s8732_s9, 4  ;;  %s8659_s15 = int_to_ptr.vmem [resolvable:$false] %s8658_s15 }
  0x59   : > { %324 = vst [vmem:[#allocation2 + $0x80] sm:$0xff] %v8730_v0  ;;  %325 = vst [vmem:[#allocation2 + $0x88] sm:$0x3] %v8730_v0  ;;  %7095 = vmatprep.subr.bf16.mxu1 %v8317_v10  ;;  %v8325_v18 = vld [vmem:[#allocation5 + $0xe0] sm:$0xff]   ;;  %v8329_v22 = vld [vmem:[#allocation5 + $0xe8] sm:$0xff]   ;;  %s8660_s19 = scalar_lea.vmem %s8659_s15, 8192 }
  0x5a   : > { %326 = vst [vmem:[#allocation2 + $0x90] sm:$0xff] %v8730_v0  ;;  %327 = vst [vmem:[#allocation2 + $0x98] sm:$0xff] %v8730_v0  ;;  %v8326_v19 = vld [vmem:[#allocation5 + $0x20] sm:$0xff]   ;;  %v8330_v23 = vld [vmem:[#allocation5 + $0x28] sm:$0xff]  }
  0x5b   : > { %328 = vst [vmem:[#allocation2 + $0xa0] sm:$0x3] %v8730_v0  ;;  %329 = vst [vmem:[#allocation2 + $0xa8] sm:$0xff] %v8730_v0  ;;  %7032 = vmatpush3.bf16.msra.mxu0 %v8318_v11  ;;  %v8327_v20 = vld [vmem:[#allocation5 + $0xa0] sm:$0xff]   ;;  %v8331_v24 = vld [vmem:[#allocation5 + $0xa8] sm:$0xff]  }
  0x5c   : > { %330 = vst [vmem:[#allocation2 + $0xb0] sm:$0xff] %v8730_v0  ;;  %331 = vst [vmem:[#allocation2 + $0xb8] sm:$0x3] %v8730_v0  ;;  %7096 = vmatpush3.bf16.msra.mxu1 %v8319_v12  ;;  %7033 = vmatprep.subr.bf16.mxu0 %v8320_v13  ;;  %v8332_v25 = vld [vmem:[#allocation5 + $0x70] sm:$0xff]   ;;  %v8336_v29 = vld [vmem:[#allocation5 + $0x78] sm:$0xff]  }
  0x5d   : > { %332 = vst [vmem:[#allocation2 + $0xc0] sm:$0xff] %v8730_v0  ;;  %333 = vst [vmem:[#allocation2 + $0xc8] sm:$0xff] %v8730_v0  ;;  %7097 = vmatprep.subr.bf16.mxu1 %v8321_v14  ;;  %v8333_v26 = vld [vmem:[#allocation5 + $0xf0] sm:$0xff]   ;;  %v8337_v30 = vld [vmem:[#allocation5 + $0xf8] sm:$0xff]  }
  0x5e   : > { %334 = vst [vmem:[#allocation2 + $0xd0] sm:$0x3] %v8730_v0  ;;  %335 = vst [vmem:[#allocation2 + $0xd8] sm:$0xff] %v8730_v0  ;;  %v8334_v27 = vld [vmem:[#allocation5 + $0x30] sm:$0xff]   ;;  %v8338_v31 = vld [vmem:[#allocation5 + $0x38] sm:$0xff]  }
  0x5f   : > { %336 = vst [vmem:[#allocation2 + $0xe0] sm:$0xff] %v8730_v0  ;;  %337 = vst [vmem:[#allocation2 + $0xe8] sm:$0x3] %v8730_v0  ;;  %7034 = vmatpush3.bf16.msra.mxu0 %v8322_v15  ;;  %v8335_v28 = vld [vmem:[#allocation5 + $0xb0] sm:$0xff]   ;;  %v8339_v32 = vld [vmem:[#allocation5 + $0xb8] sm:$0xff]  }
  0x60   : > { %338 = vst [vmem:[#allocation2 + $0xf0] sm:$0xff] %v8730_v0  ;;  %339 = vst [vmem:[#allocation2 + $0xf8] sm:$0xff] %v8730_v0  ;;  %7098 = vmatpush3.bf16.msra.mxu1 %v8323_v16  ;;  %7035 = vmatprep.subr.bf16.mxu0 %v8324_v17  ;;  %v546_v33 = vld [vmem:[#allocation2 + $0x1] sm:$0xff]  ;;  %v547_v34 = vld [vmem:[#allocation2 + $0x9] sm:$0xff] }
  0x61   : > { %340 = vst [vmem:[#allocation2 + $0x100] sm:$0x3] %v8730_v0  ;;  %341 = vst [vmem:[#allocation2 + $0x108] sm:$0xff] %v8730_v0  ;;  %7099 = vmatprep.subr.bf16.mxu1 %v8325_v18  ;;  %v6949_v35 = vld [vmem:[%s9008_s17] sm:$0xff]   ;;  %v562_v36 = vpack.c.bf16 %v547_v34, %v546_v33  ;;  %v7012_v40 = vld [vmem:[%s9008_s17 + $0x8] sm:$0xff]  }
  0x62   : > { %342 = vst [vmem:[#allocation2 + $0x110] sm:$0xff] %v8730_v0  ;;  %343 = vst [vmem:[#allocation2 + $0x118] sm:$0x3] %v8730_v0  ;;  %v6950_v37 = vunpack.c.l.bf16 %v6949_v35  ;;  %v6951_v38 = vunpack.c.h.bf16 %v6949_v35  ;;  %v8340_v39 = vld [vmem:[#allocation5 + $0x1c0] sm:$0xff]   ;;  %v6954_v42 = vunpack.c.l.bf16 %v7012_v40  ;;  %v6955_v43 = vunpack.c.h.bf16 %v7012_v40  ;;  %v579_v47 = vld [vmem:[#allocation2 + $0xa] sm:$0xff] }
  0x63   : > { %344 = vst [vmem:[#allocation2 + $0x120] sm:$0xff] %v8730_v0  ;;  %345 = vst [vmem:[#allocation2 + $0x128] sm:$0xff] %v8730_v0  ;;  %7036 = vmatpush3.bf16.msra.mxu0 %v8326_v19  ;;  %1483 = vmatprep.mubr.bf16.mxu0 %v562_v36  ;;  %v8342_v44 = vld [vmem:[#allocation5 + $0x140] sm:$0xff]   ;;  %v7013_v48 = vld [vmem:[%s9008_s17 + $0x10] sm:$0xff]  }
  0x64   : > { %346 = vst [vmem:[#allocation2 + $0x130] sm:$0x3] %v8730_v0  ;;  %347 = vst [vmem:[#allocation2 + $0x138] sm:$0xff] %v8730_v0  ;;  %7100 = vmatpush3.bf16.msra.mxu1 %v8327_v20  ;;  %7037 = vmatprep.subr.bf16.mxu0 %v8328_v21  ;;  %v578_v45 = vld [vmem:[#allocation2 + $0x2] sm:$0xff]  ;;  %v6958_v49 = vunpack.c.l.bf16 %v7013_v48  ;;  %v6959_v50 = vunpack.c.h.bf16 %v7013_v48  ;;  %v8347_v7 = vld [vmem:[#allocation5 + $0x1d0] sm:$0xff]  }
  0x65   : > { %348 = vst [vmem:[#allocation2 + $0x140] sm:$0xff] %v8730_v0  ;;  %349 = vst [vmem:[#allocation2 + $0x148] sm:$0x3] %v8730_v0  ;;  %7101 = vmatprep.subr.bf16.mxu1 %v8329_v22  ;;  %v8344_v46 = vld [vmem:[#allocation5 + $0x100] sm:$0xff]   ;;  %v8346_v51 = vld [vmem:[#allocation5 + $0x148] sm:$0xff]   ;;  %v594_v54 = vpack.c.bf16 %v579_v47, %v578_v45 }
  0x66   : > { %350 = vst [vmem:[#allocation2 + $0x150] sm:$0xff] %v8730_v0  ;;  %351 = vst [vmem:[#allocation2 + $0x158] sm:$0xff] %v8730_v0  ;;  %v8341_v57 = vld [vmem:[#allocation5 + $0x180] sm:$0xff]   ;;  %v8343_v60 = vld [vmem:[#allocation5 + $0x1c8] sm:$0xff]  }
  0x67   : > { %352 = vst [vmem:[#allocation2 + $0x160] sm:$0x3] %v8730_v0  ;;  %353 = vst [vmem:[#allocation2 + $0x168] sm:$0xff] %v8730_v0  ;;  %7038 = vmatpush3.bf16.msra.mxu0 %v8330_v23  ;;  %v8345_v63 = vld [vmem:[#allocation5 + $0x188] sm:$0xff]   ;;  %v7014_v8 = vld [vmem:[%s9008_s17 + $0x18] sm:$0xff]  }
  0x68   : > { %354 = vst [vmem:[#allocation2 + $0x170] sm:$0xff] %v8730_v0  ;;  %355 = vst [vmem:[#allocation2 + $0x178] sm:$0x3] %v8730_v0  ;;  %7102 = vmatpush3.bf16.msra.mxu1 %v8331_v24  ;;  %7039 = vmatprep.subr.bf16.mxu0 %v8332_v25  ;;  %v8348_v6 = vld [vmem:[#allocation5 + $0x108] sm:$0xff]   ;;  %v6962_v9 = vunpack.c.l.bf16 %v7014_v8  ;;  %v6963_v10 = vunpack.c.h.bf16 %v7014_v8  ;;  %v8350_v11 = vld [vmem:[#allocation5 + $0x150] sm:$0xff]  }
  0x69   : > { %356 = vst [vmem:[#allocation2 + $0x180] sm:$0xff] %v8730_v0  ;;  %357 = vst [vmem:[#allocation2 + $0x188] sm:$0xff] %v8730_v0  ;;  %7103 = vmatprep.subr.bf16.mxu1 %v8333_v26  ;;  %v8349_v17 = vld [vmem:[#allocation5 + $0x190] sm:$0xff]   ;;  %v8351_v20 = vld [vmem:[#allocation5 + $0x1d8] sm:$0xff]  }
  0x6a   : > { %358 = vst [vmem:[#allocation2 + $0x190] sm:$0x3] %v8730_v0  ;;  %359 = vst [vmem:[#allocation2 + $0x198] sm:$0xff] %v8730_v0  ;;  %v8352_v23 = vld [vmem:[#allocation5 + $0x110] sm:$0xff]   ;;  %v8353_v24 = vld [vmem:[#allocation5 + $0x198] sm:$0xff]  }
  0x6b   : > { %360 = vst [vmem:[#allocation2 + $0x1a0] sm:$0xff] %v8730_v0  ;;  %361 = vst [vmem:[#allocation2 + $0x1a8] sm:$0x3] %v8730_v0  ;;  %7040 = vmatpush3.bf16.msra.mxu0 %v8334_v27  ;;  %v7015_v25 = vld [vmem:[%s9008_s17 + $0x20] sm:$0xff]   ;;  %v8359_v45 = vld [vmem:[#allocation5 + $0x1e8] sm:$0xff]  }
  0x6c   : > { %362 = vst [vmem:[#allocation3] sm:$0xff] %v8730_v0  ;;  %363 = vst [vmem:[#allocation3 + $0x8] sm:$0xff] %v8730_v0  ;;  %7104 = vmatpush3.bf16.msra.mxu1 %v8335_v28  ;;  %7041 = vmatprep.subr.bf16.mxu0 %v8336_v29  ;;  %v6966_v26 = vunpack.c.l.bf16 %v7015_v25  ;;  %v6967_v27 = vunpack.c.h.bf16 %v7015_v25  ;;  %v8354_v28 = vld [vmem:[#allocation5 + $0x158] sm:$0xff]   ;;  %v8355_v29 = vld [vmem:[#allocation5 + $0x1e0] sm:$0xff]  }
  0x6d   : > { %364 = vst [vmem:[#allocation3 + $0x10] sm:$0x3] %v8730_v0  ;;  %365 = vst [vmem:[#allocation3 + $0x18] sm:$0xff] %v8730_v0  ;;  %7105 = vmatprep.subr.bf16.mxu1 %v8337_v30  ;;  %v8356_v30 = vld [vmem:[#allocation5 + $0x118] sm:$0xff]  }
  0x6e   : > { %366 = vst [vmem:[#allocation3 + $0x20] sm:$0xff] %v8730_v0  ;;  %367 = vst [vmem:[#allocation3 + $0x28] sm:$0x3] %v8730_v0  ;;  %v8369_v25 = vld [vmem:[#allocation5 + $0x1b8] sm:$0xff]  }
  0x6f   : > { %368 = vst [vmem:[#allocation3 + $0x30] sm:$0xff] %v8730_v0  ;;  %369 = vst [vmem:[#allocation3 + $0x38] sm:$0xff] %v8730_v0  ;;  %7042 = vmatpush3.bf16.msra.mxu0 %v8338_v31 }
  0x70   : > { %370 = vst [vmem:[#allocation3 + $0x40] sm:$0x3] %v8730_v0  ;;  %371 = vst [vmem:[#allocation3 + $0x48] sm:$0xff] %v8730_v0  ;;  %7106 = vmatpush3.bf16.msra.mxu1 %v8339_v32  ;;  %7155 = vmatprep.subr.bf16.mxu0 %v8342_v44  ;;  %v8358_v44 = vld [vmem:[#allocation5 + $0x160] sm:$0xff]  }
  0x71   : > { %372 = vst [vmem:[#allocation3 + $0x50] sm:$0xff] %v8730_v0  ;;  %373 = vst [vmem:[#allocation3 + $0x58] sm:$0x3] %v8730_v0  ;;  %7219 = vmatprep.subr.bf16.mxu1 %v8340_v39 }
  0x72   : > { %374 = vst [vmem:[#allocation3 + $0x60] sm:$0xff] %v8730_v0  ;;  %375 = vst [vmem:[#allocation3 + $0x68] sm:$0xff] %v8730_v0  ;;  %1484 = vmatmul.mubr.bf16.vlgmr.msra.gmra.mrb[0].mxu0 %v8731_v41  ;;  %v7016_v41 = vld [vmem:[%s9008_s17 + $0x28] sm:$0xff]  }
  0x73   : > { %376 = vst [vmem:[#allocation3 + $0x70] sm:$0x3] %v8730_v0  ;;  %377 = vst [vmem:[#allocation3 + $0x78] sm:$0xff] %v8730_v0  ;;  %7156 = vmatpush3.bf16.msra.mxu0 %v8344_v46 }
  0x74   : > { %378 = vst [vmem:[#allocation3 + $0x80] sm:$0xff] %v8730_v0  ;;  %379 = vst [vmem:[#allocation3 + $0x88] sm:$0x3] %v8730_v0  ;;  %7157 = vmatprep.subr.bf16.mxu0 %v8346_v51  ;;  %v8360_v51 = vld [vmem:[#allocation5 + $0x120] sm:$0xff]  }
  0x75   : > { %380 = vst [vmem:[#allocation3 + $0x90] sm:$0xff] %v8730_v0  ;;  %381 = vst [vmem:[#allocation3 + $0x98] sm:$0xff] %v8730_v0 }
  0x76   : > { %382 = vst [vmem:[#allocation3 + $0xa0] sm:$0x3] %v8730_v0  ;;  %383 = vst [vmem:[#allocation3 + $0xa8] sm:$0xff] %v8730_v0 }
  0x77   : > { %384 = vst [vmem:[#allocation3 + $0xb0] sm:$0xff] %v8730_v0  ;;  %385 = vst [vmem:[#allocation3 + $0xb8] sm:$0x3] %v8730_v0  ;;  %7158 = vmatpush3.bf16.msra.mxu0 %v8348_v6  ;;  %v8365_v6 = vld [vmem:[#allocation5 + $0x1b0] sm:$0xff]  }
  0x78   : > { %386 = vst [vmem:[#allocation3 + $0xc0] sm:$0xff] %v8730_v0  ;;  %387 = vst [vmem:[#allocation3 + $0xc8] sm:$0xff] %v8730_v0  ;;  %7159 = vmatprep.subr.bf16.mxu0 %v8350_v11  ;;  %v8366_v11 = vld [vmem:[#allocation5 + $0x170] sm:$0xff]  }
  0x79   : > { %388 = vst [vmem:[#allocation3 + $0xd0] sm:$0x3] %v8730_v0  ;;  %389 = vst [vmem:[#allocation3 + $0xd8] sm:$0xff] %v8730_v0 }
  0x7a   : > { %390 = vst [vmem:[#allocation3 + $0xe0] sm:$0xff] %v8730_v0  ;;  %391 = vst [vmem:[#allocation3 + $0xe8] sm:$0x3] %v8730_v0 }
  0x7b   : > { %392 = vst [vmem:[#allocation3 + $0xf0] sm:$0xff] %v8730_v0  ;;  %393 = vst [vmem:[#allocation3 + $0xf8] sm:$0xff] %v8730_v0  ;;  %7160 = vmatpush3.bf16.msra.mxu0 %v8352_v23 }
  0x7c   : > { %394 = vst [vmem:[#allocation3 + $0x100] sm:$0x3] %v8730_v0  ;;  %395 = vst [vmem:[#allocation3 + $0x108] sm:$0xff] %v8730_v0  ;;  %7161 = vmatprep.subr.bf16.mxu0 %v8354_v28 }
  0x7d   : > { %396 = vst [vmem:[#allocation3 + $0x110] sm:$0xff] %v8730_v0  ;;  %397 = vst [vmem:[#allocation3 + $0x118] sm:$0x3] %v8730_v0 }
  0x7e   : > { %398 = vst [vmem:[#allocation3 + $0x120] sm:$0xff] %v8730_v0  ;;  %399 = vst [vmem:[#allocation3 + $0x128] sm:$0xff] %v8730_v0 }
  0x7f   : > { %400 = vst [vmem:[#allocation3 + $0x130] sm:$0x3] %v8730_v0  ;;  %401 = vst [vmem:[#allocation3 + $0x138] sm:$0xff] %v8730_v0  ;;  %7162 = vmatpush3.bf16.msra.mxu0 %v8356_v30 }
  0x80   : > { %402 = vst [vmem:[#allocation3 + $0x140] sm:$0xff] %v8730_v0  ;;  %403 = vst [vmem:[#allocation3 + $0x148] sm:$0x3] %v8730_v0  ;;  %7163 = vmatprep.subr.bf16.mxu0 %v8358_v44 }
  0x81   : > { %404 = vst [vmem:[#allocation3 + $0x150] sm:$0xff] %v8730_v0  ;;  %405 = vst [vmem:[#allocation3 + $0x158] sm:$0xff] %v8730_v0 }
  0x82   : > { %406 = vst [vmem:[#allocation3 + $0x160] sm:$0x3] %v8730_v0  ;;  %407 = vst [vmem:[#allocation3 + $0x168] sm:$0xff] %v8730_v0 }
  0x83   : > { %408 = vst [vmem:[#allocation3 + $0x170] sm:$0xff] %v8730_v0  ;;  %409 = vst [vmem:[#allocation3 + $0x178] sm:$0x3] %v8730_v0  ;;  %7164 = vmatpush3.bf16.msra.mxu0 %v8360_v51  ;;  %v8373_v51 = vld [vmem:[#allocation5] sm:$0xff]  }
  0x84   : > { %410 = vst [vmem:[#allocation3 + $0x180] sm:$0xff] %v8730_v0  ;;  %411 = vst [vmem:[#allocation3 + $0x188] sm:$0xff] %v8730_v0 }
  0x85   : > { %412 = vst [vmem:[#allocation3 + $0x190] sm:$0x3] %v8730_v0  ;;  %413 = vst [vmem:[#allocation3 + $0x198] sm:$0xff] %v8730_v0 }
  0x86   : > { %414 = vst [vmem:[#allocation3 + $0x1a0] sm:$0xff] %v8730_v0  ;;  %415 = vst [vmem:[#allocation3 + $0x1a8] sm:$0x3] %v8730_v0 }
  0x87   : > { %482 = vst.msk [vmem:[#allocation2 + $0x19] sm:$0xff] %vm481_vm0, %v6950_v37  ;;  %483 = vst.msk [vmem:[#allocation2 + $0x21] sm:$0xff] %vm481_vm0, %v6951_v38  ;;  %v8357_v38 = vld [vmem:[#allocation5 + $0x1a0] sm:$0xff]  }
  0x88   : > { %484 = vst.msk [vmem:[#allocation2 + $0x31] sm:$0xff] %vm481_vm0, %v6954_v42  ;;  %485 = vst.msk [vmem:[#allocation2 + $0x39] sm:$0xff] %vm481_vm0, %v6955_v43  ;;  %v6970_v42 = vunpack.c.l.bf16 %v7016_v41  ;;  %v6971_v43 = vunpack.c.h.bf16 %v7016_v41 }
  0x89   : > { %486 = vst.msk [vmem:[#allocation2 + $0x49] sm:$0xff] %vm481_vm0, %v6958_v49  ;;  %487 = vst.msk [vmem:[#allocation2 + $0x51] sm:$0xff] %vm481_vm0, %v6959_v50 }
  0x8a   : > { %488 = vst.msk [vmem:[#allocation2 + $0x61] sm:$0xff] %vm481_vm0, %v6962_v9  ;;  %489 = vst.msk [vmem:[#allocation2 + $0x69] sm:$0xff] %vm481_vm0, %v6963_v10 }
  0x8b   : > { %490 = vst.msk [vmem:[#allocation2 + $0x79] sm:$0xff] %vm481_vm0, %v6966_v26  ;;  %491 = vst.msk [vmem:[#allocation2 + $0x81] sm:$0xff] %vm481_vm0, %v6967_v27  ;;  %v8370_v26 = vld [vmem:[#allocation5 + $0x178] sm:$0xff]  }
  0x8c   : > { %492 = vst.msk [vmem:[#allocation2 + $0x91] sm:$0xff] %vm481_vm0, %v6970_v42  ;;  %493 = vst.msk [vmem:[#allocation2 + $0x99] sm:$0xff] %vm481_vm0, %v6971_v43  ;;  %v8371_v27 = vld [vmem:[#allocation5 + $0x138] sm:$0xff]  }
  0x8e   : > { %v610_v52 = vld [vmem:[#allocation2 + $0x18] sm:$0xff]  ;;  %v611_v53 = vld [vmem:[#allocation2 + $0x20] sm:$0xff] }
  0x8f   : > { %v548_v55 = vld [vmem:[#allocation2 + $0x19] sm:$0xff]  ;;  %v626_v56 = vpack.c.bf16 %v611_v53, %v610_v52  ;;  %v549_v58 = vld [vmem:[#allocation2 + $0x21] sm:$0xff]  ;;  %v612_v61 = vld [vmem:[#allocation2 + $0x30] sm:$0xff] }
  0x90   : > { %v9019_v59 = vpack.c.bf16 %v549_v58, %v548_v55  ;;  %v613_v62 = vld [vmem:[#allocation2 + $0x38] sm:$0xff]  ;;  %v581_v3 = vld [vmem:[#allocation2 + $0x22] sm:$0xff]  ;;  %v615_v14 = vld [vmem:[#allocation2 + $0x50] sm:$0xff] }
  0x91   : > { %1580 = vmatprep.mubr.bf16.mxu1 %v626_v56  ;;  %v550_v0 = vld [vmem:[#allocation2 + $0x31] sm:$0xff]  ;;  %v9022_v1 = vpack.c.bf16 %v613_v62, %v612_v61  ;;  %v580_v2 = vld [vmem:[#allocation2 + $0x1a] sm:$0xff]  ;;  %v614_v13 = vld [vmem:[#allocation2 + $0x48] sm:$0xff] }
  0x92   : > { %1581 = vmatmul.mubr.bf16.vlgmr.msra.gmra.mrb[0].mxu1 %v594_v54  ;;  %1491 = vmatprep.mubr.bf16.mxu0 %v9019_v59  ;;  %v551_v4 = vld [vmem:[#allocation2 + $0x39] sm:$0xff]  ;;  %v9029_v12 = vpack.c.bf16 %v581_v3, %v580_v2  ;;  %v552_v15 = vld [vmem:[#allocation2 + $0x49] sm:$0xff]  ;;  %v9031_v16 = vpack.c.bf16 %v615_v14, %v614_v13  ;;  %v553_v18 = vld [vmem:[#allocation2 + $0x51] sm:$0xff] }
  0x93   : > { %7220 = vmatpush3.bf16.msra.mxu1 %v8341_v57  ;;  %1492 = vmatmul.mubr.bf16.gmra.mrb[4].mxu0 %v626_v56  ;;  %v9024_v5 = vpack.c.bf16 %v551_v4, %v550_v0  ;;  %v9035_v19 = vpack.c.bf16 %v553_v18, %v552_v15  ;;  %v582_v21 = vld [vmem:[#allocation2 + $0x32] sm:$0xff]  ;;  %v583_v22 = vld [vmem:[#allocation2 + $0x3a] sm:$0xff]  ;;  %v617_v33 = vld [vmem:[#allocation2 + $0x68] sm:$0xff] }
  0x94   : > { %1588 = vmatprep.mubr.bf16.mxu1 %v9022_v1  ;;  %7221 = vmatprep.subr.bf16.mxu1 %v8343_v60  ;;  %v9044_v31 = vpack.c.bf16 %v583_v22, %v582_v21  ;;  %v616_v32 = vld [vmem:[#allocation2 + $0x60] sm:$0xff]  ;;  %v555_v36 = vld [vmem:[#allocation2 + $0x69] sm:$0xff]  ;;  %v585_v40 = vld [vmem:[#allocation2 + $0x52] sm:$0xff] }
  0x95   : > { %1499 = vmatprep.mubr.bf16.mxu0 %v9024_v5  ;;  %v554_v34 = vld [vmem:[#allocation2 + $0x61] sm:$0xff]  ;;  %v9046_v35 = vpack.c.bf16 %v617_v33, %v616_v32  ;;  %v584_v39 = vld [vmem:[#allocation2 + $0x4a] sm:$0xff]  ;;  %v618_v46 = vld [vmem:[#allocation2 + $0x78] sm:$0xff] }
  0x96   : > { %v9048_v37 = vpack.c.bf16 %v555_v36, %v554_v34  ;;  %v619_v47 = vld [vmem:[#allocation2 + $0x80] sm:$0xff]  ;;  %v9057_v50 = vpack.c.bf16 %v585_v40, %v584_v39  ;;  %v8361_v53 = vld [vmem:[#allocation5 + $0x1a8] sm:$0xff]   ;;  %v7017_v54 = vld [vmem:[%s9008_s17 + $0x30] sm:$0xff]  }
  0x97   : > { %7222 = vmatpush3.bf16.msra.mxu1 %v8345_v63  ;;  %v556_v48 = vld [vmem:[#allocation2 + $0x79] sm:$0xff]  ;;  %v557_v49 = vld [vmem:[#allocation2 + $0x81] sm:$0xff]  ;;  %v9059_v52 = vpack.c.bf16 %v619_v47, %v618_v46  ;;  %v6974_v56 = vunpack.c.l.bf16 %v7017_v54  ;;  %v6975_v57 = vunpack.c.h.bf16 %v7017_v54  ;;  %v8363_v60 = vld [vmem:[#allocation5 + $0x1f0] sm:$0xff]  }
  0x98   : > { %7223 = vmatprep.subr.bf16.mxu1 %v8347_v7  ;;  %v9062_v55 = vpack.c.bf16 %v557_v49, %v556_v48  ;;  %v8362_v58 = vld [vmem:[#allocation5 + $0x168] sm:$0xff]   ;;  %v620_v0 = vld [vmem:[#allocation2 + $0x90] sm:$0xff]  ;;  %v621_v2 = vld [vmem:[#allocation2 + $0x98] sm:$0xff] }
  0x99   : > { %494 = vst.msk [vmem:[#allocation2 + $0xa9] sm:$0xff] %vm481_vm0, %v6974_v56  ;;  %495 = vst.msk [vmem:[#allocation2 + $0xb1] sm:$0xff] %vm481_vm0, %v6975_v57  ;;  %7165 = vmatprep.subr.bf16.mxu0 %v8362_v58  ;;  %v8364_v61 = vld [vmem:[#allocation5 + $0x128] sm:$0xff]   ;;  %v558_v3 = vld [vmem:[#allocation2 + $0x91] sm:$0xff]  ;;  %v9073_v13 = vpack.c.bf16 %v621_v2, %v620_v0 }
  0x9a   : > { %1589 = vmatmul.mubr.bf16.gmra.mrb[4].mxu1 %v9029_v12  ;;  %v586_v62 = vld [vmem:[#allocation2 + $0x62] sm:$0xff]  ;;  %v587_v63 = vld [vmem:[#allocation2 + $0x6a] sm:$0xff]  ;;  %v559_v4 = vld [vmem:[#allocation2 + $0x99] sm:$0xff]  ;;  %7166 = vmatpush3.bf16.msra.mxu0 %v8364_v61 }
  0x9b   : > { %1596 = vmatprep.mubr.bf16.mxu1 %v9031_v16  ;;  %1500 = vmatmul.mubr.bf16.gmra.mrb[8].mxu0 %v9022_v1  ;;  %v7018_v7 = vld [vmem:[%s9008_s17 + $0x38] sm:$0xff]   ;;  %v9071_v8 = vpack.c.bf16 %v587_v63, %v586_v62  ;;  %v9075_v15 = vpack.c.bf16 %v559_v4, %v558_v3  ;;  %v8374_v34 = vld [vmem:[#allocation5 + $0x200] sm:$0xff]   ;;  %v8380_v47 = vld [vmem:[#allocation5 + $0x210] sm:$0xff]  }
  0x9c   : > { %7224 = vmatpush3.bf16.msra.mxu1 %v8349_v17  ;;  %1507 = vmatprep.mubr.bf16.mxu0 %v9035_v19  ;;  %v6978_v9 = vunpack.c.l.bf16 %v7018_v7  ;;  %v6979_v10 = vunpack.c.h.bf16 %v7018_v7  ;;  %v8367_v14 = vld [vmem:[#allocation5 + $0x1f8] sm:$0xff]   ;;  %v8368_v17 = vld [vmem:[#allocation5 + $0x130] sm:$0xff]   ;;  %v7019_v46 = vld [vmem:[%s9008_s17 + $0x40] sm:$0xff]  }
  0x9d   : > { %7225 = vmatprep.subr.bf16.mxu1 %v8351_v20  ;;  %7167 = vmatprep.subr.bf16.mxu0 %v8366_v11  ;;  %v588_v18 = vld [vmem:[#allocation2 + $0x7a] sm:$0xff]  ;;  %v589_v20 = vld [vmem:[#allocation2 + $0x82] sm:$0xff]  ;;  %v590_v33 = vld [vmem:[#allocation2 + $0x92] sm:$0xff]  ;;  %v6982_v48 = vunpack.c.l.bf16 %v7019_v46  ;;  %v6983_v49 = vunpack.c.h.bf16 %v7019_v46 }
  0x9e   : > { %496 = vst.msk [vmem:[#allocation2 + $0xc1] sm:$0xff] %vm481_vm0, %v6978_v9  ;;  %497 = vst.msk [vmem:[#allocation2 + $0xc9] sm:$0xff] %vm481_vm0, %v6979_v10  ;;  %7168 = vmatpush3.bf16.msra.mxu0 %v8368_v17  ;;  %v9083_v28 = vpack.c.bf16 %v589_v20, %v588_v18  ;;  %v591_v36 = vld [vmem:[#allocation2 + $0x9a] sm:$0xff]  ;;  %v8378_v54 = vld [vmem:[#allocation5 + $0x50] sm:$0xff]  }
  0x9f   : > { %7169 = vmatprep.subr.bf16.mxu0 %v8370_v26  ;;  %v9093_v40 = vpack.c.bf16 %v591_v36, %v590_v33  ;;  %498 = vst.msk [vmem:[#allocation2 + $0xd9] sm:$0xff] %vm481_vm0, %v6982_v48  ;;  %499 = vst.msk [vmem:[#allocation2 + $0xe1] sm:$0xff] %vm481_vm0, %v6983_v49  ;;  %v8386_v56 = vld [vmem:[#allocation5 + $0x220] sm:$0xff]   ;;  %v8379_v57 = vld [vmem:[#allocation5 + $0x10] sm:$0xff]  }
  0xa0   : > { %7226 = vmatpush3.bf16.msra.mxu1 %v8353_v24  ;;  %v622_v21 = vld [vmem:[#allocation2 + $0xa8] sm:$0xff]  ;;  %v623_v22 = vld [vmem:[#allocation2 + $0xb0] sm:$0xff]  ;;  %v8381_v58 = vld [vmem:[#allocation5 + $0x58] sm:$0xff]  }
  0xa1   : > { %7227 = vmatprep.subr.bf16.mxu1 %v8355_v29  ;;  %v560_v23 = vld [vmem:[#allocation2 + $0xa9] sm:$0xff]  ;;  %v561_v24 = vld [vmem:[#allocation2 + $0xb1] sm:$0xff]  ;;  %v8372_v29 = vld [vmem:[#allocation5 + $0x40] sm:$0xff]   ;;  %v9085_v30 = vpack.c.bf16 %v623_v22, %v622_v21 }
  0xa2   : > { %1597 = vmatmul.mubr.bf16.gmra.mrb[8].mxu1 %v9044_v31  ;;  %7170 = vmatpush3.bf16.msra.mxu0 %v8371_v27  ;;  %v9087_v32 = vpack.c.bf16 %v561_v24, %v560_v23  ;;  %v592_v42 = vld [vmem:[#allocation2 + $0xaa] sm:$0xff]  ;;  %v593_v43 = vld [vmem:[#allocation2 + $0xb2] sm:$0xff]  ;;  %v8396_v10 = vld [vmem:[#allocation5 + $0xc0] sm:$0xff]  }
  0xa3   : > { %1604 = vmatprep.mubr.bf16.mxu1 %v9046_v35  ;;  %1508 = vmatmul.mubr.bf16.gmra.mrb[12].mxu0 %v9031_v16  ;;  %v9101_v44 = vpack.c.bf16 %v593_v43, %v592_v42  ;;  %v7020_v61 = vld [vmem:[%s9008_s17 + $0x48] sm:$0xff]   ;;  %v8392_v62 = vld [vmem:[#allocation5 + $0x230] sm:$0xff]   ;;  %v8393_v11 = vld [vmem:[#allocation5 + $0x78] sm:$0xff]  }
  0xa4   : > { %1515 = vmatprep.mubr.bf16.mxu0 %v9048_v37  ;;  %7228 = vmatpush3.bf16.msra.mxu1 %v8357_v38  ;;  %v6986_v63 = vunpack.c.l.bf16 %v7020_v61  ;;  %v6987_v0 = vunpack.c.h.bf16 %v7020_v61  ;;  %v8387_v2 = vld [vmem:[#allocation5 + $0x68] sm:$0xff]   ;;  %v8390_v4 = vld [vmem:[#allocation5 + $0x70] sm:$0xff]   ;;  %v7022_v17 = vld [vmem:[%s9008_s17 + $0x58] sm:$0xff]  }
  0xa5   : > { %7229 = vmatprep.subr.bf16.mxu1 %v8359_v45  ;;  %v624_v38 = vld [vmem:[#allocation2 + $0xc0] sm:$0xff]  ;;  %v625_v39 = vld [vmem:[#allocation2 + $0xc8] sm:$0xff]  ;;  %8115 = vmatprep.subr.bf16.mxu0 %v8374_v34  ;;  %v6994_v18 = vunpack.c.l.bf16 %v7022_v17  ;;  %v6995_v20 = vunpack.c.h.bf16 %v7022_v17  ;;  %v8402_v48 = vld [vmem:[#allocation5 + $0xd0] sm:$0xff]  }
  0xa6   : > { %v9095_v41 = vpack.c.bf16 %v625_v39, %v624_v38  ;;  %v8377_v45 = vld [vmem:[#allocation5 + $0x208] sm:$0xff]   ;;  %500 = vst.msk [vmem:[#allocation2 + $0xf1] sm:$0xff] %vm481_vm0, %v6986_v63  ;;  %501 = vst.msk [vmem:[#allocation2 + $0xf9] sm:$0xff] %vm481_vm0, %v6987_v0  ;;  %v721_v43 = vld [vmem:[#allocation2 + $0xd8] sm:$0xff] }
  0xa7   : > { %v8388_v3 = vld [vmem:[#allocation5 + $0x28] sm:$0xff]   ;;  %504 = vst.msk [vmem:[#allocation2 + $0x121] sm:$0xff] %vm481_vm0, %v6994_v18  ;;  %505 = vst.msk [vmem:[#allocation2 + $0x129] sm:$0xff] %vm481_vm0, %v6995_v20  ;;  %v8398_v46 = vld [vmem:[#allocation5 + $0x80] sm:$0xff]  }
  0xa8   : > { %7230 = vmatpush3.bf16.msra.mxu1 %v8361_v53  ;;  %v8383_v53 = vld [vmem:[#allocation5 + $0x218] sm:$0xff]   ;;  %v751_v23 = vld [vmem:[#allocation2 + $0xc1] sm:$0xff]  ;;  %v752_v26 = vld [vmem:[#allocation2 + $0xc9] sm:$0xff] }
  0xa9   : > { %7231 = vmatprep.subr.bf16.mxu1 %v8363_v60  ;;  %v8384_v60 = vld [vmem:[#allocation5 + $0x60] sm:$0xff]   ;;  %v761_v36 = vpack.c.bf16 %v752_v26, %v751_v23  ;;  %v7026_v49 = vld [vmem:[%s9008_s17 + $0x78] sm:$0xff]   ;;  %v8412_v61 = vld [vmem:[#allocation5 + $0xe8] sm:$0xff]  }
  0xaa   : > { %1605 = vmatmul.mubr.bf16.gmra.mrb[12].mxu1 %v9057_v50  ;;  %v688_v27 = vld [vmem:[#allocation2 + $0xc2] sm:$0xff]  ;;  %v8425_v23 = vld [vmem:[#allocation5 + $0x130] sm:$0xff]   ;;  %v8426_v26 = vld [vmem:[#allocation5 + $0x178] sm:$0xff]  }
  0xab   : > { %1612 = vmatprep.mubr.bf16.mxu1 %v9059_v52  ;;  %1516 = vmatmul.mubr.bf16.gmra.mrb[16].mxu0 %v9046_v35  ;;  %v754_v39 = vld [vmem:[#allocation2 + $0xe1] sm:$0xff] }
  0xac   : > { %1523 = vmatprep.mubr.bf16.mxu0 %v9062_v55  ;;  %7232 = vmatpush3.bf16.msra.mxu1 %v8365_v6  ;;  %v7021_v6 = vld [vmem:[%s9008_s17 + $0x50] sm:$0xff]   ;;  %v8423_v18 = vld [vmem:[#allocation5 + $0x128] sm:$0xff]  }
  0xad   : > { %7233 = vmatprep.subr.bf16.mxu1 %v8367_v14  ;;  %v6990_v7 = vunpack.c.l.bf16 %v7021_v6  ;;  %v6991_v9 = vunpack.c.h.bf16 %v7021_v6  ;;  %v8397_v14 = vld [vmem:[#allocation5 + $0x140] sm:$0xff]   ;;  %v2020_v63 = vld [vmem:[#allocation2 + $0xf0] sm:$0xff]  ;;  %v2021_v0 = vld [vmem:[#allocation2 + $0xf8] sm:$0xff] }
  0xae   : > { %v8414_v6 = vld [vmem:[#allocation5 + $0xf0] sm:$0xff]   ;;  %v2056_v20 = vld [vmem:[#allocation2 + $0x121] sm:$0xff] }
  0xaf   : > { %502 = vst.msk [vmem:[#allocation2 + $0x109] sm:$0xff] %vm481_vm0, %v6990_v7  ;;  %503 = vst.msk [vmem:[#allocation2 + $0x111] sm:$0xff] %vm481_vm0, %v6991_v9  ;;  %v8421_v7 = vld [vmem:[#allocation5 + $0x120] sm:$0xff]   ;;  %v9176_v9 = vpack.c.bf16 %v2021_v0, %v2020_v63  ;;  %v8442_v63 = vld [vmem:[#allocation5 + $0x1a8] sm:$0xff]  }
  0xb0   : > { %7234 = vmatpush3.bf16.msra.mxu1 %v8369_v25  ;;  %v8443_v0 = vld [vmem:[#allocation5 + $0x1f0] sm:$0xff]  }
  0xb1   : > { %7299 = vmatprep.subr.bf16.mxu1 %v8372_v29  ;;  %v689_v29 = vld [vmem:[#allocation2 + $0xca] sm:$0xff] }
  0xb2   : > { %1613 = vmatmul.mubr.bf16.gmra.mrb[16].mxu1 %v9071_v8  ;;  %v9148_v38 = vpack.c.bf16 %v689_v29, %v688_v27  ;;  %v8431_v27 = vld [vmem:[#allocation5 + $0x1c8] sm:$0xff]   ;;  %v2024_v29 = vld [vmem:[#allocation2 + $0x120] sm:$0xff] }
  0xb3   : > { %1620 = vmatprep.mubr.bf16.mxu1 %v9073_v13  ;;  %1524 = vmatmul.mubr.bf16.gmra.mrb[20].mxu0 %v9059_v52 }
  0xb4   : > { %1531 = vmatprep.mubr.bf16.mxu0 %v9075_v15 }
  0xb6   : > { %v2023_v17 = vld [vmem:[#allocation2 + $0x110] sm:$0xff] }
  0xba   : > { %1621 = vmatmul.mubr.bf16.gmra.mrb[20].mxu1 %v9083_v28 }
  0xbb   : > { %1628 = vmatprep.mubr.bf16.mxu1 %v9085_v30  ;;  %1532 = vmatmul.mubr.bf16.gmra.mrb[24].mxu0 %v9073_v13 }
  0xbc   : > { %1539 = vmatprep.mubr.bf16.mxu0 %v9087_v32 }
  0xc2   : > { %1629 = vmatmul.mubr.bf16.gmra.mrb[24].mxu1 %v9093_v40 }
  0xc3   : > { %1636 = vmatprep.mubr.bf16.mxu1 %v9095_v41  ;;  %1540 = vmatmul.mubr.bf16.gmra.mrb[28].mxu0 %v9085_v30 }
  0xc4   : > { %1677 = vmatprep.mubr.bf16.mxu0 %v9029_v12  ;;  %v8375_v12 = vld [vmem:[#allocation5 + $0x48] sm:$0xff]  }
  0xca   : > { %1637 = vmatmul.mubr.bf16.gmra.mrb[28].mxu1 %v9101_v44 }
  0xcb   : > { %1774 = vmatprep.mubr.bf16.mxu1 %v9024_v5  ;;  %1678 = vmatmul.mubr.bf16.vlgmr.msra.gmra.mrb[32].mxu0 %v9019_v59  ;;  %v8376_v59 = vld [vmem:[#allocation5 + $0x8] sm:$0xff]  }
  0xcc   : > { %1685 = vmatprep.mubr.bf16.mxu0 %v9044_v31  ;;  %8116 = vmatpush3.bf16.msra.mxu0 %v8374_v34 }
  0xcd   : > { %8117 = vmatprep.subr.bf16.mxu0 %v8377_v45 }
  0xd0   : > { %8118 = vmatpush3.bf16.msra.mxu0 %v8377_v45  ;;  %v722_v45 = vld [vmem:[#allocation2 + $0xe0] sm:$0xff] }
  0xd1   : > { %8119 = vmatprep.subr.bf16.mxu0 %v8380_v47 }
  0xd2   : > { %1775 = vmatmul.mubr.bf16.vlgmr.msra.gmra.mrb[32].mxu1 %v9022_v1  ;;  %v8389_v1 = vld [vmem:[#allocation5 + $0x228] sm:$0xff]  }
  0xd3   : > { %7300 = vmatpush3.bf16.msra.mxu1 %v8373_v51  ;;  %1782 = vmatprep.mubr.bf16.mxu1 %v9035_v19  ;;  %v8399_v51 = vld [vmem:[#allocation5 + $0x100] sm:$0xff]  }
  0xd4   : > { %1686 = vmatmul.mubr.bf16.gmra.mrb[36].mxu0 %v9024_v5  ;;  %7301 = vmatprep.subr.bf16.mxu1 %v8375_v12  ;;  %v8382_v5 = vld [vmem:[#allocation5 + $0x18] sm:$0xff]   ;;  %v8403_v12 = vld [vmem:[#allocation5 + $0x148] sm:$0xff]  }
  0xd5   : > { %1693 = vmatprep.mubr.bf16.mxu0 %v9057_v50  ;;  %8120 = vmatpush3.bf16.msra.mxu0 %v8380_v47  ;;  %v8401_v47 = vld [vmem:[#allocation5 + $0x88] sm:$0xff]  }
  0xd6   : > { %8121 = vmatprep.subr.bf16.mxu0 %v8383_v53 }
  0xd7   : > { %7302 = vmatpush3.bf16.msra.mxu1 %v8376_v59  ;;  %v8404_v59 = vld [vmem:[#allocation5 + $0x90] sm:$0xff]  }
  0xd8   : > { %7303 = vmatprep.subr.bf16.mxu1 %v8378_v54  ;;  %v8405_v54 = vld [vmem:[#allocation5 + $0x108] sm:$0xff]  }
  0xd9   : > { %8122 = vmatpush3.bf16.msra.mxu0 %v8383_v53  ;;  %v7010_v53 = vunpack.c.l.bf16 %v7026_v49 }
  0xda   : > { %1783 = vmatmul.mubr.bf16.gmra.mrb[36].mxu1 %v9031_v16  ;;  %8123 = vmatprep.subr.bf16.mxu0 %v8386_v56  ;;  %v8385_v16 = vld [vmem:[#allocation5 + $0x20] sm:$0xff]  }
  0xdb   : > { %1790 = vmatprep.mubr.bf16.mxu1 %v9048_v37  ;;  %7304 = vmatpush3.bf16.msra.mxu1 %v8379_v57  ;;  %512 = vst.msk [vmem:[#allocation2 + $0x181] sm:$0xff] %vm481_vm0, %v7010_v53  ;;  %v2053_v57 = vld [vmem:[#allocation2 + $0xf9] sm:$0xff] }
  0xdc   : > { %1694 = vmatmul.mubr.bf16.gmra.mrb[40].mxu0 %v9035_v19  ;;  %7305 = vmatprep.subr.bf16.mxu1 %v8381_v58  ;;  %v8395_v19 = vld [vmem:[#allocation5 + $0x238] sm:$0xff]  }
  0xdd   : > { %1701 = vmatprep.mubr.bf16.mxu0 %v9071_v8  ;;  %8124 = vmatpush3.bf16.msra.mxu0 %v8386_v56  ;;  %v8406_v56 = vld [vmem:[#allocation5 + $0xd8] sm:$0xff]  }
  0xde   : > { %8125 = vmatprep.subr.bf16.mxu0 %v8389_v1  ;;  %v8407_v58 = vld [vmem:[#allocation5 + $0x98] sm:$0xff]  }
  0xdf   : > { %7306 = vmatpush3.bf16.msra.mxu1 %v8382_v5  ;;  %v2085_v53 = vld [vmem:[#allocation2 + $0xfa] sm:$0xff] }
  0xe0   : > { %7307 = vmatprep.subr.bf16.mxu1 %v8384_v60  ;;  %v8410_v60 = vld [vmem:[#allocation5 + $0xa0] sm:$0xff]  }
  0xe1   : > { %8126 = vmatpush3.bf16.msra.mxu0 %v8389_v1  ;;  %v8408_v1 = vld [vmem:[#allocation5 + $0xe0] sm:$0xff]  }
  0xe2   : > { %1791 = vmatmul.mubr.bf16.gmra.mrb[40].mxu1 %v9046_v35  ;;  %8127 = vmatprep.subr.bf16.mxu0 %v8392_v62  ;;  %v8391_v35 = vld [vmem:[#allocation5 + $0x30] sm:$0xff]  }
  0xe3   : > { %1798 = vmatprep.mubr.bf16.mxu1 %v9062_v55  ;;  %7308 = vmatpush3.bf16.msra.mxu1 %v8385_v16  ;;  %v2054_v16 = vld [vmem:[#allocation2 + $0x109] sm:$0xff] }
  0xe4   : > { %1702 = vmatmul.mubr.bf16.gmra.mrb[44].mxu0 %v9048_v37  ;;  %7309 = vmatprep.subr.bf16.mxu1 %v8387_v2  ;;  %v8394_v37 = vld [vmem:[#allocation5 + $0x38] sm:$0xff]  }
  0xe5   : > { %1709 = vmatprep.mubr.bf16.mxu0 %v9083_v28  ;;  %8128 = vmatpush3.bf16.msra.mxu0 %v8392_v62  ;;  %v8415_v62 = vld [vmem:[#allocation5 + $0x158] sm:$0xff]  }
  0xe6   : > { %8129 = vmatprep.subr.bf16.mxu0 %v8395_v19  ;;  %v2055_v2 = vld [vmem:[#allocation2 + $0x111] sm:$0xff] }
  0xe7   : > { %7310 = vmatpush3.bf16.msra.mxu1 %v8388_v3  ;;  %v785_v3 = vld [vmem:[#allocation2 + $0xda] sm:$0xff] }
  0xe8   : > { %7311 = vmatprep.subr.bf16.mxu1 %v8390_v4  ;;  %v786_v4 = vld [vmem:[#allocation2 + $0xe2] sm:$0xff] }
  0xe9   : > { %8130 = vmatpush3.bf16.msra.mxu0 %v8395_v19  ;;  %v8413_v19 = vld [vmem:[#allocation5 + $0xa8] sm:$0xff]  }
  0xea   : > { %1799 = vmatmul.mubr.bf16.gmra.mrb[44].mxu1 %v9059_v52  ;;  %7363 = vmatprep.subr.bf16.mxu0 %v8396_v10  ;;  %v7023_v52 = vld [vmem:[%s9008_s17 + $0x60] sm:$0xff]   ;;  %v8422_v10 = vld [vmem:[#allocation5 + $0x168] sm:$0xff]  }
  0xeb   : > { %1806 = vmatprep.mubr.bf16.mxu1 %v9075_v15  ;;  %7312 = vmatpush3.bf16.msra.mxu1 %v8391_v35  ;;  %v6998_v21 = vunpack.c.l.bf16 %v7023_v52  ;;  %v6999_v22 = vunpack.c.h.bf16 %v7023_v52  ;;  %v9178_v35 = vpack.c.bf16 %v2055_v2, %v2054_v16  ;;  %v2057_v52 = vld [vmem:[#allocation2 + $0x129] sm:$0xff] }
  0xec   : > { %1710 = vmatmul.mubr.bf16.gmra.mrb[48].mxu0 %v9062_v55  ;;  %7313 = vmatprep.subr.bf16.mxu1 %v8393_v11  ;;  %v7024_v55 = vld [vmem:[%s9008_s17 + $0x68] sm:$0xff]   ;;  %v8416_v11 = vld [vmem:[#allocation5 + $0xb0] sm:$0xff]  }
  0xed   : > { %1717 = vmatprep.mubr.bf16.mxu0 %v9093_v40  ;;  %506 = vst.msk [vmem:[#allocation2 + $0x139] sm:$0xff] %vm481_vm0, %v6998_v21  ;;  %507 = vst.msk [vmem:[#allocation2 + $0x141] sm:$0xff] %vm481_vm0, %v6999_v22  ;;  %v7002_v24 = vunpack.c.l.bf16 %v7024_v55  ;;  %v7003_v25 = vunpack.c.h.bf16 %v7024_v55  ;;  %v8424_v21 = vld [vmem:[#allocation5 + $0x170] sm:$0xff]   ;;  %v8419_v22 = vld [vmem:[#allocation5 + $0xb8] sm:$0xff]  }
  0xef   : > { %7314 = vmatpush3.bf16.msra.mxu1 %v8394_v37  ;;  %508 = vst.msk [vmem:[#allocation2 + $0x151] sm:$0xff] %vm481_vm0, %v7002_v24  ;;  %509 = vst.msk [vmem:[#allocation2 + $0x159] sm:$0xff] %vm481_vm0, %v7003_v25  ;;  %v9180_v37 = vpack.c.bf16 %v786_v4, %v785_v3  ;;  %v8428_v24 = vld [vmem:[#allocation5 + $0x1c0] sm:$0xff]   ;;  %v9188_v25 = vpack.c.bf16 %v2057_v52, %v2056_v20  ;;  %v8445_v3 = vld [vmem:[#allocation5 + $0x1b0] sm:$0xff]  }
  0xf0   : > { %7427 = vmatprep.subr.bf16.mxu1 %v8397_v14  ;;  %v8418_v14 = vld [vmem:[#allocation5 + $0xf8] sm:$0xff]   ;;  %v8434_v20 = vld [vmem:[#allocation5 + $0x208] sm:$0xff]  }
  0xf1   : > { %v8446_v4 = vld [vmem:[#allocation5 + $0x1f8] sm:$0xff]  }
  0xf2   : > { %1807 = vmatmul.mubr.bf16.gmra.mrb[48].mxu1 %v9073_v13  ;;  %v7025_v13 = vld [vmem:[%s9008_s17 + $0x70] sm:$0xff]   ;;  %s9982_s17 = scalar_lea.vmem [#allocation10], %s6626_s14 }
  0xf3   : > { %1814 = vmatprep.mubr.bf16.mxu1 %v9087_v32  ;;  %v7006_v33 = vunpack.c.l.bf16 %v7025_v13  ;;  %v7007_v34 = vunpack.c.h.bf16 %v7025_v13  ;;  %v8429_v13 = vld [vmem:[#allocation5 + $0x180] sm:$0xff]   ;;  %s6534_s21 = sshll.u32 %s9982_s17, 4  ;;  %s10178_s21 = int_to_ptr.vmem [resolvable:$true] %s6534_s21 }
  0xf4   : > { %1718 = vmatmul.mubr.bf16.gmra.mrb[52].mxu0 %v9075_v15  ;;  %v753_v15 = vld [vmem:[#allocation2 + $0xd9] sm:$0xff]  ;;  %s8654_s8 = scalar_lea.vmem %s10178_s21, 4096  ;;  %p8661_p4 = scmp.lt.s32.totalorder %s10178_s21, %s8659_s15 }
  0xf5   : > { %1725 = vmatprep.mubr.bf16.mxu0 %v9101_v44  ;;  %510 = vst.msk [vmem:[#allocation2 + $0x169] sm:$0xff] %vm481_vm0, %v7006_v33  ;;  %511 = vst.msk [vmem:[#allocation2 + $0x171] sm:$0xff] %vm481_vm0, %v7007_v34  ;;  %v9153_v42 = vpack.c.bf16 %v754_v39, %v753_v15  ;;  %v2025_v33 = vld [vmem:[#allocation2 + $0x128] sm:$0xff]  ;;  %v8427_v34 = vld [vmem:[#allocation5 + $0x138] sm:$0xff]   ;;  %p8655_p10 = scmp.ne.s32.totalorder %s10178_s21, %s8654_s8  ;;  %p8662_p7 = scmp.lt.s32.totalorder %s8660_s19, %s8654_s8 }
  0xf6   : > { %v2059_v15 = vld [vmem:[#allocation2 + $0x141] sm:$0xff] }
  0xf7   : > { %v9191_v39 = vld [vmem:[#allocation5 + $0x200] sm:$0xff]   ;;  %p8656_p2 = pnand %p8655_p10, %p10247_p1  ;;  %p8663_p8 = por %p8662_p7, %p8661_p4 }
  0xf9   : > { %p8657_p3 = pneg %p8656_p2 }
  0xfa   : > { %1815 = vmatmul.mubr.bf16.gmra.mrb[52].mxu1 %v9085_v30  ;;  %v9158_v30 = vpack.c.bf16 %v722_v45, %v721_v43  ;;  %v8432_v43 = vld [vmem:[#allocation5 + $0x188] sm:$0xff]   ;;  %v8433_v45 = vld [vmem:[#allocation5 + $0x1d0] sm:$0xff]  }
  0xfb   : > { %1822 = vmatprep.mubr.bf16.mxu1 %v761_v36  ;;  %p8664_p11 = pnand %p8663_p8, %p8657_p3 }
  0xfc   : > { %1726 = vmatmul.mubr.bf16.gmra.mrb[56].mxu0 %v9087_v32  ;;  %v8400_v32 = vld [vmem:[#allocation5 + $0xc8] sm:$0xff]  }
  0xfd   : > { %1733 = vmatprep.mubr.bf16.mxu0 %v9148_v38 }
 0x102   : > { %1823 = vmatmul.mubr.bf16.gmra.mrb[56].mxu1 %v9095_v41 }
 0x103   : > { %1830 = vmatprep.mubr.bf16.mxu1 %v9153_v42 }
 0x104   : > { %1734 = vmatmul.mubr.bf16.gmra.mrb[60].mxu0 %v761_v36 }
 0x105   : > { %8131 = vmatprep.mubr.bf16.mxu0 %v9044_v31  ;;  %v7011_v31 = vunpack.c.h.bf16 %v7026_v49  ;;  %v2027_v49 = vld [vmem:[#allocation2 + $0x140] sm:$0xff] }
 0x107   : > { %513 = vst.msk [vmem:[#allocation2 + $0x189] sm:$0xff] %vm481_vm0, %v7011_v31  ;;  %v8437_v31 = vld [vmem:[#allocation5 + $0x198] sm:$0xff]  }
 0x10a   : > { %1831 = vmatmul.mubr.bf16.gmra.mrb[60].mxu1 %v9158_v30 }
 0x10b   : > { %2986 = vmatprep.mubr.bf16.mxu1 %v761_v36  ;;  %v2058_v36 = vld [vmem:[#allocation2 + $0x139] sm:$0xff] }
 0x10c   : > { %8132 = vmatmul.mubr.bf16.vlgmr.msra.gmra.mrb[64].mxu0 %v9057_v50  ;;  %v8409_v50 = vld [vmem:[#allocation5 + $0x150] sm:$0xff]  }
 0x10d   : > { %7364 = vmatpush3.bf16.msra.mxu0 %v8398_v46  ;;  %8135 = vmatprep.mubr.bf16.mxu0 %v9071_v8  ;;  %v2052_v8 = vld [vmem:[#allocation2 + $0xf1] sm:$0xff]  ;;  %v9198_v46 = vpack.c.bf16 %v2059_v15, %v2058_v36 }
 0x10e   : > { %7365 = vmatprep.subr.bf16.mxu0 %v8400_v32  ;;  %v9170_v5 = vpack.c.bf16 %v2053_v57, %v2052_v8  ;;  %v8435_v32 = vld [vmem:[#allocation5 + $0x190] sm:$0xff]   ;;  %v8441_v57 = vld [vmem:[#allocation5 + $0x1e8] sm:$0xff]  }
 0x111   : > { %7366 = vmatpush3.bf16.msra.mxu0 %v8401_v47  ;;  %v8436_v47 = vld [vmem:[#allocation5 + $0x1d8] sm:$0xff]  }
 0x112   : > { %2987 = vmatmul.mubr.bf16.vlgmr.msra.gmra.mrb[64].mxu1 %v9095_v41  ;;  %7367 = vmatprep.subr.bf16.mxu0 %v8402_v48  ;;  %v8411_v41 = vld [vmem:[#allocation5 + $0x110] sm:$0xff]   ;;  %v2026_v48 = vld [vmem:[#allocation2 + $0x138] sm:$0xff] }
 0x113   : > { %7428 = vmatpush3.bf16.msra.mxu1 %v8399_v51  ;;  %2994 = vmatprep.mubr.bf16.mxu1 %v9153_v42  ;;  %v2061_v51 = vld [vmem:[#allocation2 + $0x159] sm:$0xff] }
 0x114   : > { %8136 = vmatmul.mubr.bf16.gmra.mrb[68].mxu0 %v9083_v28  ;;  %7429 = vmatprep.subr.bf16.mxu1 %v8403_v12  ;;  %v8417_v28 = vld [vmem:[#allocation5 + $0x118] sm:$0xff]  }
 0x115   : > { %7368 = vmatpush3.bf16.msra.mxu0 %v8404_v59  ;;  %8139 = vmatprep.mubr.bf16.mxu0 %v9093_v40  ;;  %v8420_v40 = vld [vmem:[#allocation5 + $0x160] sm:$0xff]   ;;  %v2084_v12 = vld [vmem:[#allocation2 + $0xf2] sm:$0xff] }
 0x116   : > { %7369 = vmatprep.subr.bf16.mxu0 %v8406_v56  ;;  %v8438_v59 = vld [vmem:[#allocation5 + $0x1e0] sm:$0xff]   ;;  %v9209_v8 = vpack.c.bf16 %v2085_v53, %v2084_v12 }
 0x117   : > { %7430 = vmatpush3.bf16.msra.mxu1 %v8405_v54  ;;  %v9205_v54 = vpack.c.bf16 %v2027_v49, %v2026_v48  ;;  %v8450_v48 = vld [vmem:[#allocation5 + $0x230] sm:$0xff]  }
 0x118   : > { %7431 = vmatprep.subr.bf16.mxu1 %v8409_v50  ;;  %v8440_v50 = vld [vmem:[#allocation5 + $0x1a0] sm:$0xff]  }
 0x119   : > { %7370 = vmatpush3.bf16.msra.mxu0 %v8407_v58  ;;  %v2028_v58 = vld [vmem:[#allocation2 + $0x150] sm:$0xff] }
 0x11a   : > { %2995 = vmatmul.mubr.bf16.gmra.mrb[68].mxu1 %v9158_v30  ;;  %7371 = vmatprep.subr.bf16.mxu0 %v8408_v1  ;;  %v2029_v1 = vld [vmem:[#allocation2 + $0x158] sm:$0xff] }
 0x11b   : > { %3002 = vmatprep.mubr.bf16.mxu1 %v9170_v5  ;;  %7432 = vmatpush3.bf16.msra.mxu1 %v8411_v41  ;;  %v2062_v41 = vld [vmem:[#allocation2 + $0x169] sm:$0xff] }
 0x11c   : > { %8140 = vmatmul.mubr.bf16.gmra.mrb[72].mxu0 %v9101_v44  ;;  %7433 = vmatprep.subr.bf16.mxu1 %v8415_v62  ;;  %v2022_v44 = vld [vmem:[#allocation2 + $0x108] sm:$0xff]  ;;  %v2087_v62 = vld [vmem:[#allocation2 + $0x112] sm:$0xff] }
 0x11d   : > { %7372 = vmatpush3.bf16.msra.mxu0 %v8410_v60  ;;  %8143 = vmatprep.mubr.bf16.mxu0 %v9148_v38  ;;  %v9186_v55 = vpack.c.bf16 %v2023_v17, %v2022_v44  ;;  %v2063_v60 = vld [vmem:[#allocation2 + $0x171] sm:$0xff]  ;;  %v2090_v17 = vld [vmem:[#allocation2 + $0x13a] sm:$0xff] }
 0x11e   : > { %7373 = vmatprep.subr.bf16.mxu0 %v8412_v61  ;;  %v2086_v61 = vld [vmem:[#allocation2 + $0x10a] sm:$0xff]  ;;  %v9217_v16 = vpack.c.bf16 %v2063_v60, %v2062_v41 }
 0x11f   : > { %7434 = vmatpush3.bf16.msra.mxu1 %v8417_v28  ;;  %v9215_v28 = vpack.c.bf16 %v2029_v1, %v2028_v58  ;;  %v9219_v2 = vpack.c.bf16 %v2087_v62, %v2086_v61  ;;  %v8451_v58 = vld [vmem:[#allocation5 + $0x238] sm:$0xff]   ;;  %v8453_v61 = vld [vmem:[#allocation8] sm:$0xff]  }
 0x120   : > { %7435 = vmatprep.subr.bf16.mxu1 %v8420_v40  ;;  %v2030_v40 = vld [vmem:[#allocation2 + $0x168] sm:$0xff] }
 0x121   : > { %7374 = vmatpush3.bf16.msra.mxu0 %v8413_v19  ;;  %v2031_v19 = vld [vmem:[#allocation2 + $0x170] sm:$0xff] }
 0x122   : > { %3003 = vmatmul.mubr.bf16.gmra.mrb[72].mxu1 %v9176_v9  ;;  %7375 = vmatprep.subr.bf16.mxu0 %v8414_v6  ;;  %v2088_v6 = vld [vmem:[#allocation2 + $0x122] sm:$0xff] }
 0x123   : > { %3010 = vmatprep.mubr.bf16.mxu1 %v9178_v35  ;;  %7436 = vmatpush3.bf16.msra.mxu1 %v8421_v7  ;;  %v2089_v7 = vld [vmem:[#allocation2 + $0x12a] sm:$0xff] }
 0x124   : > { %8144 = vmatmul.mubr.bf16.gmra.mrb[76].mxu0 %v9180_v37  ;;  %7437 = vmatprep.subr.bf16.mxu1 %v8422_v10  ;;  %v8447_v10 = vld [vmem:[#allocation5 + $0x1b8] sm:$0xff]   ;;  %v9227_v44 = vpack.c.bf16 %v2089_v7, %v2088_v6  ;;  %v8456_v6 = vld [vmem:[#allocation8 + $0x50] sm:$0xff]  }
 0x125   : > { %7376 = vmatpush3.bf16.msra.mxu0 %v8416_v11  ;;  %3083 = vmatprep.mubr.bf16.mxu0 %v9158_v30  ;;  %v9196_v30 = vpack.c.bf16 %v2025_v33, %v2024_v29  ;;  %v8452_v11 = vld [vmem:[#allocation8 + $0x40] sm:$0xff]   ;;  %v2094_v29 = vld [vmem:[#allocation2 + $0x16a] sm:$0xff] }
 0x126   : > { %7377 = vmatprep.subr.bf16.mxu0 %v8418_v14  ;;  %v9225_v14 = vpack.c.bf16 %v2031_v19, %v2030_v40  ;;  %v8455_v19 = vld [vmem:[#allocation8 + $0x8] sm:$0xff]  }
 0x127   : > { %7438 = vmatpush3.bf16.msra.mxu1 %v8423_v18  ;;  %v2091_v18 = vld [vmem:[#allocation2 + $0x142] sm:$0xff] }
 0x128   : > { %7439 = vmatprep.subr.bf16.mxu1 %v8424_v21  ;;  %v9233_v52 = vpack.c.bf16 %v2091_v18, %v2090_v17  ;;  %v8439_v21 = vld [vmem:[#allocation5 + $0x210] sm:$0xff]  }
 0x129   : > { %7378 = vmatpush3.bf16.msra.mxu0 %v8419_v22  ;;  %v2092_v22 = vld [vmem:[#allocation2 + $0x152] sm:$0xff] }
 0x12a   : > { %3011 = vmatmul.mubr.bf16.gmra.mrb[76].mxu1 %v9186_v55  ;;  %7491 = vmatprep.subr.bf16.mxu0 %v8428_v24  ;;  %v2128_v24 = vld [vmem:[#allocation2 + $0x188] sm:$0xff] }
 0x12b   : > { %3018 = vmatprep.mubr.bf16.mxu1 %v9188_v25  ;;  %7440 = vmatpush3.bf16.msra.mxu1 %v8425_v23  ;;  %v2093_v23 = vld [vmem:[#allocation2 + $0x15a] sm:$0xff] }
 0x12c   : > { %3084 = vmatmul.mubr.bf16.vlgmr.msra.gmra.mrb[80].mxu0 %v9148_v38  ;;  %7441 = vmatprep.subr.bf16.mxu1 %v8426_v26  ;;  %v2060_v38 = vld [vmem:[#allocation2 + $0x151] sm:$0xff] }
 0x12d   : > { %3091 = vmatprep.mubr.bf16.mxu0 %v9176_v9  ;;  %7492 = vmatpush3.bf16.msra.mxu0 %v8429_v13  ;;  %v9207_v56 = vpack.c.bf16 %v2061_v51, %v2060_v38  ;;  %v8444_v26 = vld [vmem:[#allocation5 + $0x218] sm:$0xff]   ;;  %v9240_v13 = vpack.c.bf16 %v2093_v23, %v2092_v22 }
 0x12e   : > { %7493 = vmatprep.subr.bf16.mxu0 %v8431_v27 }
 0x12f   : > { %7442 = vmatpush3.bf16.msra.mxu1 %v8427_v34  ;;  %v8448_v34 = vld [vmem:[#allocation5 + $0x220] sm:$0xff]  }
 0x130   : > { %8147 = vmatprep.subr.bf16.mxu1 %v9191_v39 }
 0x131   : > { %7494 = vmatpush3.bf16.msra.mxu0 %v8432_v43 }
 0x132   : > { %3019 = vmatmul.mubr.bf16.gmra.mrb[80].mxu1 %v9196_v30  ;;  %7495 = vmatprep.subr.bf16.mxu0 %v8433_v45 }
 0x133   : > { %3026 = vmatprep.mubr.bf16.mxu1 %v9198_v46 }
 0x134   : > { %3092 = vmatmul.mubr.bf16.gmra.mrb[84].mxu0 %v9180_v37 }
 0x135   : > { %3099 = vmatprep.mubr.bf16.mxu0 %v9186_v55  ;;  %7496 = vmatpush3.bf16.msra.mxu0 %v8435_v32 }
 0x136   : > { %7497 = vmatprep.subr.bf16.mxu0 %v8436_v47  ;;  %v8449_v47 = vld [vmem:[#allocation5 + $0x228] sm:$0xff]  }
 0x139   : > { %7498 = vmatpush3.bf16.msra.mxu0 %v8437_v31 }
 0x13a   : > { %3027 = vmatmul.mubr.bf16.gmra.mrb[84].mxu1 %v9205_v54  ;;  %7499 = vmatprep.subr.bf16.mxu0 %v8438_v59 }
 0x13b   : > { %3034 = vmatprep.mubr.bf16.mxu1 %v9207_v56 }
 0x13c   : > { %3100 = vmatmul.mubr.bf16.gmra.mrb[88].mxu0 %v9209_v8 }
 0x13d   : > { %3107 = vmatprep.mubr.bf16.mxu0 %v9196_v30  ;;  %7500 = vmatpush3.bf16.msra.mxu0 %v8440_v50 }
 0x13e   : > { %7501 = vmatprep.subr.bf16.mxu0 %v8441_v57 }
 0x141   : > { %7502 = vmatpush3.bf16.msra.mxu0 %v8442_v63 }
 0x142   : > { %3035 = vmatmul.mubr.bf16.gmra.mrb[88].mxu1 %v9215_v28  ;;  %7503 = vmatprep.subr.bf16.mxu0 %v8443_v0  ;;  %v8460_v0 = vld [vmem:[#allocation8 + $0xc0] sm:$0xff]  }
 0x143   : > { %3042 = vmatprep.mubr.bf16.mxu1 %v9217_v16 }
 0x144   : > { %3108 = vmatmul.mubr.bf16.gmra.mrb[92].mxu0 %v9219_v2 }
 0x145   : > { %3115 = vmatprep.mubr.bf16.mxu0 %v9205_v54  ;;  %7504 = vmatpush3.bf16.msra.mxu0 %v8445_v3  ;;  %v7043_v27 = vpop.f32.mrb[0].mxu0 }
 0x146   : > { %7505 = vmatprep.subr.bf16.mxu0 %v8446_v4  ;;  %v7044_v33 = vpop.f32.mrb[1].mxu0 }
 0x147   : > { %v7045_v36 = vadd.f32 %v7044_v33, %v7043_v27  ;;  %v7046_v15 = vpop.f32.mrb[2].mxu0  ;;  %v8459_v27 = vld [vmem:[#allocation8 + $0x18] sm:$0xff]  }
 0x148   : > { %v7047_v43 = vpop.f32.mrb[3].mxu0 }
 0x149   : > { %7506 = vmatpush3.bf16.msra.mxu0 %v8447_v10  ;;  %v7048_v45 = vadd.f32 %v7047_v43, %v7046_v15 }
 0x14a   : > { %3043 = vmatmul.mubr.bf16.gmra.mrb[92].mxu1 %v9225_v14  ;;  %7571 = vmatprep.subr.bf16.mxu0 %v8452_v11 }
 0x14b   : > { %3180 = vmatprep.mubr.bf16.mxu1 %v9180_v37  ;;  %v2127_v37 = vld [vmem:[#allocation2 + $0x180] sm:$0xff] }
 0x14c   : > { %3116 = vmatmul.mubr.bf16.gmra.mrb[96].mxu0 %v9227_v44 }
 0x14d   : > { %3123 = vmatprep.mubr.bf16.mxu0 %v9215_v28 }
 0x152   : > { %3181 = vmatmul.mubr.bf16.vlgmr.msra.gmra.mrb[96].mxu1 %v9153_v42  ;;  %v9242_v42 = vpack.c.bf16 %v2128_v24, %v2127_v37  ;;  %v8458_v37 = vld [vmem:[#allocation8 + $0x58] sm:$0xff]  }
 0x153   : > { %8148 = vmatpush3.bf16.msra.mxu1 %v9191_v39  ;;  %3188 = vmatprep.mubr.bf16.mxu1 %v9209_v8  ;;  %v2095_v39 = vld [vmem:[#allocation2 + $0x172] sm:$0xff] }
 0x154   : > { %3124 = vmatmul.mubr.bf16.gmra.mrb[100].mxu0 %v9233_v52  ;;  %8149 = vmatprep.subr.bf16.mxu1 %v8434_v20  ;;  %v9248_v32 = vpack.c.bf16 %v2095_v39, %v2094_v29 }
 0x155   : > { %3131 = vmatprep.mubr.bf16.mxu0 %v9225_v14 }
 0x157   : > { %8150 = vmatpush3.bf16.msra.mxu1 %v8434_v20 }
 0x158   : > { %8151 = vmatprep.subr.bf16.mxu1 %v8439_v21 }
 0x15a   : > { %3189 = vmatmul.mubr.bf16.gmra.mrb[100].mxu1 %v9170_v5 }
 0x15b   : > { %3196 = vmatprep.mubr.bf16.mxu1 %v9219_v2  ;;  %8152 = vmatpush3.bf16.msra.mxu1 %v8439_v21 }
 0x15c   : > { %3132 = vmatmul.mubr.bf16.gmra.mrb[104].mxu0 %v9240_v13  ;;  %8153 = vmatprep.subr.bf16.mxu1 %v8444_v26 }
 0x15d   : > { %3139 = vmatprep.mubr.bf16.mxu0 %v9242_v42 }
 0x15f   : > { %8154 = vmatpush3.bf16.msra.mxu1 %v8444_v26 }
 0x160   : > { %8155 = vmatprep.subr.bf16.mxu1 %v8448_v34 }
 0x162   : > { %3197 = vmatmul.mubr.bf16.gmra.mrb[104].mxu1 %v9178_v35 }
 0x163   : > { %3204 = vmatprep.mubr.bf16.mxu1 %v9227_v44  ;;  %8156 = vmatpush3.bf16.msra.mxu1 %v8448_v34  ;;  %v8462_v34 = vld [vmem:[#allocation8 + $0x60] sm:$0xff]  }
 0x164   : > { %3140 = vmatmul.mubr.bf16.gmra.mrb[108].mxu0 %v9248_v32  ;;  %8157 = vmatprep.subr.bf16.mxu1 %v8449_v47 }
 0x165   : > { %v7107_v49 = vpop.f32.mrb[0].mxu1  ;;  %3277 = vmatprep.mubr.bf16.mxu0 %v9170_v5  ;;  %v8454_v5 = vld [vmem:[#allocation8 + $0x48] sm:$0xff]  }
 0x166   : > { %v7108_v38 = vpop.f32.mrb[1].mxu1  ;;  %v7049_v51 = vpop.f32.mrb[4].mxu0 }
 0x167   : > { %v7109_v12 = vadd.f32 %v7108_v38, %v7107_v49  ;;  %v7110_v53 = vpop.f32.mrb[2].mxu1  ;;  %v7050_v31 = vpop.f32.mrb[5].mxu0  ;;  %8158 = vmatpush3.bf16.msra.mxu1 %v8449_v47 }
 0x168   : > { %v7111_v59 = vpop.f32.mrb[3].mxu1  ;;  %v7051_v50 = vadd.f32 %v7050_v31, %v7049_v51  ;;  %v7052_v57 = vpop.f32.mrb[6].mxu0  ;;  %8159 = vmatprep.subr.bf16.mxu1 %v8450_v48  ;;  %v8468_v51 = vld [vmem:[#allocation8 + $0x68] sm:$0xff]  }
 0x169   : > { %v7112_v1 = vadd.f32 %v7111_v59, %v7110_v53  ;;  %v7053_v41 = vpop.f32.mrb[7].mxu0  ;;  %v9254_v60 = vadd.f32 %v7109_v12, %v7045_v36  ;;  %v2191_v12 = vld [vmem:[#allocation2 + $0x182] sm:$0xff]  ;;  %v2192_v53 = vld [vmem:[#allocation2 + $0x18a] sm:$0xff] }
 0x16a   : > { %3205 = vmatmul.mubr.bf16.gmra.mrb[108].mxu1 %v9188_v25  ;;  %v7054_v62 = vadd.f32 %v7053_v41, %v7052_v57  ;;  %v8470_v59 = vld [vmem:[#allocation8 + $0x28] sm:$0xff]   ;;  %v8472_v57 = vld [vmem:[#allocation8 + $0x70] sm:$0xff]  }
 0x16b   : > { %3212 = vmatprep.mubr.bf16.mxu1 %v9233_v52  ;;  %8160 = vmatpush3.bf16.msra.mxu1 %v8450_v48  ;;  %v9258_v63 = vadd.f32 %v7112_v1, %v7048_v45 }
 0x16c   : > { %3278 = vmatmul.mubr.bf16.vlgmr.msra.gmra.mrb[112].mxu0 %v9176_v9  ;;  %8161 = vmatprep.subr.bf16.mxu1 %v8451_v58 }
 0x16d   : > { %v7113_v40 = vpop.f32.mrb[4].mxu1  ;;  %3285 = vmatprep.mubr.bf16.mxu0 %v9178_v35  ;;  %7572 = vmatpush3.bf16.msra.mxu0 %v8453_v61  ;;  %v8457_v35 = vld [vmem:[#allocation8 + $0x10] sm:$0xff]  }
 0x16e   : > { %v7114_v3 = vpop.f32.mrb[5].mxu1  ;;  %v7055_v4 = vpop.f32.mrb[8].mxu0  ;;  %7573 = vmatprep.subr.bf16.mxu0 %v8454_v5  ;;  %v9278_v5 = vpack.c.bf16 %v2192_v53, %v2191_v12 }
 0x16f   : > { %v7115_v7 = vadd.f32 %v7114_v3, %v7113_v40  ;;  %v7116_v10 = vpop.f32.mrb[6].mxu1  ;;  %v7056_v11 = vpop.f32.mrb[9].mxu0  ;;  %8162 = vmatpush3.bf16.msra.mxu1 %v8451_v58 }
 0x170   : > { %v7117_v17 = vpop.f32.mrb[7].mxu1  ;;  %v7057_v18 = vadd.f32 %v7056_v11, %v7055_v4  ;;  %v7058_v20 = vpop.f32.mrb[10].mxu0  ;;  %7635 = vmatprep.subr.bf16.mxu1 %v8460_v0  ;;  %v8474_v0 = vld [vmem:[#allocation8 + $0x30] sm:$0xff]  }
 0x171   : > { %v7118_v9 = vadd.f32 %v7117_v17, %v7116_v10  ;;  %v7059_v21 = vpop.f32.mrb[11].mxu0  ;;  %v9262_v22 = vadd.f32 %v7115_v7, %v7051_v50  ;;  %7574 = vmatpush3.bf16.msra.mxu0 %v8455_v19  ;;  %v2159_v10 = vld [vmem:[#allocation2 + $0x181] sm:$0xff]  ;;  %v2160_v11 = vld [vmem:[#allocation2 + $0x189] sm:$0xff] }
 0x172   : > { %3213 = vmatmul.mubr.bf16.gmra.mrb[112].mxu1 %v9198_v46  ;;  %v7060_v23 = vadd.f32 %v7059_v21, %v7058_v20  ;;  %7575 = vmatprep.subr.bf16.mxu0 %v8456_v6 }
 0x173   : > { %3220 = vmatprep.mubr.bf16.mxu1 %v9240_v13  ;;  %v9266_v24 = vadd.f32 %v7118_v9, %v7054_v62  ;;  %v8484_v9 = vld [vmem:[#allocation8 + $0x140] sm:$0xff]  }
 0x174   : > { %3286 = vmatmul.mubr.bf16.gmra.mrb[116].mxu0 %v9186_v55  ;;  %v8464_v55 = vld [vmem:[#allocation8 + $0x20] sm:$0xff]  }
 0x175   : > { %v7119_v26 = vpop.f32.mrb[8].mxu1  ;;  %3293 = vmatprep.mubr.bf16.mxu0 %v9188_v25  ;;  %7576 = vmatpush3.bf16.msra.mxu0 %v8457_v35  ;;  %v2168_v35 = vpack.c.bf16 %v2160_v11, %v2159_v10 }
 0x176   : > { %v7120_v29 = vpop.f32.mrb[9].mxu1  ;;  %v7061_v33 = vpop.f32.mrb[12].mxu0  ;;  %7577 = vmatprep.subr.bf16.mxu0 %v8458_v37 }
 0x177   : > { %v7121_v36 = vadd.f32 %v7120_v29, %v7119_v26  ;;  %v7122_v15 = vpop.f32.mrb[10].mxu1  ;;  %v7062_v39 = vpop.f32.mrb[13].mxu0 }
 0x178   : > { %v7123_v43 = vpop.f32.mrb[11].mxu1  ;;  %v7063_v45 = vadd.f32 %v7062_v39, %v7061_v33  ;;  %v7064_v47 = vpop.f32.mrb[14].mxu0 }
 0x179   : > { %v7124_v48 = vadd.f32 %v7123_v43, %v7122_v15  ;;  %v7065_v49 = vpop.f32.mrb[15].mxu0  ;;  %v9270_v38 = vadd.f32 %v7121_v36, %v7057_v18  ;;  %7578 = vmatpush3.bf16.msra.mxu0 %v8459_v27  ;;  %v8478_v18 = vld [vmem:[#allocation8 + $0x38] sm:$0xff]  }
 0x17a   : > { %3221 = vmatmul.mubr.bf16.gmra.mrb[116].mxu1 %v9207_v56  ;;  %v7066_v25 = vadd.f32 %v7065_v49, %v7064_v47  ;;  %7579 = vmatprep.subr.bf16.mxu0 %v8462_v34  ;;  %v8463_v49 = vld [vmem:[#allocation8 + $0xc8] sm:$0xff]  }
 0x17b   : > { %3228 = vmatprep.mubr.bf16.mxu1 %v9248_v32  ;;  %v9274_v31 = vadd.f32 %v7124_v48, %v7060_v23 }
 0x17c   : > { %3294 = vmatmul.mubr.bf16.gmra.mrb[120].mxu0 %v9196_v30 }
 0x17d   : > { %v7125_v50 = vpop.f32.mrb[12].mxu1  ;;  %3301 = vmatprep.mubr.bf16.mxu0 %v9198_v46  ;;  %7580 = vmatpush3.bf16.msra.mxu0 %v8464_v55  ;;  %v8476_v46 = vld [vmem:[#allocation8 + $0x78] sm:$0xff]  }
 0x17e   : > { %v7126_v58 = vpop.f32.mrb[13].mxu1  ;;  %v7067_v1 = vpop.f32.mrb[16].mxu0  ;;  %7581 = vmatprep.subr.bf16.mxu0 %v8468_v51 }
 0x17f   : > { %v7127_v41 = vadd.f32 %v7126_v58, %v7125_v50  ;;  %v7128_v61 = vpop.f32.mrb[14].mxu1  ;;  %v7068_v62 = vpop.f32.mrb[17].mxu0  ;;  %v8465_v58 = vld [vmem:[#allocation8 + $0x88] sm:$0xff]  }
 0x180   : > { %v7129_v40 = vpop.f32.mrb[15].mxu1  ;;  %v7069_v19 = vadd.f32 %v7068_v62, %v7067_v1  ;;  %v7070_v3 = vpop.f32.mrb[18].mxu0  ;;  %v8466_v1 = vld [vmem:[#allocation8 + $0xd0] sm:$0xff]  }
 0x181   : > { %v7130_v4 = vadd.f32 %v7129_v40, %v7128_v61  ;;  %v7071_v6 = vpop.f32.mrb[19].mxu0  ;;  %v9280_v30 = vadd.f32 %v7127_v41, %v7063_v45  ;;  %7582 = vmatpush3.bf16.msra.mxu0 %v8470_v59  ;;  %v8461_v45 = vld [vmem:[#allocation8 + $0x80] sm:$0xff]  }
 0x182   : > { %3229 = vmatmul.mubr.bf16.gmra.mrb[120].mxu1 %v9217_v16  ;;  %v7072_v7 = vadd.f32 %v7071_v6, %v7070_v3  ;;  %7583 = vmatprep.subr.bf16.mxu0 %v8472_v57  ;;  %v2257_v40 = vld [vmem:[#allocation2 + $0x1a1] sm:$0xff] }
 0x183   : > { %3236 = vmatprep.mubr.bf16.mxu1 %v9278_v5  ;;  %v9284_v17 = vadd.f32 %v7130_v4, %v7066_v25 }
 0x184   : > { %3302 = vmatmul.mubr.bf16.gmra.mrb[124].mxu0 %v9205_v54 }
 0x185   : > { %v7131_v20 = vpop.f32.mrb[16].mxu1  ;;  %3309 = vmatprep.mubr.bf16.mxu0 %v9207_v56  ;;  %7584 = vmatpush3.bf16.msra.mxu0 %v8474_v0  ;;  %v2256_v0 = vld [vmem:[#allocation2 + $0x199] sm:$0xff] }
 0x186   : > { %v7132_v21 = vpop.f32.mrb[17].mxu1  ;;  %v7073_v23 = vpop.f32.mrb[20].mxu0  ;;  %7585 = vmatprep.subr.bf16.mxu0 %v8476_v46  ;;  %v2265_v11 = vpack.c.bf16 %v2257_v40, %v2256_v0  ;;  %v8482_v40 = vld [vmem:[#allocation8 + $0xf8] sm:$0xff]  }
 0x187   : > { %v7133_v37 = vadd.f32 %v7132_v21, %v7131_v20  ;;  %v7134_v26 = vpop.f32.mrb[18].mxu1  ;;  %v7074_v27 = vpop.f32.mrb[21].mxu0  ;;  %v8471_v21 = vld [vmem:[#allocation8 + $0x98] sm:$0xff]  }
 0x188   : > { %v7135_v29 = vpop.f32.mrb[19].mxu1  ;;  %v7075_v33 = vadd.f32 %v7074_v27, %v7073_v23  ;;  %v7076_v34 = vpop.f32.mrb[22].mxu0  ;;  %v3550_v27 = vld [vmem:[#allocation3 + $0x1] sm:$0xff] }
 0x189   : > { %v7136_v36 = vadd.f32 %v7135_v29, %v7134_v26  ;;  %v7077_v15 = vpop.f32.mrb[23].mxu0  ;;  %v9288_v39 = vadd.f32 %v7133_v37, %v7069_v19  ;;  %7586 = vmatpush3.bf16.msra.mxu0 %v8478_v18  ;;  %v3551_v29 = vld [vmem:[#allocation3 + $0x9] sm:$0xff] }
 0x18a   : > { %3237 = vmatmul.mubr.bf16.gmra.mrb[124].mxu1 %v2168_v35  ;;  %v7078_v54 = vadd.f32 %v7077_v15, %v7076_v34  ;;  %7699 = vmatprep.subr.bf16.mxu0 %v8484_v9 }
 0x18b   : > { %8163 = vmatprep.mubr.bf16.mxu1 %v9209_v8  ;;  %v9291_v56 = vadd.f32 %v7136_v36, %v7072_v7  ;;  %v8469_v7 = vld [vmem:[#allocation8 + $0xd8] sm:$0xff]   ;;  %v8475_v36 = vld [vmem:[#allocation8 + $0xa0] sm:$0xff]  }
 0x18c   : > { %3310 = vmatmul.mubr.bf16.gmra.mrb[128].mxu0 %v9215_v28 }
 0x18d   : > { %v7137_v43 = vpop.f32.mrb[20].mxu1  ;;  %3317 = vmatprep.mubr.bf16.mxu0 %v9217_v16 }
 0x18e   : > { %v7138_v47 = vpop.f32.mrb[21].mxu1  ;;  %v7079_v48 = vpop.f32.mrb[24].mxu0 }
 0x18f   : > { %v7139_v55 = vadd.f32 %v7138_v47, %v7137_v43  ;;  %v7140_v51 = vpop.f32.mrb[22].mxu1  ;;  %v7080_v25 = vpop.f32.mrb[25].mxu0  ;;  %v8596_v43 = vld [vmem:[#allocation2] sm:$0xff] }
 0x190   : > { %v7141_v12 = vpop.f32.mrb[23].mxu1  ;;  %v7081_v53 = vadd.f32 %v7080_v25, %v7079_v48  ;;  %v7082_v59 = vpop.f32.mrb[26].mxu0 }
 0x191   : > { %v7142_v50 = vadd.f32 %v7141_v12, %v7140_v51  ;;  %v7083_v57 = vpop.f32.mrb[27].mxu0  ;;  %v9295_v8 = vadd.f32 %v7139_v55, %v7075_v33  ;;  %v3566_v55 = vpack.c.bf16 %v3551_v29, %v3550_v27  ;;  %v2288_v12 = vld [vmem:[#allocation2 + $0x19a] sm:$0xff] }
 0x192   : > { %8164 = vmatmul.mubr.bf16.vlgmr.msra.gmra.mrb[128].mxu1 %v9219_v2  ;;  %v7084_v28 = vadd.f32 %v7083_v57, %v7082_v59  ;;  %v8467_v2 = vld [vmem:[#allocation8 + $0x90] sm:$0xff]  }
 0x193   : > { %8167 = vmatprep.mubr.bf16.mxu1 %v9227_v44  ;;  %v9299_v16 = vadd.f32 %v7142_v50, %v7078_v54  ;;  %7636 = vmatpush3.bf16.msra.mxu1 %v8461_v45  ;;  %v2233_v45 = vpack.c.bf16 %v8596_v43, %v8596_v43  ;;  %v8479_v50 = vld [vmem:[#allocation8 + $0xa8] sm:$0xff]  }
 0x194   : > { %3318 = vmatmul.mubr.bf16.gmra.mrb[132].mxu0 %v9225_v14  ;;  %7637 = vmatprep.subr.bf16.mxu1 %v8463_v49 }
 0x195   : > { %v7143_v41 = vpop.f32.mrb[24].mxu1  ;;  %3325 = vmatprep.mubr.bf16.mxu0 %v2168_v35  ;;  %v8473_v35 = vld [vmem:[#allocation8 + $0xe0] sm:$0xff]  }
 0x196   : > { %v7144_v61 = vpop.f32.mrb[25].mxu1  ;;  %v7085_v62 = vpop.f32.mrb[28].mxu0 }
 0x197   : > { %v7145_v19 = vadd.f32 %v7144_v61, %v7143_v41  ;;  %v7146_v3 = vpop.f32.mrb[26].mxu1  ;;  %v7086_v4 = vpop.f32.mrb[29].mxu0  ;;  %7638 = vmatpush3.bf16.msra.mxu1 %v8465_v58  ;;  %v8480_v58 = vld [vmem:[#allocation8 + $0xf0] sm:$0xff]  }
 0x198   : > { %v7147_v6 = vpop.f32.mrb[27].mxu1  ;;  %v7087_v44 = vadd.f32 %v7086_v4, %v7085_v62  ;;  %v7088_v46 = vpop.f32.mrb[30].mxu0  ;;  %7639 = vmatprep.subr.bf16.mxu1 %v8466_v1 }
 0x199   : > { %v7148_v10 = vadd.f32 %v7147_v6, %v7146_v3  ;;  %v7089_v14 = vpop.f32.mrb[31].mxu0  ;;  %v9302_v18 = vadd.f32 %v7145_v19, %v7081_v53  ;;  %v2289_v53 = vld [vmem:[#allocation2 + $0x1a2] sm:$0xff] }
 0x19a   : > { %8168 = vmatmul.mubr.bf16.gmra.mrb[132].mxu1 %v9233_v52  ;;  %v7090_v20 = vadd.f32 %v7089_v14, %v7088_v46  ;;  %v8483_v14 = vld [vmem:[#allocation8 + $0xb8] sm:$0xff]  }
 0x19b   : > { %8171 = vmatprep.mubr.bf16.mxu1 %v9240_v13  ;;  %v9306_v9 = vadd.f32 %v7148_v10, %v7084_v28  ;;  %7640 = vmatpush3.bf16.msra.mxu1 %v8467_v2  ;;  %v8485_v2 = vld [vmem:[#allocation8 + $0x100] sm:$0xff]  }
 0x19c   : > { %3326 = vmatmul.mubr.bf16.gmra.mrb[136].mxu0 %v9242_v42  ;;  %7641 = vmatprep.subr.bf16.mxu1 %v8469_v7  ;;  %v8477_v42 = vld [vmem:[#allocation8 + $0xe8] sm:$0xff]  }
 0x19d   : > { %v7149_v23 = vpop.f32.mrb[28].mxu1  ;;  %3333 = vmatprep.mubr.bf16.mxu0 %v2265_v11  ;;  %v8486_v11 = vld [vmem:[#allocation8 + $0x1c0] sm:$0xff]  }
 0x19e   : > { %v7150_v37 = vpop.f32.mrb[29].mxu1  ;;  %v7171_v26 = vpop.f32.mrb[32].mxu0 }
 0x19f   : > { %v7151_v33 = vadd.f32 %v7150_v37, %v7149_v23  ;;  %v7152_v34 = vpop.f32.mrb[30].mxu1  ;;  %v7172_v52 = vpop.f32.mrb[33].mxu0  ;;  %7642 = vmatpush3.bf16.msra.mxu1 %v8471_v21  ;;  %v8492_v37 = vld [vmem:[#allocation8 + $0x150] sm:$0xff]  }
 0x1a0   : > { %v7153_v13 = vpop.f32.mrb[31].mxu1  ;;  %v7173_v15 = vadd.f32 %v7172_v52, %v7171_v26  ;;  %v7174_v54 = vpop.f32.mrb[34].mxu0  ;;  %7643 = vmatprep.subr.bf16.mxu1 %v8473_v35  ;;  %v8489_v35 = vld [vmem:[#allocation8 + $0x108] sm:$0xff]  }
 0x1a1   : > { %v7154_v47 = vadd.f32 %v7153_v13, %v7152_v34  ;;  %v7175_v48 = vpop.f32.mrb[35].mxu0  ;;  %v9309_v49 = vadd.f32 %v7151_v33, %v7087_v44  ;;  %v8488_v44 = vld [vmem:[#allocation8 + $0x148] sm:$0xff]  }
 0x1a2   : > { %8172 = vmatmul.mubr.bf16.gmra.mrb[136].mxu1 %v9248_v32  ;;  %v1680_v51 = vadd.f32 %v7173_v15, %v9254_v60  ;;  %v7176_v25 = vadd.f32 %v7175_v48, %v7174_v54  ;;  %v2297_v32 = vpack.c.bf16 %v2289_v53, %v2288_v12  ;;  %v8493_v15 = vld [vmem:[#allocation8 + $0x110] sm:$0xff]   ;;  %v8496_v54 = vld [vmem:[#allocation8 + $0x158] sm:$0xff]  }
 0x1a3   : > { %8175 = vmatprep.mubr.bf16.mxu1 %v9278_v5  ;;  %v9314_v59 = vadd.f32 %v7154_v47, %v7090_v20  ;;  %7644 = vmatpush3.bf16.msra.mxu1 %v8475_v36  ;;  %v8481_v5 = vld [vmem:[#allocation8 + $0xb0] sm:$0xff]  }
 0x1a4   : > { %v1683_v57 = vadd.f32 %v7176_v25, %v9258_v63  ;;  %3334 = vmatmul.mubr.bf16.gmra.mrb[140].mxu0 %v2233_v45  ;;  %7645 = vmatprep.subr.bf16.mxu1 %v8477_v42  ;;  %v8500_v25 = vld [vmem:[#allocation8 + $0x160] sm:$0xff]  }
 0x1a5   : > { %v7235_v28 = vpop.f32.mrb[32].mxu1  ;;  %4487 = vmatprep.mubr.bf16.mxu0 %v3566_v55  ;;  %v8497_v55 = vld [vmem:[#allocation8 + $0x118] sm:$0xff]  }
 0x1a6   : > { %v7236_v1 = vpop.f32.mrb[33].mxu1 }
 0x1a7   : > { %v7237_v41 = vadd.f32 %v7236_v1, %v7235_v28  ;;  %v7238_v60 = vpop.f32.mrb[34].mxu1  ;;  %v7177_v61 = vpop.f32.mrb[36].mxu0  ;;  %7646 = vmatpush3.bf16.msra.mxu1 %v8479_v50 }
 0x1a8   : > { %v7239_v62 = vpop.f32.mrb[35].mxu1  ;;  %v7178_v0 = vpop.f32.mrb[37].mxu0  ;;  %7647 = vmatprep.subr.bf16.mxu1 %v8480_v58 }
 0x1a9   : > { %v7240_v19 = vadd.f32 %v7239_v62, %v7238_v60  ;;  %v7179_v3 = vadd.f32 %v7178_v0, %v7177_v61  ;;  %v7180_v4 = vpop.f32.mrb[38].mxu0  ;;  %v9317_v63 = vadd.f32 %v7237_v41, %v1680_v51  ;;  %v8501_v41 = vld [vmem:[#allocation8 + $0x120] sm:$0xff]  }
 0x1aa   : > { %8176 = vmatmul.mubr.bf16.gmra.mrb[140].mxu1 %v2297_v32  ;;  %v7181_v6 = vpop.f32.mrb[39].mxu0 }
 0x1ab   : > { %v1688_v46 = vadd.f32 %v7179_v3, %v9262_v22  ;;  %v7182_v7 = vadd.f32 %v7181_v6, %v7180_v4  ;;  %v9320_v10 = vadd.f32 %v7240_v19, %v1683_v57  ;;  %7648 = vmatpush3.bf16.msra.mxu1 %v8481_v5  ;;  %v8505_v19 = vld [vmem:[#allocation8 + $0x128] sm:$0xff]   ;;  %v8506_v4 = vld [vmem:[#allocation8 + $0x170] sm:$0xff]  }
 0x1ac   : > { %4488 = vmatmul.mubr.bf16.vlgmr.msra.gmra.mrb[144].mxu0 %v2233_v45  ;;  %7649 = vmatprep.subr.bf16.mxu1 %v8482_v40 }
 0x1ad   : > { %v7241_v20 = vpop.f32.mrb[36].mxu1  ;;  %v1691_v21 = vadd.f32 %v7182_v7, %v9266_v24  ;;  %7700 = vmatpush3.bf16.msra.mxu0 %v8485_v2 }
 0x1ae   : > { %v7242_v23 = vpop.f32.mrb[37].mxu1  ;;  %7701 = vmatprep.subr.bf16.mxu0 %v8488_v44 }
 0x1af   : > { %v7243_v26 = vadd.f32 %v7242_v23, %v7241_v20  ;;  %v7244_v27 = vpop.f32.mrb[38].mxu1  ;;  %v7183_v29 = vpop.f32.mrb[40].mxu0  ;;  %7650 = vmatpush3.bf16.msra.mxu1 %v8483_v14 }
 0x1b0   : > { %v7245_v22 = vpop.f32.mrb[39].mxu1  ;;  %v7184_v33 = vpop.f32.mrb[41].mxu0  ;;  %7763 = vmatprep.subr.bf16.mxu1 %v8486_v11 }
 0x1b1   : > { %v7246_v34 = vadd.f32 %v7245_v22, %v7244_v27  ;;  %v7185_v52 = vadd.f32 %v7184_v33, %v7183_v29  ;;  %v7186_v36 = vpop.f32.mrb[42].mxu0  ;;  %v9323_v13 = vadd.f32 %v7243_v26, %v1688_v46  ;;  %7702 = vmatpush3.bf16.msra.mxu0 %v8489_v35  ;;  %v8511_v22 = vld [vmem:[#allocation8 + $0x138] sm:$0xff]  }
 0x1b2   : > { %v7187_v24 = vpop.f32.mrb[43].mxu0  ;;  %7703 = vmatprep.subr.bf16.mxu0 %v8492_v37 }
 0x1b3   : > { %v1696_v43 = vadd.f32 %v7185_v52, %v9270_v38  ;;  %v7188_v45 = vadd.f32 %v7187_v24, %v7186_v36  ;;  %v9326_v42 = vadd.f32 %v7246_v34, %v1691_v21  ;;  %v8508_v21 = vld [vmem:[#allocation8 + $0x130] sm:$0xff]   ;;  %v9341_v34 = vld [vmem:[#allocation8 + $0x200] sm:$0xff]  }
 0x1b5   : > { %v7247_v47 = vpop.f32.mrb[40].mxu1  ;;  %v1699_v48 = vadd.f32 %v7188_v45, %v9274_v31  ;;  %7704 = vmatpush3.bf16.msra.mxu0 %v8493_v15  ;;  %v8504_v31 = vld [vmem:[#allocation8 + $0x168] sm:$0xff]  }
 0x1b6   : > { %v7248_v51 = vpop.f32.mrb[41].mxu1  ;;  %7705 = vmatprep.subr.bf16.mxu0 %v8496_v54 }
 0x1b7   : > { %v7249_v12 = vadd.f32 %v7248_v51, %v7247_v47  ;;  %v7250_v53 = vpop.f32.mrb[42].mxu1  ;;  %v7189_v50 = vpop.f32.mrb[44].mxu0 }
 0x1b8   : > { %v7251_v57 = vpop.f32.mrb[43].mxu1  ;;  %v7190_v58 = vpop.f32.mrb[45].mxu0 }
 0x1b9   : > { %v7252_v28 = vadd.f32 %v7251_v57, %v7250_v53  ;;  %v7191_v1 = vadd.f32 %v7190_v58, %v7189_v50  ;;  %v7192_v32 = vpop.f32.mrb[46].mxu0  ;;  %v9329_v38 = vadd.f32 %v7249_v12, %v1696_v43  ;;  %7706 = vmatpush3.bf16.msra.mxu0 %v8497_v55 }
 0x1ba   : > { %v7193_v60 = vpop.f32.mrb[47].mxu0  ;;  %7707 = vmatprep.subr.bf16.mxu0 %v8500_v25 }
 0x1bb   : > { %v1704_v61 = vadd.f32 %v7191_v1, %v9280_v30  ;;  %v7194_v5 = vadd.f32 %v7193_v60, %v7192_v32  ;;  %v9332_v62 = vadd.f32 %v7252_v28, %v1699_v48 }
 0x1bd   : > { %v7253_v0 = vpop.f32.mrb[44].mxu1  ;;  %v1707_v40 = vadd.f32 %v7194_v5, %v9284_v17  ;;  %7708 = vmatpush3.bf16.msra.mxu0 %v8501_v41  ;;  %v8510_v17 = vld [vmem:[#allocation8 + $0x178] sm:$0xff]  }
 0x1be   : > { %v7254_v3 = vpop.f32.mrb[45].mxu1  ;;  %7709 = vmatprep.subr.bf16.mxu0 %v8504_v31 }
 0x1bf   : > { %v7255_v2 = vadd.f32 %v7254_v3, %v7253_v0  ;;  %v7256_v6 = vpop.f32.mrb[46].mxu1  ;;  %v7195_v44 = vpop.f32.mrb[48].mxu0 }
 0x1c0   : > { %v7257_v46 = vpop.f32.mrb[47].mxu1  ;;  %v7196_v7 = vpop.f32.mrb[49].mxu0 }
 0x1c1   : > { %v7258_v14 = vadd.f32 %v7257_v46, %v7256_v6  ;;  %v7197_v11 = vadd.f32 %v7196_v7, %v7195_v44  ;;  %v7198_v20 = vpop.f32.mrb[50].mxu0  ;;  %v9335_v30 = vadd.f32 %v7255_v2, %v1704_v61  ;;  %7710 = vmatpush3.bf16.msra.mxu0 %v8505_v19 }
 0x1c2   : > { %v7199_v35 = vpop.f32.mrb[51].mxu0  ;;  %7711 = vmatprep.subr.bf16.mxu0 %v8506_v4 }
 0x1c3   : > { %v1712_v23 = vadd.f32 %v7197_v11, %v9288_v39  ;;  %v7200_v37 = vadd.f32 %v7199_v35, %v7198_v20  ;;  %v9338_v26 = vadd.f32 %v7258_v14, %v1707_v40 }
 0x1c5   : > { %v7259_v27 = vpop.f32.mrb[48].mxu1  ;;  %v1715_v29 = vadd.f32 %v7200_v37, %v9291_v56  ;;  %7712 = vmatpush3.bf16.msra.mxu0 %v8508_v21 }
 0x1c6   : > { %v7260_v33 = vpop.f32.mrb[49].mxu1  ;;  %7713 = vmatprep.subr.bf16.mxu0 %v8510_v17 }
 0x1c7   : > { %v7261_v52 = vadd.f32 %v7260_v33, %v7259_v27  ;;  %v7262_v36 = vpop.f32.mrb[50].mxu1  ;;  %v7201_v15 = vpop.f32.mrb[52].mxu0 }
 0x1c8   : > { %v7263_v24 = vpop.f32.mrb[51].mxu1  ;;  %v7202_v54 = vpop.f32.mrb[53].mxu0 }
 0x1c9   : > { %v7264_v43 = vadd.f32 %v7263_v24, %v7262_v36  ;;  %v7203_v45 = vadd.f32 %v7202_v54, %v7201_v15  ;;  %v7204_v39 = vpop.f32.mrb[54].mxu0  ;;  %v9343_v47 = vadd.f32 %v7261_v52, %v1712_v23  ;;  %7714 = vmatpush3.bf16.msra.mxu0 %v8511_v22  ;;  %v9365_v22 = vld [vmem:[%s10228_s2] ss:$0 sm:$0xff] }
 0x1ca   : > { %v7205_v48 = vpop.f32.mrb[55].mxu0  ;;  %8179 = vmatprep.subr.bf16.mxu0 %v9341_v34  ;;  %v9371_v15 = vld [vmem:[%s10229_s3] ss:$0 sm:$0xff] }
 0x1cb   : > { %v1720_v56 = vadd.f32 %v7203_v45, %v9295_v8  ;;  %v7206_v55 = vadd.f32 %v7205_v48, %v7204_v39  ;;  %v9347_v51 = vadd.f32 %v7264_v43, %v1715_v29 }
 0x1cd   : > { %v7265_v25 = vpop.f32.mrb[52].mxu1  ;;  %v1723_v12 = vadd.f32 %v7206_v55, %v9299_v16 }
 0x1ce   : > { %v7266_v53 = vpop.f32.mrb[53].mxu1 }
 0x1cf   : > { %v7267_v50 = vadd.f32 %v7266_v53, %v7265_v25  ;;  %v7268_v57 = vpop.f32.mrb[54].mxu1  ;;  %v7207_v58 = vpop.f32.mrb[56].mxu0 }
 0x1d0   : > { %v7269_v28 = vpop.f32.mrb[55].mxu1  ;;  %v7208_v1 = vpop.f32.mrb[57].mxu0 }
 0x1d1   : > { %v7270_v32 = vadd.f32 %v7269_v28, %v7268_v57  ;;  %v7209_v41 = vadd.f32 %v7208_v1, %v7207_v58  ;;  %v7210_v60 = vpop.f32.mrb[58].mxu0  ;;  %v9350_v31 = vadd.f32 %v7267_v50, %v1720_v56 }
 0x1d2   : > { %v7211_v61 = vpop.f32.mrb[59].mxu0 }
 0x1d3   : > { %v1728_v8 = vadd.f32 %v7209_v41, %v9302_v18  ;;  %v7212_v5 = vadd.f32 %v7211_v61, %v7210_v60  ;;  %v9353_v0 = vadd.f32 %v7270_v32, %v1723_v12 }
 0x1d5   : > { %v7271_v40 = vpop.f32.mrb[56].mxu1  ;;  %v1731_v16 = vadd.f32 %v7212_v5, %v9306_v9 }
 0x1d6   : > { %v7272_v19 = vpop.f32.mrb[57].mxu1 }
 0x1d7   : > { %v7273_v3 = vadd.f32 %v7272_v19, %v7271_v40  ;;  %v7274_v4 = vpop.f32.mrb[58].mxu1  ;;  %v7213_v2 = vpop.f32.mrb[60].mxu0 }
 0x1d8   : > { %v7275_v6 = vpop.f32.mrb[59].mxu1  ;;  %v7214_v44 = vpop.f32.mrb[61].mxu0 }
 0x1d9   : > { %v7276_v46 = vadd.f32 %v7275_v6, %v7274_v4  ;;  %v7215_v7 = vadd.f32 %v7214_v44, %v7213_v2  ;;  %v7216_v14 = vpop.f32.mrb[62].mxu0  ;;  %v9356_v11 = vadd.f32 %v7273_v3, %v1728_v8 }
 0x1da   : > { %v7217_v20 = vpop.f32.mrb[63].mxu0 }
 0x1db   : > { %v1736_v18 = vadd.f32 %v7215_v7, %v9309_v49  ;;  %v7218_v21 = vadd.f32 %v7217_v20, %v7216_v14  ;;  %v9359_v35 = vadd.f32 %v7276_v46, %v1731_v16 }
 0x1dd   : > { %v7277_v17 = vpop.f32.mrb[60].mxu1  ;;  %v1739_v9 = vadd.f32 %v7218_v21, %v9314_v59 }
 0x1de   : > { %v7278_v23 = vpop.f32.mrb[61].mxu1 }
 0x1df   : > { %v7279_v37 = vadd.f32 %v7278_v23, %v7277_v17  ;;  %v7280_v27 = vpop.f32.mrb[62].mxu1  ;;  %v8133_v29 = vpop.f32.mrb[64].mxu0 }
 0x1e0   : > { %v7281_v33 = vpop.f32.mrb[63].mxu1  ;;  %v1882_v52 = vadd.f32 %v8133_v29, %v9323_v13  ;;  %v1873_v36 = vpop.f32.mrb[65].mxu0  ;;  %v3582_v29 = vld [vmem:[#allocation3 + $0x2] sm:$0xff] }
 0x1e1   : > { %v7282_v49 = vadd.f32 %v7281_v33, %v7280_v27  ;;  %v1874_v59 = vadd.f32 %v1873_v36, %v9317_v63  ;;  %v8134_v24 = vpop.f32.mrb[66].mxu0  ;;  %v9374_v54 = vadd.f32 %v7279_v37, %v1736_v18  ;;  %v3583_v33 = vld [vmem:[#allocation3 + $0xa] sm:$0xff] }
 0x1e2   : > { %v1945_v43 = vmul.f32 %v9365_v22, %v1882_v52  ;;  %v1885_v45 = vadd.f32 %v8134_v24, %v9326_v42  ;;  %v1876_v39 = vpop.f32.mrb[67].mxu0 }
 0x1e3   : > { %v1943_v48 = vmul.f32 %v9365_v22, %v1874_v59  ;;  %v1877_v13 = vadd.f32 %v1876_v39, %v9320_v10  ;;  %v9380_v56 = vadd.f32 %v7282_v49, %v1739_v9 }
 0x1e4   : > { %v1968_v55 = vadd.f32 %v9371_v15, %v1945_v43  ;;  %v1946_v25 = vmul.f32 %v9365_v22, %v1885_v45 }
 0x1e5   : > { %v7315_v12 = vpop.f32.mrb[64].mxu1  ;;  %v1966_v63 = vadd.f32 %v9371_v15, %v1943_v48  ;;  %v1944_v53 = vmul.f32 %v9365_v22, %v1877_v13 }
 0x1e6   : > { %v1984_v50 = vmax.f32 %v1968_v55, 0.0  ;;  %v7316_v57 = vpop.f32.mrb[65].mxu1  ;;  %v1969_v42 = vadd.f32 %v9371_v15, %v1946_v25 }
 0x1e7   : > { %v1982_v58 = vmax.f32 %v1966_v63, 0.0  ;;  %v9387_v28 = vadd.f32 %v7316_v57, %v7315_v12  ;;  %v7318_v1 = vpop.f32.mrb[66].mxu1  ;;  %v1967_v10 = vadd.f32 %v9371_v15, %v1944_v53  ;;  %v8137_v32 = vpop.f32.mrb[68].mxu0  ;;  %v3598_v63 = vpack.c.bf16 %v3583_v33, %v3582_v29 }
 0x1e8   : > { %2001 = vst [vmem:[#allocation3 + $0x31] sm:$0xff] %v1984_v50  ;;  %v1985_v41 = vmax.f32 %v1969_v42, 0.0  ;;  %v7319_v60 = vpop.f32.mrb[67].mxu1  ;;  %v1898_v61 = vadd.f32 %v8137_v32, %v9335_v30  ;;  %v1889_v8 = vpop.f32.mrb[69].mxu0  ;;  %v8487_v42 = vld [vmem:[#allocation8 + $0x180] sm:$0xff]  }
 0x1e9   : > { %1999 = vst [vmem:[#allocation3 + $0x19] sm:$0xff] %v1982_v58  ;;  %v9391_v5 = vmax.f32 %v1967_v10, 0.0  ;;  %v9393_v40 = vadd.f32 %v7319_v60, %v7318_v1  ;;  %v1890_v16 = vadd.f32 %v1889_v8, %v9329_v38  ;;  %v8138_v19 = vpop.f32.mrb[70].mxu0 }
 0x1ea   : > { %2002 = vst [vmem:[#allocation3 + $0x39] sm:$0xff] %v1985_v41  ;;  %v1949_v3 = vmul.f32 %v9365_v22, %v1898_v61  ;;  %v1901_v4 = vadd.f32 %v8138_v19, %v9338_v26  ;;  %v1892_v2 = vpop.f32.mrb[71].mxu0  ;;  %v3568_v6 = vpack.c.bf16 %v1985_v41, %v1984_v50 }
 0x1eb   : > { %2000 = vst [vmem:[#allocation3 + $0x21] sm:$0xff] %v9391_v5  ;;  %v1947_v30 = vmul.f32 %v9365_v22, %v1890_v16  ;;  %v1893_v44 = vadd.f32 %v1892_v2, %v9332_v62  ;;  %v3567_v46 = vpack.c.bf16 %v9391_v5, %v1982_v58 }
 0x1ec   : > { %v1972_v7 = vadd.f32 %v9371_v15, %v1949_v3  ;;  %v1950_v38 = vmul.f32 %v9365_v22, %v1901_v4 }
 0x1ed   : > { %v7321_v14 = vpop.f32.mrb[68].mxu1  ;;  %v1970_v20 = vadd.f32 %v9371_v15, %v1947_v30  ;;  %v1948_v18 = vmul.f32 %v9365_v22, %v1893_v44  ;;  %4495 = vmatprep.mubr.bf16.mxu0 %v3567_v46  ;;  %v8491_v46 = vld [vmem:[#allocation8 + $0x188] sm:$0xff]  }
 0x1ee   : > { %v1988_v26 = vmax.f32 %v1972_v7, 0.0  ;;  %v7322_v21 = vpop.f32.mrb[69].mxu1  ;;  %v1973_v17 = vadd.f32 %v9371_v15, %v1950_v38 }
 0x1ef   : > { %v1986_v9 = vmax.f32 %v1970_v20, 0.0  ;;  %v9407_v23 = vadd.f32 %v7322_v21, %v7321_v14  ;;  %v7324_v62 = vpop.f32.mrb[70].mxu1  ;;  %v1971_v37 = vadd.f32 %v9371_v15, %v1948_v18  ;;  %v8141_v27 = vpop.f32.mrb[72].mxu0  ;;  %v3616_v1 = vld [vmem:[#allocation3 + $0x30] sm:$0xff] }
 0x1f0   : > { %2005 = vst [vmem:[#allocation3 + $0x61] sm:$0xff] %v1988_v26  ;;  %v1989_v52 = vmax.f32 %v1973_v17, 0.0  ;;  %v7325_v36 = vpop.f32.mrb[71].mxu1  ;;  %v1914_v49 = vadd.f32 %v8141_v27, %v9350_v31  ;;  %v1905_v59 = vpop.f32.mrb[73].mxu0  ;;  %v3614_v25 = vld [vmem:[#allocation3 + $0x18] sm:$0xff] }
 0x1f1   : > { %2003 = vst [vmem:[#allocation3 + $0x49] sm:$0xff] %v1986_v9  ;;  %v1987_v24 = vmax.f32 %v1971_v37, 0.0  ;;  %v9411_v43 = vadd.f32 %v7325_v36, %v7324_v62  ;;  %v1906_v45 = vadd.f32 %v1905_v59, %v9343_v47  ;;  %v8142_v39 = vpop.f32.mrb[74].mxu0  ;;  %v3617_v53 = vld [vmem:[#allocation3 + $0x38] sm:$0xff] }
 0x1f2   : > { %2006 = vst [vmem:[#allocation3 + $0x69] sm:$0xff] %v1989_v52  ;;  %v1953_v48 = vmul.f32 %v9365_v22, %v1914_v49  ;;  %v1917_v13 = vadd.f32 %v8142_v39, %v9353_v0  ;;  %v1908_v55 = vpop.f32.mrb[75].mxu0  ;;  %v3615_v12 = vld [vmem:[#allocation3 + $0x20] sm:$0xff]  ;;  %v8490_v0 = vld [vmem:[#allocation8 + $0x1c8] sm:$0xff]   ;;  %v9422_v32 = vpack.c.bf16 %v1989_v52, %v1988_v26 }
 0x1f3   : > { %2004 = vst [vmem:[#allocation3 + $0x51] sm:$0xff] %v1987_v24  ;;  %v1951_v31 = vmul.f32 %v9365_v22, %v1906_v45  ;;  %v1909_v50 = vadd.f32 %v1908_v55, %v9347_v51  ;;  %v3630_v57 = vpack.c.bf16 %v3615_v12, %v3614_v25  ;;  %v9420_v10 = vpack.c.bf16 %v1987_v24, %v1986_v9  ;;  %v3584_v18 = vld [vmem:[#allocation3 + $0x1a] sm:$0xff]  ;;  %v3585_v26 = vld [vmem:[#allocation3 + $0x22] sm:$0xff] }
 0x1f4   : > { %v1976_v47 = vadd.f32 %v9371_v15, %v1953_v48  ;;  %v1954_v58 = vmul.f32 %v9365_v22, %v1917_v13  ;;  %v9426_v51 = vpack.c.bf16 %v3617_v53, %v3616_v1  ;;  %v9444_v36 = vpack.c.bf16 %v3585_v26, %v3584_v18  ;;  %v8495_v49 = vld [vmem:[#allocation8 + $0x190] sm:$0xff]   ;;  %v8498_v45 = vld [vmem:[#allocation8 + $0x1d8] sm:$0xff]  }
 0x1f5   : > { %v7327_v41 = vpop.f32.mrb[72].mxu1  ;;  %v1974_v60 = vadd.f32 %v9371_v15, %v1951_v31  ;;  %v1952_v61 = vmul.f32 %v9365_v22, %v1909_v50  ;;  %4584 = vmatprep.mubr.bf16.mxu1 %v3630_v57  ;;  %4496 = vmatmul.mubr.bf16.gmra.mrb[148].mxu0 %v3630_v57 }
 0x1f6   : > { %v1992_v8 = vmax.f32 %v1976_v47, 0.0  ;;  %v7328_v16 = vpop.f32.mrb[73].mxu1  ;;  %v1977_v19 = vadd.f32 %v9371_v15, %v1954_v58  ;;  %4585 = vmatmul.mubr.bf16.vlgmr.msra.gmra.mrb[144].mxu1 %v3598_v63  ;;  %4503 = vmatprep.mubr.bf16.mxu0 %v3568_v6  ;;  %v8494_v6 = vld [vmem:[#allocation8 + $0x1d0] sm:$0xff]  }
 0x1f7   : > { %v1990_v3 = vmax.f32 %v1974_v60, 0.0  ;;  %v9429_v4 = vadd.f32 %v7328_v16, %v7327_v41  ;;  %v7330_v2 = vpop.f32.mrb[74].mxu1  ;;  %v1975_v30 = vadd.f32 %v9371_v15, %v1952_v61  ;;  %v8145_v44 = vpop.f32.mrb[76].mxu0  ;;  %4592 = vmatprep.mubr.bf16.mxu1 %v9426_v51  ;;  %7764 = vmatpush3.bf16.msra.mxu1 %v8487_v42  ;;  %v3586_v16 = vld [vmem:[#allocation3 + $0x32] sm:$0xff] }
 0x1f8   : > { %2009 = vst [vmem:[#allocation3 + $0x91] sm:$0xff] %v1992_v8  ;;  %v1993_v7 = vmax.f32 %v1977_v19, 0.0  ;;  %v7331_v38 = vpop.f32.mrb[75].mxu1  ;;  %v1930_v14 = vadd.f32 %v8145_v44, %v9374_v54  ;;  %v1921_v20 = vpop.f32.mrb[77].mxu0  ;;  %7765 = vmatprep.subr.bf16.mxu1 %v8490_v0  ;;  %v3618_v24 = vld [vmem:[#allocation3 + $0x48] sm:$0xff]  ;;  %v8502_v0 = vld [vmem:[#allocation8 + $0x1e0] sm:$0xff]  }
 0x1f9   : > { %2007 = vst [vmem:[#allocation3 + $0x79] sm:$0xff] %v1990_v3  ;;  %v9434_v21 = vmax.f32 %v1975_v30, 0.0  ;;  %v9436_v17 = vadd.f32 %v7331_v38, %v7330_v2  ;;  %v1922_v9 = vadd.f32 %v1921_v20, %v9356_v11  ;;  %v8146_v62 = vpop.f32.mrb[78].mxu0  ;;  %v3587_v19 = vld [vmem:[#allocation3 + $0x3a] sm:$0xff]  ;;  %v8503_v44 = vld [vmem:[#allocation8 + $0x1a0] sm:$0xff]  }
 0x1fa   : > { %2010 = vst [vmem:[#allocation3 + $0x99] sm:$0xff] %v1993_v7  ;;  %v1957_v37 = vmul.f32 %v9365_v22, %v1930_v14  ;;  %v1933_v27 = vadd.f32 %v8146_v62, %v9380_v56  ;;  %v1924_v29 = vpop.f32.mrb[79].mxu0  ;;  %v3619_v54 = vld [vmem:[#allocation3 + $0x50] sm:$0xff]  ;;  %v9451_v39 = vpack.c.bf16 %v1993_v7, %v1992_v8  ;;  %v3620_v7 = vld [vmem:[#allocation3 + $0x60] sm:$0xff]  ;;  %v8507_v14 = vld [vmem:[#allocation8 + $0x1e8] sm:$0xff]  }
 0x1fb   : > { %2008 = vst [vmem:[#allocation3 + $0x81] sm:$0xff] %v9434_v21  ;;  %v1955_v33 = vmul.f32 %v9365_v22, %v1922_v9  ;;  %v1925_v52 = vadd.f32 %v1924_v29, %v9359_v35  ;;  %7766 = vmatpush3.bf16.msra.mxu1 %v8491_v46  ;;  %v9449_v56 = vpack.c.bf16 %v9434_v21, %v1990_v3  ;;  %v3621_v3 = vld [vmem:[#allocation3 + $0x68] sm:$0xff]  ;;  %v8512_v29 = vld [vmem:[#allocation8 + $0x1f0] sm:$0xff]  }
 0x1fc   : > { %v1980_v11 = vadd.f32 %v9371_v15, %v1957_v37  ;;  %v1958_v59 = vmul.f32 %v9365_v22, %v1933_v27  ;;  %7767 = vmatprep.subr.bf16.mxu1 %v8494_v6  ;;  %v9456_v55 = vpack.c.bf16 %v3619_v54, %v3618_v24  ;;  %v9470_v46 = vpack.c.bf16 %v3587_v19, %v3586_v16  ;;  %v8509_v37 = vld [vmem:[#allocation8 + $0x1a8] sm:$0xff]  }
 0x1fd   : > { %v7333_v48 = vpop.f32.mrb[76].mxu1  ;;  %v1978_v13 = vadd.f32 %v9371_v15, %v1955_v33  ;;  %v1956_v35 = vmul.f32 %v9365_v22, %v1925_v52  ;;  %4504 = vmatmul.mubr.bf16.gmra.mrb[152].mxu0 %v9426_v51  ;;  %v8499_v22 = vld [vmem:[#allocation8 + $0x198] sm:$0xff]   ;;  %v9478_v26 = vpack.c.bf16 %v3621_v3, %v3620_v7 }
 0x1fe   : > { %v1996_v25 = vmax.f32 %v1980_v11, 0.0  ;;  %v7334_v12 = vpop.f32.mrb[77].mxu1  ;;  %v1981_v63 = vadd.f32 %v9371_v15, %v1958_v59  ;;  %4593 = vmatmul.mubr.bf16.gmra.mrb[148].mxu1 %v9444_v36  ;;  %4511 = vmatprep.mubr.bf16.mxu0 %v9420_v10  ;;  %v3589_v11 = vld [vmem:[#allocation3 + $0x52] sm:$0xff] }
 0x1ff   : > { %v1994_v53 = vmax.f32 %v1978_v13, 0.0  ;;  %v9461_v31 = vadd.f32 %v7334_v12, %v7333_v48  ;;  %v7336_v50 = vpop.f32.mrb[78].mxu1  ;;  %v1979_v57 = vadd.f32 %v9371_v15, %v1956_v35  ;;  %v7379_v42 = vpop.f32.mrb[80].mxu0  ;;  %4600 = vmatprep.mubr.bf16.mxu1 %v9456_v55  ;;  %7768 = vmatpush3.bf16.msra.mxu1 %v8495_v49  ;;  %v3588_v49 = vld [vmem:[#allocation3 + $0x4a] sm:$0xff]  ;;  %v8513_v48 = vld [vmem:[#allocation8 + $0x1b0] sm:$0xff]  }
 0x200   : > { %2013 = vst [vmem:[#allocation3 + $0xc1] sm:$0xff] %v1996_v25  ;;  %v1997_v47 = vmax.f32 %v1981_v63, 0.0  ;;  %v7337_v58 = vpop.f32.mrb[79].mxu1  ;;  %v7380_v1 = vpop.f32.mrb[81].mxu0  ;;  %7769 = vmatprep.subr.bf16.mxu1 %v8498_v45  ;;  %v9490_v13 = vpack.c.bf16 %v3589_v11, %v3588_v49  ;;  %v3622_v35 = vld [vmem:[#allocation3 + $0x78] sm:$0xff]  ;;  %v8514_v25 = vld [vmem:[#allocation8 + $0x1f8] sm:$0xff]  }
 0x201   : > { %2011 = vst [vmem:[#allocation3 + $0xa9] sm:$0xff] %v1994_v53  ;;  %v1995_v41 = vmax.f32 %v1979_v57, 0.0  ;;  %v9465_v60 = vadd.f32 %v7337_v58, %v7336_v50  ;;  %v7381_v61 = vadd.f32 %v7380_v1, %v7379_v42  ;;  %v7382_v8 = vpop.f32.mrb[82].mxu0  ;;  %v8517_v58 = vld [vmem:[#allocation8 + $0x40] sm:$0xff]  }
 0x202   : > { %2014 = vst [vmem:[#allocation3 + $0xc9] sm:$0xff] %v1997_v47  ;;  %v7383_v15 = vpop.f32.mrb[83].mxu0 }
 0x203   : > { %2012 = vst [vmem:[#allocation3 + $0xb1] sm:$0xff] %v1995_v41  ;;  %v9468_v2 = vadd.f32 %v7381_v61, %v9387_v28  ;;  %v7384_v30 = vadd.f32 %v7383_v15, %v7382_v8  ;;  %7770 = vmatpush3.bf16.msra.mxu1 %v8499_v22  ;;  %v9472_v38 = vpack.c.bf16 %v1995_v41, %v1994_v53  ;;  %v8515_v22 = vld [vmem:[#allocation8 + $0x1b8] sm:$0xff]  }
 0x204   : > { %7771 = vmatprep.subr.bf16.mxu1 %v8502_v0  ;;  %v3590_v61 = vld [vmem:[#allocation3 + $0x62] sm:$0xff]  ;;  %v3591_v8 = vld [vmem:[#allocation3 + $0x6a] sm:$0xff] }
 0x205   : > { %v7339_v20 = vpop.f32.mrb[80].mxu1  ;;  %v9475_v18 = vadd.f32 %v7384_v30, %v9393_v40  ;;  %4512 = vmatmul.mubr.bf16.gmra.mrb[156].mxu0 %v9456_v55  ;;  %v9508_v3 = vpack.c.bf16 %v3591_v8, %v3590_v61  ;;  %v3624_v30 = vld [vmem:[#allocation3 + $0x90] sm:$0xff] }
 0x206   : > { %v7340_v28 = vpop.f32.mrb[81].mxu1  ;;  %4601 = vmatmul.mubr.bf16.gmra.mrb[152].mxu1 %v9470_v46  ;;  %4519 = vmatprep.mubr.bf16.mxu0 %v9422_v32  ;;  %v3623_v32 = vld [vmem:[#allocation3 + $0x80] sm:$0xff] }
 0x207   : > { %v9482_v6 = vadd.f32 %v7340_v28, %v7339_v20  ;;  %v7342_v9 = vpop.f32.mrb[82].mxu1  ;;  %v7385_v62 = vpop.f32.mrb[84].mxu0  ;;  %4608 = vmatprep.mubr.bf16.mxu1 %v9478_v26  ;;  %7772 = vmatpush3.bf16.msra.mxu1 %v8503_v44  ;;  %v9496_v53 = vpack.c.bf16 %v3623_v32, %v3622_v35 }
 0x208   : > { %v7343_v27 = vpop.f32.mrb[83].mxu1  ;;  %v7386_v40 = vpop.f32.mrb[85].mxu0  ;;  %7773 = vmatprep.subr.bf16.mxu1 %v8507_v14  ;;  %v3626_v32 = vld [vmem:[#allocation3 + $0xa8] sm:$0xff] }
 0x209   : > { %v9485_v54 = vadd.f32 %v7343_v27, %v7342_v9  ;;  %v7387_v33 = vadd.f32 %v7386_v40, %v7385_v62  ;;  %v7388_v52 = vpop.f32.mrb[86].mxu0 }
 0x20a   : > { %v7389_v59 = vpop.f32.mrb[87].mxu0  ;;  %v3627_v49 = vld [vmem:[#allocation3 + $0xb0] sm:$0xff] }
 0x20b   : > { %v9488_v24 = vadd.f32 %v7387_v33, %v9407_v23  ;;  %v7390_v45 = vadd.f32 %v7389_v59, %v7388_v52  ;;  %7774 = vmatpush3.bf16.msra.mxu1 %v8509_v37  ;;  %v3593_v33 = vld [vmem:[#allocation3 + $0x82] sm:$0xff]  ;;  %v9532_v35 = vpack.c.bf16 %v3627_v49, %v3626_v32 }
 0x20c   : > { %7775 = vmatprep.subr.bf16.mxu1 %v8512_v29  ;;  %v3592_v29 = vld [vmem:[#allocation3 + $0x7a] sm:$0xff] }
 0x20d   : > { %v7345_v12 = vpop.f32.mrb[84].mxu1  ;;  %v9493_v63 = vadd.f32 %v7390_v45, %v9411_v43  ;;  %4520 = vmatmul.mubr.bf16.gmra.mrb[160].mxu0 %v9478_v26  ;;  %v9526_v59 = vpack.c.bf16 %v3593_v33, %v3592_v29  ;;  %v3596_v33 = vld [vmem:[#allocation3 + $0xaa] sm:$0xff] }
 0x20e   : > { %v7346_v50 = vpop.f32.mrb[85].mxu1  ;;  %4609 = vmatmul.mubr.bf16.gmra.mrb[156].mxu1 %v9490_v13  ;;  %4527 = vmatprep.mubr.bf16.mxu0 %v9449_v56  ;;  %v3625_v56 = vld [vmem:[#allocation3 + $0x98] sm:$0xff] }
 0x20f   : > { %v9500_v23 = vadd.f32 %v7346_v50, %v7345_v12  ;;  %v7348_v57 = vpop.f32.mrb[86].mxu1  ;;  %v7391_v42 = vpop.f32.mrb[88].mxu0  ;;  %4616 = vmatprep.mubr.bf16.mxu1 %v9496_v53  ;;  %7776 = vmatpush3.bf16.msra.mxu1 %v8513_v48  ;;  %v9514_v14 = vpack.c.bf16 %v3625_v56, %v3624_v30 }
 0x210   : > { %v7349_v47 = vpop.f32.mrb[87].mxu1  ;;  %v7392_v43 = vpop.f32.mrb[89].mxu0  ;;  %7777 = vmatprep.subr.bf16.mxu1 %v8514_v25 }
 0x211   : > { %v9503_v1 = vadd.f32 %v7349_v47, %v7348_v57  ;;  %v7393_v0 = vadd.f32 %v7392_v43, %v7391_v42  ;;  %v7394_v41 = vpop.f32.mrb[90].mxu0  ;;  %v3594_v43 = vld [vmem:[#allocation3 + $0x92] sm:$0xff] }
 0x212   : > { %v7395_v16 = vpop.f32.mrb[91].mxu0 }
 0x213   : > { %v9506_v19 = vadd.f32 %v7393_v0, %v9429_v4  ;;  %v7396_v15 = vadd.f32 %v7395_v16, %v7394_v41  ;;  %7778 = vmatpush3.bf16.msra.mxu1 %v8515_v22  ;;  %v3629_v41 = vld [vmem:[#allocation3 + $0xc8] sm:$0xff]  ;;  %v3628_v16 = vld [vmem:[#allocation3 + $0xc0] sm:$0xff] }
 0x214   : > { %7843 = vmatprep.subr.bf16.mxu1 %v8517_v58  ;;  %v3595_v58 = vld [vmem:[#allocation3 + $0x9a] sm:$0xff]  ;;  %v9550_v30 = vpack.c.bf16 %v3629_v41, %v3628_v16 }
 0x215   : > { %v7351_v44 = vpop.f32.mrb[88].mxu1  ;;  %v9511_v7 = vadd.f32 %v7396_v15, %v9436_v17  ;;  %4528 = vmatmul.mubr.bf16.gmra.mrb[164].mxu0 %v9496_v53  ;;  %v9544_v8 = vpack.c.bf16 %v3595_v58, %v3594_v43 }
 0x216   : > { %v7352_v20 = vpop.f32.mrb[89].mxu1  ;;  %4617 = vmatmul.mubr.bf16.gmra.mrb[160].mxu1 %v9508_v3  ;;  %4535 = vmatprep.mubr.bf16.mxu0 %v9451_v39 }
 0x217   : > { %v9518_v4 = vadd.f32 %v7352_v20, %v7351_v44  ;;  %v7354_v28 = vpop.f32.mrb[90].mxu1  ;;  %v7397_v9 = vpop.f32.mrb[92].mxu0  ;;  %4624 = vmatprep.mubr.bf16.mxu1 %v9514_v14 }
 0x218   : > { %v7355_v62 = vpop.f32.mrb[91].mxu1  ;;  %v7398_v37 = vpop.f32.mrb[93].mxu0 }
 0x219   : > { %v9521_v27 = vadd.f32 %v7355_v62, %v7354_v28  ;;  %v7399_v17 = vadd.f32 %v7398_v37, %v7397_v9  ;;  %v7400_v40 = vpop.f32.mrb[94].mxu0  ;;  %v3646_v37 = vld [vmem:[#allocation3 + $0x19] sm:$0xff] }
 0x21a   : > { %v7401_v52 = vpop.f32.mrb[95].mxu0 }
 0x21b   : > { %v9524_v11 = vadd.f32 %v7399_v17, %v9461_v31  ;;  %v7402_v39 = vadd.f32 %v7401_v52, %v7400_v40  ;;  %v3597_v52 = vld [vmem:[#allocation3 + $0xb2] sm:$0xff] }
 0x21d   : > { %v7357_v45 = vpop.f32.mrb[92].mxu1  ;;  %v9529_v48 = vadd.f32 %v7402_v39, %v9465_v60  ;;  %4536 = vmatmul.mubr.bf16.gmra.mrb[168].mxu0 %v9514_v14  ;;  %v3744_v39 = vld [vmem:[#allocation3 + $0x39] sm:$0xff] }
 0x21e   : > { %v7358_v25 = vpop.f32.mrb[93].mxu1  ;;  %4625 = vmatmul.mubr.bf16.gmra.mrb[164].mxu1 %v9526_v59  ;;  %4543 = vmatprep.mubr.bf16.mxu0 %v9472_v38 }
 0x21f   : > { %v9536_v12 = vadd.f32 %v7358_v25, %v7357_v45  ;;  %v7360_v31 = vpop.f32.mrb[94].mxu1  ;;  %v7403_v50 = vpop.f32.mrb[96].mxu0  ;;  %4632 = vmatprep.mubr.bf16.mxu1 %v9532_v35  ;;  %v3662_v25 = vpack.c.bf16 %v9391_v5, %v3646_v37 }
 0x220   : > { %v7361_v57 = vpop.f32.mrb[95].mxu1  ;;  %v7404_v42 = vpop.f32.mrb[97].mxu0 }
 0x221   : > { %v9539_v22 = vadd.f32 %v7361_v57, %v7360_v31  ;;  %v7405_v60 = vadd.f32 %v7404_v42, %v7403_v50  ;;  %v7406_v47 = vpop.f32.mrb[98].mxu0  ;;  %v9565_v31 = vpack.c.bf16 %v3597_v52, %v3596_v33  ;;  %v8519_v50 = vld [vmem:[#allocation8 + $0x208] sm:$0xff]  }
 0x222   : > { %v7407_v0 = vpop.f32.mrb[99].mxu0  ;;  %v3651_v33 = vld [vmem:[#allocation3 + $0x51] sm:$0xff] }
 0x223   : > { %v9542_v61 = vadd.f32 %v7405_v60, %v9482_v6  ;;  %v7408_v38 = vadd.f32 %v7407_v0, %v7406_v47  ;;  %v8522_v0 = vld [vmem:[#allocation8 + $0x210] sm:$0xff]  }
 0x225   : > { %v7443_v56 = vpop.f32.mrb[96].mxu1  ;;  %v9547_v15 = vadd.f32 %v7408_v38, %v9485_v54  ;;  %4544 = vmatmul.mubr.bf16.gmra.mrb[172].mxu0 %v9532_v35 }
 0x226   : > { %v7444_v44 = vpop.f32.mrb[97].mxu1  ;;  %4633 = vmatmul.mubr.bf16.gmra.mrb[168].mxu1 %v9544_v8  ;;  %4681 = vmatprep.mubr.bf16.mxu0 %v9444_v36 }
 0x227   : > { %v7445_v20 = vadd.f32 %v7444_v44, %v7443_v56  ;;  %v7446_v6 = vpop.f32.mrb[98].mxu1  ;;  %v7409_v28 = vpop.f32.mrb[100].mxu0  ;;  %4640 = vmatprep.mubr.bf16.mxu1 %v9550_v30 }
 0x228   : > { %v7447_v9 = vpop.f32.mrb[99].mxu1  ;;  %v7410_v62 = vpop.f32.mrb[101].mxu0 }
 0x229   : > { %v9556_v54 = vadd.f32 %v7445_v20, %v9468_v2  ;;  %v7448_v17 = vadd.f32 %v7447_v9, %v7446_v6  ;;  %v7411_v40 = vadd.f32 %v7410_v62, %v7409_v28  ;;  %v7412_v29 = vpop.f32.mrb[102].mxu0  ;;  %v3743_v2 = vld [vmem:[#allocation3 + $0x31] sm:$0xff] }
 0x22a   : > { %v7413_v49 = vpop.f32.mrb[103].mxu0  ;;  %v3759_v60 = vpack.c.bf16 %v3744_v39, %v3743_v2  ;;  %v8518_v6 = vld [vmem:[#allocation8] sm:$0xff]  }
 0x22b   : > { %v9559_v36 = vadd.f32 %v7448_v17, %v9475_v18  ;;  %v9562_v32 = vadd.f32 %v7411_v40, %v9500_v23  ;;  %v7414_v45 = vadd.f32 %v7413_v49, %v7412_v29  ;;  %v8521_v17 = vld [vmem:[#allocation8 + $0x8] sm:$0xff]   ;;  %v3748_v2 = vld [vmem:[#allocation3 + $0x69] sm:$0xff] }
 0x22d   : > { %v7449_v57 = vpop.f32.mrb[100].mxu1  ;;  %v9568_v42 = vadd.f32 %v7414_v45, %v9503_v1  ;;  %4682 = vmatmul.mubr.bf16.vlgmr.msra.gmra.mrb[176].mxu0 %v3662_v25  ;;  %v3650_v25 = vld [vmem:[#allocation3 + $0x49] sm:$0xff] }
 0x22e   : > { %v7450_v47 = vpop.f32.mrb[101].mxu1  ;;  %4641 = vmatmul.mubr.bf16.gmra.mrb[172].mxu1 %v9565_v31  ;;  %4689 = vmatprep.mubr.bf16.mxu0 %v9470_v46 }
 0x22f   : > { %v7451_v18 = vadd.f32 %v7450_v47, %v7449_v57  ;;  %v7452_v23 = vpop.f32.mrb[102].mxu1  ;;  %v7415_v43 = vpop.f32.mrb[104].mxu0  ;;  %4778 = vmatprep.mubr.bf16.mxu1 %v3759_v60  ;;  %8180 = vmatpush3.bf16.msra.mxu0 %v9341_v34  ;;  %v8520_v34 = vld [vmem:[#allocation8 + $0x48] sm:$0xff]   ;;  %v8524_v47 = vld [vmem:[#allocation8 + $0x10] sm:$0xff]  }
 0x230   : > { %v7453_v5 = vpop.f32.mrb[103].mxu1  ;;  %v7416_v58 = vpop.f32.mrb[105].mxu0  ;;  %8181 = vmatprep.subr.bf16.mxu0 %v8519_v50 }
 0x231   : > { %v9574_v1 = vadd.f32 %v7451_v18, %v9488_v24  ;;  %v7454_v41 = vadd.f32 %v7453_v5, %v7452_v23  ;;  %v7417_v38 = vadd.f32 %v7416_v58, %v7415_v43  ;;  %v7418_v16 = vpop.f32.mrb[106].mxu0  ;;  %v8525_v24 = vld [vmem:[#allocation8 + $0x218] sm:$0xff]  }
 0x232   : > { %v7419_v56 = vpop.f32.mrb[107].mxu0  ;;  %v8526_v18 = vld [vmem:[#allocation8 + $0x58] sm:$0xff]  }
 0x233   : > { %v9577_v44 = vadd.f32 %v7454_v41, %v9493_v63  ;;  %v9580_v46 = vadd.f32 %v7417_v38, %v9518_v4  ;;  %v7420_v20 = vadd.f32 %v7419_v56, %v7418_v16  ;;  %8182 = vmatpush3.bf16.msra.mxu0 %v8519_v50  ;;  %v8527_v38 = vld [vmem:[#allocation8 + $0x18] sm:$0xff]  }
 0x234   : > { %8183 = vmatprep.subr.bf16.mxu0 %v8522_v0 }
 0x235   : > { %v7455_v28 = vpop.f32.mrb[104].mxu1  ;;  %v9583_v9 = vadd.f32 %v7420_v20, %v9521_v27  ;;  %4690 = vmatmul.mubr.bf16.gmra.mrb[180].mxu0 %v3759_v60  ;;  %v8523_v27 = vld [vmem:[#allocation8 + $0x50] sm:$0xff]   ;;  %v3664_v60 = vpack.c.bf16 %v3651_v33, %v3650_v25  ;;  %v8535_v33 = vld [vmem:[#allocation8 + $0x238] sm:$0xff]  }
 0x236   : > { %v7456_v62 = vpop.f32.mrb[105].mxu1  ;;  %4779 = vmatmul.mubr.bf16.vlgmr.msra.gmra.mrb[176].mxu1 %v9426_v51  ;;  %4697 = vmatprep.mubr.bf16.mxu0 %v9490_v13  ;;  %v8528_v13 = vld [vmem:[#allocation8 + $0x220] sm:$0xff]  }
 0x237   : > { %v7457_v63 = vadd.f32 %v7456_v62, %v7455_v28  ;;  %v7458_v37 = vpop.f32.mrb[106].mxu1  ;;  %v7421_v4 = vpop.f32.mrb[108].mxu0  ;;  %4786 = vmatprep.mubr.bf16.mxu1 %v9420_v10  ;;  %7844 = vmatpush3.bf16.msra.mxu1 %v8518_v6 }
 0x238   : > { %v7459_v40 = vpop.f32.mrb[107].mxu1  ;;  %v7422_v29 = vpop.f32.mrb[109].mxu0  ;;  %7845 = vmatprep.subr.bf16.mxu1 %v8520_v34  ;;  %8184 = vmatpush3.bf16.msra.mxu0 %v8522_v0 }
 0x239   : > { %v9589_v52 = vadd.f32 %v7457_v63, %v9506_v19  ;;  %v7460_v49 = vadd.f32 %v7459_v40, %v7458_v37  ;;  %v7423_v51 = vadd.f32 %v7422_v29, %v7421_v4  ;;  %v7424_v39 = vpop.f32.mrb[110].mxu0  ;;  %8185 = vmatprep.subr.bf16.mxu0 %v8525_v24  ;;  %v3747_v19 = vld [vmem:[#allocation3 + $0x61] sm:$0xff]  ;;  %v8530_v37 = vld [vmem:[#allocation8 + $0x20] sm:$0xff]  }
 0x23a   : > { %v7425_v45 = vpop.f32.mrb[111].mxu0  ;;  %v3761_v5 = vpack.c.bf16 %v3748_v2, %v3747_v19 }
 0x23b   : > { %v9592_v10 = vadd.f32 %v7460_v49, %v9511_v7  ;;  %v9595_v50 = vadd.f32 %v7423_v51, %v9536_v12  ;;  %v7426_v57 = vadd.f32 %v7425_v45, %v7424_v39  ;;  %7846 = vmatpush3.bf16.msra.mxu1 %v8521_v17  ;;  %v8531_v7 = vld [vmem:[#allocation8 + $0x228] sm:$0xff]   ;;  %v3655_v45 = vld [vmem:[#allocation3 + $0x81] sm:$0xff] }
 0x23c   : > { %7847 = vmatprep.subr.bf16.mxu1 %v8523_v27  ;;  %8186 = vmatpush3.bf16.msra.mxu0 %v8525_v24  ;;  %v3749_v24 = vld [vmem:[#allocation3 + $0x79] sm:$0xff] }
 0x23d   : > { %v7461_v23 = vpop.f32.mrb[108].mxu1  ;;  %v9598_v43 = vadd.f32 %v7426_v57, %v9539_v22  ;;  %4698 = vmatmul.mubr.bf16.gmra.mrb[184].mxu0 %v3664_v60  ;;  %8187 = vmatprep.subr.bf16.mxu0 %v8528_v13  ;;  %v8529_v22 = vld [vmem:[#allocation8 + $0x60] sm:$0xff]   ;;  %v3762_v40 = vpack.c.bf16 %v9434_v21, %v3749_v24  ;;  %v8534_v51 = vld [vmem:[#allocation8 + $0x28] sm:$0xff]   ;;  %v8536_v21 = vld [vmem:[#allocation8 + $0x70] sm:$0xff]  }
 0x23e   : > { %v7462_v58 = vpop.f32.mrb[109].mxu1  ;;  %4787 = vmatmul.mubr.bf16.gmra.mrb[180].mxu1 %v9456_v55  ;;  %4705 = vmatprep.mubr.bf16.mxu0 %v9508_v3  ;;  %v8532_v55 = vld [vmem:[#allocation8 + $0x230] sm:$0xff]  }
 0x23f   : > { %v7463_v12 = vadd.f32 %v7462_v58, %v7461_v23  ;;  %v7464_v0 = vpop.f32.mrb[110].mxu1  ;;  %v7507_v41 = vpop.f32.mrb[112].mxu0  ;;  %4794 = vmatprep.mubr.bf16.mxu1 %v3761_v5  ;;  %7848 = vmatpush3.bf16.msra.mxu1 %v8524_v47  ;;  %v3752_v60 = vld [vmem:[#allocation3 + $0x99] sm:$0xff] }
 0x240   : > { %v7465_v16 = vpop.f32.mrb[111].mxu1  ;;  %v7508_v56 = vpop.f32.mrb[113].mxu0  ;;  %7849 = vmatprep.subr.bf16.mxu1 %v8526_v18  ;;  %8188 = vmatpush3.bf16.msra.mxu0 %v8528_v13  ;;  %v3666_v18 = vpack.c.bf16 %v3655_v45, %v3749_v24 }
 0x241   : > { %v9603_v20 = vadd.f32 %v7463_v12, %v9524_v11  ;;  %v7466_v6 = vadd.f32 %v7465_v16, %v7464_v0  ;;  %v7509_v34 = vadd.f32 %v7508_v56, %v7507_v41  ;;  %v7510_v28 = vpop.f32.mrb[114].mxu0  ;;  %8189 = vmatprep.subr.bf16.mxu0 %v8531_v7  ;;  %v8533_v11 = vld [vmem:[#allocation8 + $0x68] sm:$0xff]   ;;  %v8544_v16 = vld [vmem:[#allocation8 + $0x38] sm:$0xff]  }
 0x242   : > { %v7511_v3 = vpop.f32.mrb[115].mxu0 }
 0x243   : > { %v9606_v62 = vadd.f32 %v7466_v6, %v9529_v48  ;;  %v7512_v63 = vadd.f32 %v7511_v3, %v7510_v28  ;;  %7850 = vmatpush3.bf16.msra.mxu1 %v8527_v38  ;;  %v9609_v4 = vadd.f32 %v7509_v34, %v9556_v54  ;;  %v8549_v6 = vld [vmem:[#allocation8 + $0x140] sm:$0xff]  }
 0x244   : > { %7851 = vmatprep.subr.bf16.mxu1 %v8529_v22  ;;  %8190 = vmatpush3.bf16.msra.mxu0 %v8531_v7  ;;  %v3751_v7 = vld [vmem:[#allocation3 + $0x91] sm:$0xff] }
 0x245   : > { %v7467_v17 = vpop.f32.mrb[112].mxu1  ;;  %4706 = vmatmul.mubr.bf16.gmra.mrb[188].mxu0 %v3761_v5  ;;  %v9613_v29 = vadd.f32 %v7512_v63, %v9559_v36  ;;  %8191 = vmatprep.subr.bf16.mxu0 %v8532_v55  ;;  %v8538_v5 = vld [vmem:[#allocation8 + $0x30] sm:$0xff]   ;;  %v3763_v12 = vpack.c.bf16 %v3752_v60, %v3751_v7 }
 0x246   : > { %v7468_v48 = vpop.f32.mrb[113].mxu1  ;;  %4795 = vmatmul.mubr.bf16.gmra.mrb[184].mxu1 %v9478_v26  ;;  %4713 = vmatprep.mubr.bf16.mxu0 %v9526_v59  ;;  %v8537_v59 = vld [vmem:[#allocation8 + $0xc0] sm:$0xff]  }
 0x247   : > { %v7469_v27 = vadd.f32 %v7468_v48, %v7467_v17  ;;  %v7470_v54 = vpop.f32.mrb[114].mxu1  ;;  %v7513_v49 = vpop.f32.mrb[116].mxu0  ;;  %4802 = vmatprep.mubr.bf16.mxu1 %v3762_v40  ;;  %7852 = vmatpush3.bf16.msra.mxu1 %v8530_v37  ;;  %v3753_v37 = vld [vmem:[#allocation3 + $0xa9] sm:$0xff] }
 0x248   : > { %v7471_v39 = vpop.f32.mrb[115].mxu1  ;;  %v7514_v13 = vpop.f32.mrb[117].mxu0  ;;  %7853 = vmatprep.subr.bf16.mxu1 %v8533_v11  ;;  %8192 = vmatpush3.bf16.msra.mxu0 %v8532_v55 }
 0x249   : > { %v9618_v36 = vadd.f32 %v7469_v27, %v9542_v61  ;;  %v7472_v25 = vadd.f32 %v7471_v39, %v7470_v54  ;;  %v7515_v2 = vadd.f32 %v7514_v13, %v7513_v49  ;;  %v7516_v26 = vpop.f32.mrb[118].mxu0  ;;  %8193 = vmatprep.subr.bf16.mxu0 %v8535_v33  ;;  %v8542_v61 = vld [vmem:[#allocation8 + $0x78] sm:$0xff]  }
 0x24a   : > { %v7517_v57 = vpop.f32.mrb[119].mxu0  ;;  %v3692_v13 = vld [vmem:[#allocation3 + $0xc2] sm:$0xff] }
 0x24b   : > { %v9621_v47 = vadd.f32 %v7472_v25, %v9547_v15  ;;  %v7518_v19 = vadd.f32 %v7517_v57, %v7516_v26  ;;  %v9624_v23 = vadd.f32 %v7515_v2, %v9574_v1  ;;  %7854 = vmatpush3.bf16.msra.mxu1 %v8534_v51  ;;  %v3755_v26 = vld [vmem:[#allocation3 + $0xc1] sm:$0xff] }
 0x24c   : > { %8194 = vmatpush3.bf16.msra.mxu0 %v8535_v33  ;;  %7855 = vmatprep.subr.bf16.mxu1 %v8536_v21  ;;  %v3756_v21 = vld [vmem:[#allocation3 + $0xc9] sm:$0xff] }
 0x24d   : > { %v7473_v58 = vpop.f32.mrb[116].mxu1  ;;  %4714 = vmatmul.mubr.bf16.gmra.mrb[192].mxu0 %v3666_v18  ;;  %v9627_v0 = vadd.f32 %v7518_v19, %v9577_v44  ;;  %7907 = vmatprep.subr.bf16.mxu0 %v8537_v59 }
 0x24e   : > { %v7474_v15 = vpop.f32.mrb[117].mxu1  ;;  %4803 = vmatmul.mubr.bf16.gmra.mrb[188].mxu1 %v9496_v53  ;;  %4721 = vmatprep.mubr.bf16.mxu0 %v9544_v8  ;;  %v3754_v53 = vld [vmem:[#allocation3 + $0xb1] sm:$0xff] }
 0x24f   : > { %v7475_v1 = vadd.f32 %v7474_v15, %v7473_v58  ;;  %v7476_v41 = vpop.f32.mrb[118].mxu1  ;;  %v7519_v38 = vpop.f32.mrb[120].mxu0  ;;  %4810 = vmatprep.mubr.bf16.mxu1 %v3763_v12  ;;  %7856 = vmatpush3.bf16.msra.mxu1 %v8538_v5  ;;  %v3764_v17 = vpack.c.bf16 %v3754_v53, %v3753_v37  ;;  %v3776_v15 = vld [vmem:[#allocation3 + $0x3a] sm:$0xff]  ;;  %v3778_v53 = vld [vmem:[#allocation3 + $0x52] sm:$0xff] }
 0x250   : > { %v7477_v56 = vpop.f32.mrb[119].mxu1  ;;  %v7520_v22 = vpop.f32.mrb[121].mxu0  ;;  %7857 = vmatprep.subr.bf16.mxu1 %v8542_v61 }
 0x251   : > { %v9632_v34 = vadd.f32 %v7475_v1, %v9562_v32  ;;  %v7478_v44 = vadd.f32 %v7477_v56, %v7476_v41  ;;  %v7521_v28 = vadd.f32 %v7520_v22, %v7519_v38  ;;  %v7522_v55 = vpop.f32.mrb[122].mxu0 }
 0x252   : > { %v7523_v3 = vpop.f32.mrb[123].mxu0 }
 0x253   : > { %v9635_v8 = vadd.f32 %v7478_v44, %v9568_v42  ;;  %v7524_v24 = vadd.f32 %v7523_v3, %v7522_v55  ;;  %v9638_v63 = vadd.f32 %v7521_v28, %v9589_v52  ;;  %7858 = vmatpush3.bf16.msra.mxu1 %v8544_v16  ;;  %v3777_v3 = vld [vmem:[#allocation3 + $0x4a] sm:$0xff] }
 0x254   : > { %7971 = vmatprep.subr.bf16.mxu1 %v8549_v6 }
 0x255   : > { %v7479_v11 = vpop.f32.mrb[120].mxu1  ;;  %4722 = vmatmul.mubr.bf16.gmra.mrb[196].mxu0 %v3763_v12  ;;  %v9641_v32 = vadd.f32 %v7524_v24, %v9592_v10  ;;  %v3693_v10 = vld [vmem:[#allocation3 + $0xca] sm:$0xff] }
 0x256   : > { %v7480_v40 = vpop.f32.mrb[121].mxu1  ;;  %4811 = vmatmul.mubr.bf16.gmra.mrb[192].mxu1 %v9514_v14  ;;  %4729 = vmatprep.mubr.bf16.mxu0 %v9565_v31  ;;  %v9654_v2 = vpack.c.bf16 %v3693_v10, %v3692_v13 }
 0x257   : > { %v7481_v42 = vadd.f32 %v7480_v40, %v7479_v11  ;;  %v7482_v33 = vpop.f32.mrb[122].mxu1  ;;  %v7525_v48 = vpop.f32.mrb[124].mxu0  ;;  %4818 = vmatprep.mubr.bf16.mxu1 %v3764_v17 }
 0x258   : > { %v7483_v52 = vpop.f32.mrb[123].mxu1  ;;  %v7526_v27 = vpop.f32.mrb[125].mxu0 }
 0x259   : > { %v9646_v54 = vadd.f32 %v7481_v42, %v9580_v46  ;;  %v7484_v49 = vadd.f32 %v7483_v52, %v7482_v33  ;;  %v7527_v51 = vadd.f32 %v7526_v27, %v7525_v48  ;;  %v7528_v39 = vpop.f32.mrb[126].mxu0  ;;  %v9656_v46 = vpack.c.bf16 %v3756_v21, %v3755_v26  ;;  %v3779_v42 = vld [vmem:[#allocation3 + $0x62] sm:$0xff]  ;;  %v3780_v33 = vld [vmem:[#allocation3 + $0x6a] sm:$0xff] }
 0x25a   : > { %v7529_v45 = vpop.f32.mrb[127].mxu0  ;;  %v3792_v27 = vpack.c.bf16 %v3778_v53, %v3777_v3  ;;  %v3793_v21 = vpack.c.bf16 %v3780_v33, %v3779_v42 }
 0x25b   : > { %v9649_v14 = vadd.f32 %v7484_v49, %v9583_v9  ;;  %v7530_v31 = vadd.f32 %v7529_v45, %v7528_v39  ;;  %v9652_v25 = vadd.f32 %v7527_v51, %v9603_v20  ;;  %v8539_v49 = vld [vmem:[#allocation8 + $0x80] sm:$0xff]  }
 0x25d   : > { %v7485_v59 = vpop.f32.mrb[124].mxu1  ;;  %4730 = vmatmul.mubr.bf16.gmra.mrb[200].mxu0 %v3764_v17  ;;  %v9659_v57 = vadd.f32 %v7530_v31, %v9606_v62  ;;  %v3775_v62 = vld [vmem:[#allocation3 + $0x32] sm:$0xff] }
 0x25e   : > { %v7486_v60 = vpop.f32.mrb[125].mxu1  ;;  %4819 = vmatmul.mubr.bf16.gmra.mrb[196].mxu1 %v9532_v35  ;;  %4737 = vmatprep.mubr.bf16.mxu0 %v9654_v2  ;;  %v3791_v16 = vpack.c.bf16 %v3776_v15, %v3775_v62  ;;  %v3782_v62 = vld [vmem:[#allocation3 + $0x82] sm:$0xff] }
 0x25f   : > { %v7487_v9 = vadd.f32 %v7486_v60, %v7485_v59  ;;  %v7488_v19 = vpop.f32.mrb[126].mxu1  ;;  %v7531_v18 = vpop.f32.mrb[128].mxu0  ;;  %4826 = vmatprep.mubr.bf16.mxu1 %v9656_v46  ;;  %v8543_v15 = vld [vmem:[#allocation8 + $0xd0] sm:$0xff]  }
 0x260   : > { %v7489_v20 = vpop.f32.mrb[127].mxu1  ;;  %v7532_v5 = vpop.f32.mrb[129].mxu0 }
 0x261   : > { %v9665_v7 = vadd.f32 %v7487_v9, %v9595_v50  ;;  %v7490_v61 = vadd.f32 %v7489_v20, %v7488_v19  ;;  %v7533_v58 = vadd.f32 %v7532_v5, %v7531_v18  ;;  %v7534_v12 = vpop.f32.mrb[130].mxu0  ;;  %v9676_v50 = vld [vmem:[%s10228_s2] ss:$0 sm:$0xff] }
 0x262   : > { %v7535_v1 = vpop.f32.mrb[131].mxu0 }
 0x263   : > { %v9668_v35 = vadd.f32 %v7490_v61, %v9598_v43  ;;  %v7536_v41 = vadd.f32 %v7535_v1, %v7534_v12  ;;  %v9671_v38 = vadd.f32 %v7533_v58, %v9618_v36  ;;  %v9687_v36 = vld [vmem:[%s10229_s3] ss:$0 sm:$0xff]  ;;  %v3781_v12 = vld [vmem:[#allocation3 + $0x7a] sm:$0xff] }
 0x265   : > { %v8165_v56 = vpop.f32.mrb[128].mxu1  ;;  %4738 = vmatmul.mubr.bf16.gmra.mrb[204].mxu0 %v9656_v46  ;;  %v9680_v22 = vadd.f32 %v7536_v41, %v9621_v47 }
 0x266   : > { %v3385_v6 = vadd.f32 %v8165_v56, %v9624_v23  ;;  %v3376_v43 = vpop.f32.mrb[129].mxu1  ;;  %4827 = vmatmul.mubr.bf16.gmra.mrb[200].mxu1 %v9550_v30  ;;  %8195 = vmatprep.mubr.bf16.mxu0 %v3791_v16 }
 0x267   : > { %v3377_v44 = vadd.f32 %v3376_v43, %v9609_v4  ;;  %v8166_v28 = vpop.f32.mrb[130].mxu1  ;;  %v7537_v55 = vpop.f32.mrb[132].mxu0 }
 0x268   : > { %v3448_v47 = vmul.f32 %v9676_v50, %v3385_v6  ;;  %v3388_v24 = vadd.f32 %v8166_v28, %v9627_v0  ;;  %v3379_v23 = vpop.f32.mrb[131].mxu1  ;;  %v7538_v37 = vpop.f32.mrb[133].mxu0  ;;  %v3783_v28 = vld [vmem:[#allocation3 + $0x92] sm:$0xff] }
 0x269   : > { %v3446_v30 = vmul.f32 %v9676_v50, %v3377_v44  ;;  %v3380_v11 = vadd.f32 %v3379_v23, %v9613_v29  ;;  %v7539_v17 = vadd.f32 %v7538_v37, %v7537_v55  ;;  %v7540_v40 = vpop.f32.mrb[134].mxu0  ;;  %v8540_v29 = vld [vmem:[#allocation8 + $0xc8] sm:$0xff]  }
 0x26a   : > { %v3471_v4 = vadd.f32 %v9687_v36, %v3448_v47  ;;  %v3449_v48 = vmul.f32 %v9676_v50, %v3388_v24  ;;  %v7541_v52 = vpop.f32.mrb[135].mxu0  ;;  %v3784_v55 = vld [vmem:[#allocation3 + $0x9a] sm:$0xff]  ;;  %v3794_v47 = vpack.c.bf16 %v3782_v62, %v3781_v12 }
 0x26b   : > { %v3469_v51 = vadd.f32 %v9687_v36, %v3446_v30  ;;  %v3447_v0 = vmul.f32 %v9676_v50, %v3380_v11  ;;  %v7542_v39 = vadd.f32 %v7541_v52, %v7540_v40  ;;  %v9699_v13 = vadd.f32 %v7539_v17, %v9632_v34  ;;  %v8541_v34 = vld [vmem:[#allocation8 + $0x88] sm:$0xff]   ;;  %v8545_v24 = vld [vmem:[#allocation8 + $0x90] sm:$0xff]  }
 0x26c   : > { %v3487_v10 = vmax.f32 %v3471_v4, 0.0  ;;  %v3472_v45 = vadd.f32 %v9687_v36, %v3449_v48  ;;  %v3795_v40 = vpack.c.bf16 %v3784_v55, %v3783_v28 }
 0x26d   : > { %v3485_v31 = vmax.f32 %v3469_v51, 0.0  ;;  %v3470_v26 = vadd.f32 %v9687_v36, %v3447_v0  ;;  %v8169_v59 = vpop.f32.mrb[132].mxu1  ;;  %8196 = vmatmul.mubr.bf16.vlgmr.msra.gmra.mrb[208].mxu0 %v3792_v27  ;;  %v9704_v60 = vadd.f32 %v7542_v39, %v9635_v8  ;;  %v8547_v0 = vld [vmem:[#allocation8 + $0x98] sm:$0xff]  }
 0x26e   : > { %3504 = vst [vmem:[#allocation3 + $0xf1] sm:$0xff] %v3487_v10  ;;  %v3488_v9 = vmax.f32 %v3472_v45, 0.0  ;;  %v3401_v19 = vadd.f32 %v8169_v59, %v9652_v25  ;;  %v3392_v18 = vpop.f32.mrb[133].mxu1  ;;  %8199 = vmatprep.mubr.bf16.mxu0 %v3793_v21  ;;  %7908 = vmatpush3.bf16.msra.mxu0 %v8539_v49  ;;  %v3785_v45 = vld [vmem:[#allocation3 + $0xaa] sm:$0xff]  ;;  %v3786_v21 = vld [vmem:[#allocation3 + $0xb2] sm:$0xff] }
 0x26f   : > { %3502 = vst [vmem:[#allocation3 + $0xd9] sm:$0xff] %v3485_v31  ;;  %v3486_v20 = vmax.f32 %v3470_v26, 0.0  ;;  %v3393_v5 = vadd.f32 %v3392_v18, %v9638_v63  ;;  %v8170_v61 = vpop.f32.mrb[134].mxu1  ;;  %v7543_v58 = vpop.f32.mrb[136].mxu0  ;;  %7909 = vmatprep.subr.bf16.mxu0 %v8540_v29  ;;  %v3796_v62 = vpack.c.bf16 %v3786_v21, %v3785_v45 }
 0x270   : > { %3505 = vst [vmem:[#allocation3 + $0xf9] sm:$0xff] %v3488_v9  ;;  %v3452_v8 = vmul.f32 %v9676_v50, %v3401_v19  ;;  %v3404_v1 = vadd.f32 %v8170_v61, %v9659_v57  ;;  %v3395_v25 = vpop.f32.mrb[135].mxu1  ;;  %v7544_v41 = vpop.f32.mrb[137].mxu0  ;;  %v9710_v16 = vpack.c.bf16 %v3488_v9, %v3487_v10  ;;  %v8548_v19 = vld [vmem:[#allocation8 + $0xe0] sm:$0xff]  }
 0x271   : > { %3503 = vst [vmem:[#allocation3 + $0xe1] sm:$0xff] %v3486_v20  ;;  %v3450_v56 = vmul.f32 %v9676_v50, %v3393_v5  ;;  %v3396_v63 = vadd.f32 %v3395_v25, %v9641_v32  ;;  %v7545_v6 = vadd.f32 %v7544_v41, %v7543_v58  ;;  %v7546_v43 = vpop.f32.mrb[138].mxu0  ;;  %v9714_v44 = vpack.c.bf16 %v3486_v20, %v3485_v31  ;;  %v8546_v32 = vld [vmem:[#allocation8 + $0xd8] sm:$0xff]  }
 0x272   : > { %v3475_v3 = vadd.f32 %v9687_v36, %v3452_v8  ;;  %v3453_v53 = vmul.f32 %v9676_v50, %v3404_v1  ;;  %v7547_v57 = vpop.f32.mrb[139].mxu0  ;;  %7910 = vmatpush3.bf16.msra.mxu0 %v8541_v34 }
 0x273   : > { %v3473_v23 = vadd.f32 %v9687_v36, %v3450_v56  ;;  %v3451_v37 = vmul.f32 %v9676_v50, %v3396_v63  ;;  %v7548_v30 = vadd.f32 %v7547_v57, %v7546_v43  ;;  %4834 = vmatprep.mubr.bf16.mxu1 %v9714_v44  ;;  %7911 = vmatprep.subr.bf16.mxu0 %v8543_v15  ;;  %v8550_v15 = vld [vmem:[#allocation8 + $0xa0] sm:$0xff]   ;;  %v8552_v56 = vld [vmem:[#allocation8 + $0xe8] sm:$0xff]  }
 0x274   : > { %v3491_v11 = vmax.f32 %v3475_v3, 0.0  ;;  %v3476_v17 = vadd.f32 %v9687_v36, %v3453_v53  ;;  %v9723_v42 = vadd.f32 %v7545_v6, %v9646_v54 }
 0x275   : > { %v3489_v33 = vmax.f32 %v3473_v23, 0.0  ;;  %v3474_v4 = vadd.f32 %v9687_v36, %v3451_v37  ;;  %v8173_v48 = vpop.f32.mrb[136].mxu1  ;;  %8200 = vmatmul.mubr.bf16.gmra.mrb[212].mxu0 %v3794_v47  ;;  %v9727_v52 = vadd.f32 %v7548_v30, %v9649_v14 }
 0x276   : > { %3508 = vst [vmem:[#allocation3 + $0x121] sm:$0xff] %v3491_v11  ;;  %v3492_v27 = vmax.f32 %v3476_v17, 0.0  ;;  %v3417_v49 = vadd.f32 %v8173_v48, %v9699_v13  ;;  %v3408_v51 = vpop.f32.mrb[137].mxu1  ;;  %8203 = vmatprep.mubr.bf16.mxu0 %v3795_v40  ;;  %7912 = vmatpush3.bf16.msra.mxu0 %v8545_v24  ;;  %v3725_v26 = vld [vmem:[#allocation3 + $0xd8] sm:$0xff]  ;;  %v8551_v48 = vld [vmem:[#allocation8 + $0x100] sm:$0xff]  }
 0x277   : > { %3506 = vst [vmem:[#allocation3 + $0x109] sm:$0xff] %v3489_v33  ;;  %v9730_v39 = vmax.f32 %v3474_v4, 0.0  ;;  %v3409_v54 = vadd.f32 %v3408_v51, %v9671_v38  ;;  %v8174_v29 = vpop.f32.mrb[138].mxu1  ;;  %v7549_v10 = vpop.f32.mrb[140].mxu0  ;;  %7913 = vmatprep.subr.bf16.mxu0 %v8546_v32  ;;  %v8553_v24 = vld [vmem:[#allocation8 + $0xa8] sm:$0xff]   ;;  %v5019_v4 = vld [vmem:[#allocation3 + $0xc0] sm:$0xff] }
 0x278   : > { %3509 = vst [vmem:[#allocation3 + $0x129] sm:$0xff] %v3492_v27  ;;  %v3456_v14 = vmul.f32 %v9676_v50, %v3417_v49  ;;  %v3420_v31 = vadd.f32 %v8174_v29, %v9704_v60  ;;  %v3411_v13 = vpop.f32.mrb[139].mxu1  ;;  %v3726_v59 = vld [vmem:[#allocation3 + $0xe0] sm:$0xff]  ;;  %v7550_v9 = vpop.f32.mrb[141].mxu0  ;;  %v9735_v18 = vpack.c.bf16 %v3492_v27, %v3491_v11 }
 0x279   : > { %3507 = vst [vmem:[#allocation3 + $0x111] sm:$0xff] %v9730_v39  ;;  %v3454_v38 = vmul.f32 %v9676_v50, %v3409_v54  ;;  %v3412_v34 = vadd.f32 %v3411_v13, %v9680_v22  ;;  %v9740_v20 = vpack.c.bf16 %v3726_v59, %v3725_v26  ;;  %v7551_v5 = vadd.f32 %v7550_v9, %v7549_v10  ;;  %v7552_v61 = vpop.f32.mrb[142].mxu0  ;;  %v3789_v30 = vld [vmem:[#allocation3 + $0xda] sm:$0xff]  ;;  %v3790_v32 = vld [vmem:[#allocation3 + $0xe2] sm:$0xff] }
 0x27a   : > { %v3479_v58 = vadd.f32 %v9687_v36, %v3456_v14  ;;  %v3457_v60 = vmul.f32 %v9676_v50, %v3420_v31  ;;  %v7553_v12 = vpop.f32.mrb[143].mxu0  ;;  %7914 = vmatpush3.bf16.msra.mxu0 %v8547_v0  ;;  %v9745_v8 = vpack.c.bf16 %v9730_v39, %v3489_v33  ;;  %v8555_v54 = vld [vmem:[#allocation8 + $0x148] sm:$0xff]   ;;  %v9770_v14 = vpack.c.bf16 %v3790_v32, %v3789_v30  ;;  %v8556_v31 = vld [vmem:[#allocation8 + $0xb0] sm:$0xff]   ;;  %v8580_v30 = vld [vmem:[#allocation8 + $0x1e0] sm:$0xff]  }
 0x27b   : > { %v3477_v1 = vadd.f32 %v9687_v36, %v3454_v38  ;;  %v3455_v25 = vmul.f32 %v9676_v50, %v3412_v34  ;;  %4835 = vmatmul.mubr.bf16.gmra.mrb[204].mxu1 %v9740_v20  ;;  %v3336_v22 = vadd.f32 %v7551_v5, %v9665_v7  ;;  %v7554_v41 = vadd.f32 %v7553_v12, %v7552_v61  ;;  %v5020_v7 = vld [vmem:[#allocation3 + $0xc8] sm:$0xff]  ;;  %v8557_v34 = vld [vmem:[#allocation8 + $0x108] sm:$0xff]  }
 0x27c   : > { %v3495_v63 = vmax.f32 %v3479_v58, 0.0  ;;  %v3480_v6 = vadd.f32 %v9687_v36, %v3457_v60  ;;  %5988 = vmatprep.mubr.bf16.mxu1 %v9656_v46  ;;  %7915 = vmatprep.subr.bf16.mxu0 %v8548_v19  ;;  %v5035_v0 = vpack.c.bf16 %v5020_v7, %v5019_v4  ;;  %v8559_v12 = vld [vmem:[#allocation8 + $0xb8] sm:$0xff]   ;;  %v5087_v32 = vld [vmem:[#allocation3 + $0xf2] sm:$0xff] }
 0x27d   : > { %v3493_v43 = vmax.f32 %v3477_v1, 0.0  ;;  %v3478_v28 = vadd.f32 %v9687_v36, %v3455_v25  ;;  %v8177_v55 = vpop.f32.mrb[140].mxu1  ;;  %v3339_v3 = vadd.f32 %v7554_v41, %v9668_v35  ;;  %8204 = vmatmul.mubr.bf16.gmra.mrb[216].mxu0 %v3796_v62  ;;  %v8554_v35 = vld [vmem:[#allocation8 + $0xf0] sm:$0xff]   ;;  %v8562_v25 = vld [vmem:[#allocation8 + $0x158] sm:$0xff]   ;;  %v8565_v41 = vld [vmem:[#allocation8 + $0x180] sm:$0xff]  }
 0x27e   : > { %3512 = vst [vmem:[#allocation3 + $0x151] sm:$0xff] %v3495_v63  ;;  %v3496_v53 = vmax.f32 %v3480_v6, 0.0  ;;  %v3433_v57 = vadd.f32 %v8177_v55, %v3336_v22  ;;  %v3424_v47 = vpop.f32.mrb[141].mxu1  ;;  %8207 = vmatprep.mubr.bf16.mxu0 %v9654_v2  ;;  %7916 = vmatpush3.bf16.msra.mxu0 %v8550_v15  ;;  %v8564_v15 = vld [vmem:[#allocation8 + $0x1c0] sm:$0xff]   ;;  %v8561_v1 = vld [vmem:[#allocation8 + $0x110] sm:$0xff]   ;;  %v8569_v55 = vld [vmem:[#allocation8 + $0x188] sm:$0xff]  }
 0x27f   : > { %3510 = vst [vmem:[#allocation3 + $0x139] sm:$0xff] %v3493_v43  ;;  %v9756_v23 = vmax.f32 %v3478_v28, 0.0  ;;  %v3425_v46 = vadd.f32 %v3424_v47, %v9723_v42  ;;  %v8178_v37 = vpop.f32.mrb[142].mxu1  ;;  %7917 = vmatprep.subr.bf16.mxu0 %v8552_v56  ;;  %v7587_v11 = vpop.f32.mrb[144].mxu0  ;;  %v5023_v56 = vld [vmem:[#allocation3 + $0xf0] sm:$0xff]  ;;  %v5025_v47 = vld [vmem:[#allocation3 + $0x108] sm:$0xff] }
 0x280   : > { %3513 = vst [vmem:[#allocation3 + $0x159] sm:$0xff] %v3496_v53  ;;  %v3460_v17 = vmul.f32 %v9676_v50, %v3433_v57  ;;  %v3436_v40 = vadd.f32 %v8178_v37, %v3339_v3  ;;  %v3427_v33 = vpop.f32.mrb[143].mxu1  ;;  %v9760_v27 = vpack.c.bf16 %v3496_v53, %v3495_v63  ;;  %v7588_v49 = vpop.f32.mrb[145].mxu0  ;;  %v8568_v63 = vld [vmem:[#allocation8 + $0x1c8] sm:$0xff]   ;;  %v8566_v28 = vld [vmem:[#allocation8 + $0x160] sm:$0xff]   ;;  %v8572_v3 = vld [vmem:[#allocation8 + $0x1d0] sm:$0xff]  }
 0x281   : > { %3511 = vst [vmem:[#allocation3 + $0x141] sm:$0xff] %v9756_v23  ;;  %v3458_v42 = vmul.f32 %v9676_v50, %v3425_v46  ;;  %v3428_v51 = vadd.f32 %v3427_v33, %v9727_v52  ;;  %v9766_v29 = vpack.c.bf16 %v9756_v23, %v3493_v43  ;;  %v7590_v10 = vpop.f32.mrb[146].mxu0  ;;  %v8558_v52 = vld [vmem:[#allocation8 + $0xf8] sm:$0xff]   ;;  %v9774_v9 = vadd.f32 %v7588_v49, %v7587_v11  ;;  %v5026_v53 = vld [vmem:[#allocation3 + $0x110] sm:$0xff]  ;;  %v8570_v57 = vld [vmem:[#allocation8 + $0x168] sm:$0xff]  }
 0x282   : > { %v3483_v45 = vadd.f32 %v9687_v36, %v3460_v17  ;;  %v3461_v21 = vmul.f32 %v9676_v50, %v3436_v40  ;;  %7918 = vmatpush3.bf16.msra.mxu0 %v8553_v24  ;;  %v7591_v13 = vpop.f32.mrb[147].mxu0  ;;  %v8563_v43 = vld [vmem:[#allocation8 + $0x118] sm:$0xff]   ;;  %v9797_v7 = vpack.c.bf16 %v5026_v53, %v5025_v47  ;;  %v8571_v24 = vld [vmem:[#allocation8 + $0x128] sm:$0xff]   ;;  %v8574_v46 = vld [vmem:[#allocation8 + $0x170] sm:$0xff]  }
 0x283   : > { %v3481_v26 = vadd.f32 %v9687_v36, %v3458_v42  ;;  %v3459_v59 = vmul.f32 %v9676_v50, %v3428_v51  ;;  %5989 = vmatmul.mubr.bf16.vlgmr.msra.gmra.mrb[208].mxu1 %v5035_v0  ;;  %7919 = vmatprep.subr.bf16.mxu0 %v8554_v35  ;;  %v9778_v5 = vadd.f32 %v7591_v13, %v7590_v10  ;;  %v8560_v50 = vld [vmem:[#allocation8 + $0x150] sm:$0xff]   ;;  %v8577_v37 = vld [vmem:[#allocation8 + $0x198] sm:$0xff]   ;;  %v8581_v40 = vld [vmem:[#allocation8 + $0x1a0] sm:$0xff]  }
 0x284   : > { %v3499_v19 = vmax.f32 %v3483_v45, 0.0  ;;  %v3484_v38 = vadd.f32 %v9687_v36, %v3461_v21  ;;  %5996 = vmatprep.mubr.bf16.mxu1 %v9714_v44  ;;  %7972 = vmatpush3.bf16.msra.mxu1 %v8551_v48  ;;  %v5088_v35 = vld [vmem:[#allocation3 + $0xfa] sm:$0xff]  ;;  %v5028_v17 = vld [vmem:[#allocation3 + $0x128] sm:$0xff]  ;;  %v9808_v51 = vld [vmem:[#allocation8 + $0x200] sm:$0xff]  }
 0x285   : > { %v3497_v61 = vmax.f32 %v3481_v26, 0.0  ;;  %v3482_v58 = vadd.f32 %v9687_v36, %v3459_v59  ;;  %8208 = vmatmul.mubr.bf16.gmra.mrb[220].mxu0 %v9770_v14  ;;  %7973 = vmatprep.subr.bf16.mxu1 %v8555_v54  ;;  %v5024_v36 = vld [vmem:[#allocation3 + $0xf8] sm:$0xff]  ;;  %v8575_v11 = vld [vmem:[#allocation8 + $0x130] sm:$0xff]   ;;  %v9802_v4 = vpack.c.bf16 %v5088_v35, %v5087_v32  ;;  %v8579_v42 = vld [vmem:[#allocation8 + $0x138] sm:$0xff]  }
 0x286   : > { %3516 = vst [vmem:[#allocation3 + $0x181] sm:$0xff] %v3499_v19  ;;  %v3500_v60 = vmax.f32 %v3484_v38, 0.0  ;;  %7920 = vmatpush3.bf16.msra.mxu0 %v8556_v31  ;;  %6085 = vmatprep.mubr.bf16.mxu0 %v9740_v20  ;;  %v9791_v6 = vpack.c.bf16 %v5024_v36, %v5023_v56  ;;  %v5027_v33 = vld [vmem:[#allocation3 + $0x120] sm:$0xff]  ;;  %v8583_v48 = vld [vmem:[#allocation8 + $0x1e8] sm:$0xff]   ;;  %v5089_v10 = vld [vmem:[#allocation3 + $0x10a] sm:$0xff] }
 0x287   : > { %3514 = vst [vmem:[#allocation3 + $0x169] sm:$0xff] %v3497_v61  ;;  %v9783_v62 = vmax.f32 %v3482_v58, 0.0  ;;  %7921 = vmatprep.subr.bf16.mxu0 %v8558_v52  ;;  %v9805_v49 = vpack.c.bf16 %v5028_v17, %v5027_v33  ;;  %v8584_v0 = vld [vmem:[#allocation8 + $0x1a8] sm:$0xff]   ;;  %v8585_v54 = vld [vmem:[#allocation8 + $0x1f0] sm:$0xff]   ;;  %v8588_v26 = vld [vmem:[#allocation8 + $0x1f8] sm:$0xff]  }
 0x288   : > { %3517 = vst [vmem:[#allocation3 + $0x189] sm:$0xff] %v3500_v60  ;;  %7974 = vmatpush3.bf16.msra.mxu1 %v8557_v34  ;;  %v5090_v45 = vld [vmem:[#allocation3 + $0x112] sm:$0xff]  ;;  %v5030_v21 = vld [vmem:[#allocation3 + $0x140] sm:$0xff]  ;;  %v8589_v52 = vld [vmem:[#allocation8 + $0x1b8] sm:$0xff]  }
 0x289   : > { %3515 = vst [vmem:[#allocation3 + $0x171] sm:$0xff] %v9783_v62  ;;  %7975 = vmatprep.subr.bf16.mxu1 %v8560_v50  ;;  %v9787_v22 = vpack.c.bf16 %v9783_v62, %v3497_v61  ;;  %v5029_v31 = vld [vmem:[#allocation3 + $0x138] sm:$0xff]  ;;  %v9813_v13 = vpack.c.bf16 %v5090_v45, %v5089_v10  ;;  %v5091_v19 = vld [vmem:[#allocation3 + $0x122] sm:$0xff]  ;;  %v5092_v38 = vld [vmem:[#allocation3 + $0x12a] sm:$0xff] }
 0x28a   : > { %7922 = vmatpush3.bf16.msra.mxu0 %v8559_v12  ;;  %v9816_v59 = vpack.c.bf16 %v5030_v21, %v5029_v31  ;;  %v5032_v34 = vld [vmem:[#allocation3 + $0x158] sm:$0xff]  ;;  %v5031_v61 = vld [vmem:[#allocation3 + $0x150] sm:$0xff]  ;;  %v9821_v58 = vpack.c.bf16 %v5092_v38, %v5091_v19  ;;  %v5094_v60 = vld [vmem:[#allocation3 + $0x142] sm:$0xff] }
 0x28b   : > { %5997 = vmatmul.mubr.bf16.gmra.mrb[212].mxu1 %v9740_v20  ;;  %8035 = vmatprep.subr.bf16.mxu0 %v8564_v15  ;;  %v8567_v20 = vld [vmem:[#allocation8 + $0x120] sm:$0xff]   ;;  %v5093_v50 = vld [vmem:[#allocation3 + $0x13a] sm:$0xff] }
 0x28c   : > { %6004 = vmatprep.mubr.bf16.mxu1 %v9710_v16  ;;  %7976 = vmatpush3.bf16.msra.mxu1 %v8561_v1  ;;  %v8573_v16 = vld [vmem:[#allocation8 + $0x190] sm:$0xff]   ;;  %v9829_v1 = vpack.c.bf16 %v5094_v60, %v5093_v50  ;;  %v5149_v53 = vld [vmem:[#allocation3 + $0xf1] sm:$0xff]  ;;  %v5151_v17 = vld [vmem:[#allocation3 + $0x109] sm:$0xff] }
 0x28d   : > { %6086 = vmatmul.mubr.bf16.vlgmr.msra.gmra.mrb[224].mxu0 %v9654_v2  ;;  %7977 = vmatprep.subr.bf16.mxu1 %v8562_v25  ;;  %v8576_v2 = vld [vmem:[#allocation8 + $0x1d8] sm:$0xff]   ;;  %v5096_v25 = vld [vmem:[#allocation3 + $0x15a] sm:$0xff]  ;;  %v5165_v10 = vpack.c.bf16 %v9730_v39, %v5151_v17 }
 0x28e   : > { %6093 = vmatprep.mubr.bf16.mxu0 %v9791_v6  ;;  %8036 = vmatpush3.bf16.msra.mxu0 %v8565_v41  ;;  %v5033_v15 = vld [vmem:[#allocation3 + $0x168] sm:$0xff]  ;;  %v8593_v31 = vld [vmem:[#allocation8 + $0x228] sm:$0xff]  }
 0x28f   : > { %8037 = vmatprep.subr.bf16.mxu0 %v8568_v63  ;;  %v5130_v41 = vld [vmem:[#allocation3 + $0x188] sm:$0xff]  ;;  %v5129_v63 = vld [vmem:[#allocation3 + $0x180] sm:$0xff] }
 0x290   : > { %7978 = vmatpush3.bf16.msra.mxu1 %v8563_v43  ;;  %v5034_v12 = vld [vmem:[#allocation3 + $0x170] sm:$0xff]  ;;  %v9840_v43 = vpack.c.bf16 %v5130_v41, %v5129_v63  ;;  %v5251_v63 = vld [vmem:[#allocation3 + $0x141] sm:$0xff] }
 0x291   : > { %7979 = vmatprep.subr.bf16.mxu1 %v8566_v28  ;;  %v9832_v36 = vpack.c.bf16 %v5034_v12, %v5033_v15  ;;  %v5098_v28 = vld [vmem:[#allocation3 + $0x172] sm:$0xff]  ;;  %v8594_v12 = vld [vmem:[#allocation8 + $0x230] sm:$0xff]  }
 0x292   : > { %8038 = vmatpush3.bf16.msra.mxu0 %v8569_v55  ;;  %v5150_v55 = vld [vmem:[#allocation3 + $0xf9] sm:$0xff] }
 0x293   : > { %6005 = vmatmul.mubr.bf16.gmra.mrb[216].mxu1 %v9791_v6  ;;  %8039 = vmatprep.subr.bf16.mxu0 %v8572_v3  ;;  %v8586_v3 = vld [vmem:[#allocation8 + $0x208] sm:$0xff]  }
 0x294   : > { %6012 = vmatprep.mubr.bf16.mxu1 %v9745_v8  ;;  %7980 = vmatpush3.bf16.msra.mxu1 %v8567_v20  ;;  %v8578_v8 = vld [vmem:[#allocation8 + $0x178] sm:$0xff]  }
 0x295   : > { %6094 = vmatmul.mubr.bf16.gmra.mrb[228].mxu0 %v9770_v14  ;;  %7981 = vmatprep.subr.bf16.mxu1 %v8570_v57  ;;  %v8590_v57 = vld [vmem:[#allocation8 + $0x210] sm:$0xff]  }
 0x296   : > { %6101 = vmatprep.mubr.bf16.mxu0 %v9797_v7  ;;  %8040 = vmatpush3.bf16.msra.mxu0 %v8573_v16 }
 0x297   : > { %8041 = vmatprep.subr.bf16.mxu0 %v8576_v2 }
 0x298   : > { %7982 = vmatpush3.bf16.msra.mxu1 %v8571_v24  ;;  %v5247_v24 = vld [vmem:[#allocation3 + $0x111] sm:$0xff] }
 0x299   : > { %7983 = vmatprep.subr.bf16.mxu1 %v8574_v46  ;;  %v5261_v33 = vpack.c.bf16 %v5247_v24, %v5151_v17 }
 0x29a   : > { %8042 = vmatpush3.bf16.msra.mxu0 %v8577_v37 }
 0x29b   : > { %6013 = vmatmul.mubr.bf16.gmra.mrb[220].mxu1 %v9797_v7  ;;  %8043 = vmatprep.subr.bf16.mxu0 %v8580_v30 }
 0x29c   : > { %6020 = vmatprep.mubr.bf16.mxu1 %v9735_v18  ;;  %7984 = vmatpush3.bf16.msra.mxu1 %v8575_v11  ;;  %v8587_v18 = vld [vmem:[#allocation8 + $0x1b0] sm:$0xff]  }
 0x29d   : > { %6102 = vmatmul.mubr.bf16.gmra.mrb[232].mxu0 %v9802_v4  ;;  %7985 = vmatprep.subr.bf16.mxu1 %v8578_v8 }
 0x29e   : > { %6109 = vmatprep.mubr.bf16.mxu0 %v9805_v49  ;;  %8044 = vmatpush3.bf16.msra.mxu0 %v8581_v40 }
 0x29f   : > { %8045 = vmatprep.subr.bf16.mxu0 %v8583_v48 }
 0x2a0   : > { %7986 = vmatpush3.bf16.msra.mxu1 %v8579_v42 }
 0x2a1   : > { %8211 = vmatprep.subr.bf16.mxu1 %v9808_v51 }
 0x2a2   : > { %8046 = vmatpush3.bf16.msra.mxu0 %v8584_v0 }
 0x2a3   : > { %6021 = vmatmul.mubr.bf16.gmra.mrb[224].mxu1 %v9805_v49  ;;  %8047 = vmatprep.subr.bf16.mxu0 %v8585_v54 }
 0x2a4   : > { %6028 = vmatprep.mubr.bf16.mxu1 %v9766_v29  ;;  %v9824_v29 = vpack.c.bf16 %v5032_v34, %v5031_v61  ;;  %v5153_v34 = vld [vmem:[#allocation3 + $0x121] sm:$0xff] }
 0x2a5   : > { %6110 = vmatmul.mubr.bf16.gmra.mrb[236].mxu0 %v9813_v13 }
 0x2a6   : > { %6117 = vmatprep.mubr.bf16.mxu0 %v9816_v59  ;;  %8048 = vmatpush3.bf16.msra.mxu0 %v8587_v18  ;;  %v5154_v18 = vld [vmem:[#allocation3 + $0x129] sm:$0xff] }
 0x2a7   : > { %8049 = vmatprep.subr.bf16.mxu0 %v8588_v26  ;;  %v5166_v50 = vpack.c.bf16 %v5154_v18, %v5153_v34 }
 0x2aa   : > { %8050 = vmatpush3.bf16.msra.mxu0 %v8589_v52 }
 0x2ab   : > { %6029 = vmatmul.mubr.bf16.gmra.mrb[228].mxu1 %v9816_v59 }
 0x2ac   : > { %6036 = vmatprep.mubr.bf16.mxu1 %v9760_v27  ;;  %v5095_v27 = vld [vmem:[#allocation3 + $0x152] sm:$0xff] }
 0x2ad   : > { %6118 = vmatmul.mubr.bf16.gmra.mrb[240].mxu0 %v9821_v58  ;;  %v9837_v56 = vpack.c.bf16 %v5096_v25, %v5095_v27 }
 0x2ae   : > { %6125 = vmatprep.mubr.bf16.mxu0 %v9824_v29 }
 0x2b3   : > { %6037 = vmatmul.mubr.bf16.gmra.mrb[232].mxu1 %v9824_v29 }
 0x2b4   : > { %6044 = vmatprep.mubr.bf16.mxu1 %v9787_v22  ;;  %v5097_v22 = vld [vmem:[#allocation3 + $0x16a] sm:$0xff] }
 0x2b5   : > { %6126 = vmatmul.mubr.bf16.gmra.mrb[244].mxu0 %v9829_v1  ;;  %v9845_v20 = vpack.c.bf16 %v5098_v28, %v5097_v22  ;;  %v8595_v22 = vld [vmem:[#allocation8 + $0x238] sm:$0xff]  }
 0x2b6   : > { %6133 = vmatprep.mubr.bf16.mxu0 %v9832_v36 }
 0x2bb   : > { %6045 = vmatmul.mubr.bf16.gmra.mrb[236].mxu1 %v9832_v36 }
 0x2bc   : > { %6182 = vmatprep.mubr.bf16.mxu1 %v9770_v14  ;;  %v5164_v14 = vpack.c.bf16 %v5150_v55, %v5149_v53 }
 0x2bd   : > { %6134 = vmatmul.mubr.bf16.gmra.mrb[248].mxu0 %v9837_v56 }
 0x2be   : > { %6141 = vmatprep.mubr.bf16.mxu0 %v9840_v43 }
 0x2c3   : > { %6183 = vmatmul.mubr.bf16.vlgmr.msra.gmra.mrb[240].mxu1 %v9714_v44  ;;  %v8591_v44 = vld [vmem:[#allocation8 + $0x218] sm:$0xff]  }
 0x2c4   : > { %6190 = vmatprep.mubr.bf16.mxu1 %v9802_v4  ;;  %8212 = vmatpush3.bf16.msra.mxu1 %v9808_v51  ;;  %v8592_v51 = vld [vmem:[#allocation8 + $0x220] sm:$0xff]  }
 0x2c5   : > { %6142 = vmatmul.mubr.bf16.gmra.mrb[252].mxu0 %v9845_v20  ;;  %8213 = vmatprep.subr.bf16.mxu1 %v8586_v3 }
 0x2c6   : > { %6279 = vmatprep.mubr.bf16.mxu0 %v5164_v14 }
 0x2c8   : > { %8214 = vmatpush3.bf16.msra.mxu1 %v8586_v3  ;;  %v7593_v16 = vpop.f32.mrb[148].mxu0 }
 0x2c9   : > { %v7594_v47 = vpop.f32.mrb[149].mxu0  ;;  %v7651_v2 = vpop.f32.mrb[144].mxu1  ;;  %8215 = vmatprep.subr.bf16.mxu1 %v8590_v57 }
 0x2ca   : > { %v7595_v46 = vadd.f32 %v7594_v47, %v7593_v16  ;;  %v7596_v37 = vpop.f32.mrb[150].mxu0  ;;  %v7652_v30 = vpop.f32.mrb[145].mxu1 }
 0x2cb   : > { %6191 = vmatmul.mubr.bf16.gmra.mrb[244].mxu1 %v5164_v14  ;;  %v7597_v32 = vpop.f32.mrb[151].mxu0  ;;  %v7653_v35 = vadd.f32 %v7652_v30, %v7651_v2  ;;  %v7654_v11 = vpop.f32.mrb[146].mxu1 }
 0x2cc   : > { %6198 = vmatprep.mubr.bf16.mxu1 %v9813_v13  ;;  %v7598_v8 = vadd.f32 %v7597_v32, %v7596_v37  ;;  %v7655_v40 = vpop.f32.mrb[147].mxu1  ;;  %8216 = vmatpush3.bf16.msra.mxu1 %v8590_v57 }
 0x2cd   : > { %v9852_v48 = vadd.f32 %v7653_v35, %v9774_v9  ;;  %v7656_v42 = vadd.f32 %v7655_v40, %v7654_v11  ;;  %6280 = vmatmul.mubr.bf16.vlgmr.msra.gmra.mrb[0].mxu0 %v9791_v6  ;;  %8217 = vmatprep.subr.bf16.mxu1 %v8591_v44  ;;  %v5158_v11 = vld [vmem:[#allocation3 + $0x159] sm:$0xff] }
 0x2ce   : > { %6287 = vmatprep.mubr.bf16.mxu0 %v5261_v33 }
 0x2cf   : > { %v9856_v0 = vadd.f32 %v7656_v42, %v9778_v5 }
 0x2d0   : > { %v7599_v54 = vpop.f32.mrb[152].mxu0  ;;  %8218 = vmatpush3.bf16.msra.mxu1 %v8591_v44 }
 0x2d1   : > { %v7657_v45 = vpop.f32.mrb[148].mxu1  ;;  %v7600_v21 = vpop.f32.mrb[153].mxu0  ;;  %8219 = vmatprep.subr.bf16.mxu1 %v8592_v51 }
 0x2d2   : > { %v7601_v9 = vadd.f32 %v7600_v21, %v7599_v54  ;;  %v7658_v26 = vpop.f32.mrb[149].mxu1  ;;  %v7602_v52 = vpop.f32.mrb[154].mxu0  ;;  %v5157_v54 = vld [vmem:[#allocation3 + $0x151] sm:$0xff] }
 0x2d3   : > { %6199 = vmatmul.mubr.bf16.gmra.mrb[248].mxu1 %v5165_v10  ;;  %v7659_v6 = vadd.f32 %v7658_v26, %v7657_v45  ;;  %v7660_v19 = vpop.f32.mrb[150].mxu1  ;;  %v7603_v38 = vpop.f32.mrb[155].mxu0  ;;  %v5168_v45 = vpack.c.bf16 %v5158_v11, %v5157_v54 }
 0x2d4   : > { %6206 = vmatprep.mubr.bf16.mxu1 %v9821_v58  ;;  %v7604_v5 = vadd.f32 %v7603_v38, %v7602_v52  ;;  %v7661_v61 = vpop.f32.mrb[151].mxu1  ;;  %8220 = vmatpush3.bf16.msra.mxu1 %v8592_v51  ;;  %v5255_v52 = vld [vmem:[#allocation3 + $0x171] sm:$0xff] }
 0x2d5   : > { %v9860_v39 = vadd.f32 %v7659_v6, %v7595_v46  ;;  %v7662_v60 = vadd.f32 %v7661_v61, %v7660_v19  ;;  %6288 = vmatmul.mubr.bf16.gmra.mrb[4].mxu0 %v9797_v7  ;;  %8221 = vmatprep.subr.bf16.mxu1 %v8593_v31  ;;  %v5155_v7 = vld [vmem:[#allocation3 + $0x139] sm:$0xff] }
 0x2d6   : > { %6295 = vmatprep.mubr.bf16.mxu0 %v5166_v50  ;;  %v5263_v2 = vpack.c.bf16 %v5251_v63, %v5155_v7  ;;  %v5167_v30 = vpack.c.bf16 %v9756_v23, %v5155_v7  ;;  %v5193_v63 = vld [vmem:[#allocation3 + $0x182] sm:$0xff] }
 0x2d7   : > { %v9863_v15 = vadd.f32 %v7662_v60, %v7598_v8 }
 0x2d8   : > { %v7605_v27 = vpop.f32.mrb[156].mxu0  ;;  %8222 = vmatpush3.bf16.msra.mxu1 %v8593_v31 }
 0x2d9   : > { %v7663_v25 = vpop.f32.mrb[152].mxu1  ;;  %v7606_v41 = vpop.f32.mrb[157].mxu0  ;;  %8223 = vmatprep.subr.bf16.mxu1 %v8594_v12 }
 0x2da   : > { %v7607_v28 = vadd.f32 %v7606_v41, %v7605_v27  ;;  %v7664_v55 = vpop.f32.mrb[153].mxu1  ;;  %v7608_v3 = vpop.f32.mrb[158].mxu0 }
 0x2db   : > { %6207 = vmatmul.mubr.bf16.gmra.mrb[252].mxu1 %v5166_v50  ;;  %v7665_v53 = vadd.f32 %v7664_v55, %v7663_v25  ;;  %v7666_v14 = vpop.f32.mrb[154].mxu1  ;;  %v7609_v57 = vpop.f32.mrb[159].mxu0  ;;  %v5159_v50 = vld [vmem:[#allocation3 + $0x169] sm:$0xff] }
 0x2dc   : > { %6214 = vmatprep.mubr.bf16.mxu1 %v9829_v1  ;;  %v7610_v16 = vadd.f32 %v7609_v57, %v7608_v3  ;;  %v7667_v47 = vpop.f32.mrb[155].mxu1  ;;  %8224 = vmatpush3.bf16.msra.mxu1 %v8594_v12  ;;  %v5169_v55 = vpack.c.bf16 %v9783_v62, %v5159_v50 }
 0x2dd   : > { %v9866_v24 = vadd.f32 %v7665_v53, %v7601_v9  ;;  %v7668_v44 = vadd.f32 %v7667_v47, %v7666_v14  ;;  %6296 = vmatmul.mubr.bf16.gmra.mrb[8].mxu0 %v9805_v49  ;;  %8225 = vmatprep.subr.bf16.mxu1 %v8595_v22  ;;  %v5162_v14 = vld [vmem:[#allocation3 + $0x189] sm:$0xff] }
 0x2de   : > { %6303 = vmatprep.mubr.bf16.mxu0 %v5263_v2 }
 0x2df   : > { %v9869_v46 = vadd.f32 %v7668_v44, %v7604_v5 }
 0x2e0   : > { %v7611_v37 = vpop.f32.mrb[160].mxu0  ;;  %8226 = vmatpush3.bf16.msra.mxu1 %v8595_v22  ;;  %v5194_v22 = vld [vmem:[#allocation3 + $0x18a] sm:$0xff] }
 0x2e1   : > { %v7669_v32 = vpop.f32.mrb[156].mxu1  ;;  %v7612_v35 = vpop.f32.mrb[161].mxu0  ;;  %v9885_v57 = vpack.c.bf16 %v5194_v22, %v5193_v63 }
 0x2e2   : > { %v7613_v17 = vadd.f32 %v7612_v35, %v7611_v37  ;;  %v7670_v8 = vpop.f32.mrb[157].mxu1  ;;  %v7614_v40 = vpop.f32.mrb[162].mxu0  ;;  %v5161_v37 = vld [vmem:[#allocation3 + $0x181] sm:$0xff] }
 0x2e3   : > { %6215 = vmatmul.mubr.bf16.gmra.mrb[0].mxu1 %v5167_v30  ;;  %v7671_v33 = vadd.f32 %v7670_v8, %v7669_v32  ;;  %v7672_v42 = vpop.f32.mrb[158].mxu1  ;;  %v7615_v51 = vpop.f32.mrb[163].mxu0  ;;  %v5170_v35 = vpack.c.bf16 %v5162_v14, %v5161_v37  ;;  %v5258_v8 = vld [vmem:[#allocation3 + $0x199] sm:$0xff] }
 0x2e4   : > { %6222 = vmatprep.mubr.bf16.mxu1 %v9837_v56  ;;  %v7616_v49 = vadd.f32 %v7615_v51, %v7614_v40  ;;  %v7673_v10 = vpop.f32.mrb[159].mxu1  ;;  %v5259_v40 = vld [vmem:[#allocation3 + $0x1a1] sm:$0xff] }
 0x2e5   : > { %v9873_v21 = vadd.f32 %v7671_v33, %v7607_v28  ;;  %v7674_v18 = vadd.f32 %v7673_v10, %v7672_v42  ;;  %6304 = vmatmul.mubr.bf16.gmra.mrb[12].mxu0 %v9816_v59  ;;  %v5265_v59 = vpack.c.bf16 %v5255_v52, %v5159_v50 }
 0x2e6   : > { %6311 = vmatprep.mubr.bf16.mxu0 %v5168_v45 }
 0x2e7   : > { %v9876_v23 = vadd.f32 %v7674_v18, %v7610_v16 }
 0x2e8   : > { %v7617_v31 = vpop.f32.mrb[164].mxu0 }
 0x2e9   : > { %v7675_v9 = vpop.f32.mrb[160].mxu1  ;;  %v7618_v26 = vpop.f32.mrb[165].mxu0 }
 0x2ea   : > { %v7619_v6 = vadd.f32 %v7618_v26, %v7617_v31  ;;  %v7676_v19 = vpop.f32.mrb[161].mxu1  ;;  %v7620_v38 = vpop.f32.mrb[166].mxu0 }
 0x2eb   : > { %6223 = vmatmul.mubr.bf16.gmra.mrb[4].mxu1 %v5168_v45  ;;  %v7677_v34 = vadd.f32 %v7676_v19, %v7675_v9  ;;  %v7678_v5 = vpop.f32.mrb[162].mxu1  ;;  %v7621_v61 = vpop.f32.mrb[167].mxu0  ;;  %v5267_v45 = vpack.c.bf16 %v5259_v40, %v5258_v8 }
 0x2ec   : > { %6230 = vmatprep.mubr.bf16.mxu1 %v9845_v20  ;;  %v7622_v60 = vadd.f32 %v7621_v61, %v7620_v38  ;;  %v7679_v12 = vpop.f32.mrb[163].mxu1  ;;  %v8597_v61 = vld [vmem:[#allocation2] sm:$0xff] }
 0x2ed   : > { %v9879_v27 = vadd.f32 %v7677_v34, %v7613_v17  ;;  %v7680_v25 = vadd.f32 %v7679_v12, %v7678_v5  ;;  %6312 = vmatmul.mubr.bf16.gmra.mrb[16].mxu0 %v9824_v29  ;;  %v5235_v50 = vpack.c.bf16 %v8597_v61, %v8597_v61 }
 0x2ee   : > { %6319 = vmatprep.mubr.bf16.mxu0 %v5265_v59 }
 0x2ef   : > { %v9882_v41 = vadd.f32 %v7680_v25, %v7616_v49 }
 0x2f0   : > { %v7623_v28 = vpop.f32.mrb[168].mxu0 }
 0x2f1   : > { %v7681_v3 = vpop.f32.mrb[164].mxu1  ;;  %v7624_v53 = vpop.f32.mrb[169].mxu0 }
 0x2f2   : > { %v7625_v7 = vadd.f32 %v7624_v53, %v7623_v28  ;;  %v7682_v16 = vpop.f32.mrb[165].mxu1  ;;  %v7626_v47 = vpop.f32.mrb[170].mxu0 }
 0x2f3   : > { %6231 = vmatmul.mubr.bf16.gmra.mrb[8].mxu1 %v5169_v55  ;;  %v7683_v2 = vadd.f32 %v7682_v16, %v7681_v3  ;;  %v7684_v44 = vpop.f32.mrb[166].mxu1  ;;  %v7627_v29 = vpop.f32.mrb[171].mxu0 }
 0x2f4   : > { %6238 = vmatprep.mubr.bf16.mxu1 %v9885_v57  ;;  %v7628_v30 = vadd.f32 %v7627_v29, %v7626_v47  ;;  %v7685_v32 = vpop.f32.mrb[167].mxu1 }
 0x2f5   : > { %v9888_v11 = vadd.f32 %v7683_v2, %v7619_v6  ;;  %v7686_v62 = vadd.f32 %v7685_v32, %v7684_v44  ;;  %6320 = vmatmul.mubr.bf16.gmra.mrb[20].mxu0 %v9832_v36 }
 0x2f6   : > { %6327 = vmatprep.mubr.bf16.mxu0 %v5170_v35 }
 0x2f7   : > { %v9891_v17 = vadd.f32 %v7686_v62, %v7622_v60 }
 0x2f8   : > { %v7629_v33 = vpop.f32.mrb[172].mxu0 }
 0x2f9   : > { %v7687_v42 = vpop.f32.mrb[168].mxu1  ;;  %v7630_v51 = vpop.f32.mrb[173].mxu0 }
 0x2fa   : > { %v7631_v54 = vadd.f32 %v7630_v51, %v7629_v33  ;;  %v7688_v49 = vpop.f32.mrb[169].mxu1  ;;  %v7632_v10 = vpop.f32.mrb[174].mxu0 }
 0x2fb   : > { %6239 = vmatmul.mubr.bf16.gmra.mrb[12].mxu1 %v5170_v35  ;;  %v7689_v18 = vadd.f32 %v7688_v49, %v7687_v42  ;;  %v7690_v31 = vpop.f32.mrb[170].mxu1  ;;  %v7633_v9 = vpop.f32.mrb[175].mxu0 }
 0x2fc   : > { %8227 = vmatprep.mubr.bf16.mxu1 %v9802_v4  ;;  %v7634_v26 = vadd.f32 %v7633_v9, %v7632_v10  ;;  %v7691_v36 = vpop.f32.mrb[171].mxu1 }
 0x2fd   : > { %v9894_v52 = vadd.f32 %v7689_v18, %v7625_v7  ;;  %v7692_v6 = vadd.f32 %v7691_v36, %v7690_v31  ;;  %6328 = vmatmul.mubr.bf16.gmra.mrb[24].mxu0 %v9840_v43  ;;  %v5291_v31 = vld [vmem:[#allocation3 + $0x1a2] sm:$0xff] }
 0x2fe   : > { %6335 = vmatprep.mubr.bf16.mxu0 %v5267_v45 }
 0x2ff   : > { %v9897_v19 = vadd.f32 %v7692_v6, %v7628_v30 }
 0x300   : > { %v7715_v38 = vpop.f32.mrb[176].mxu0 }
 0x301   : > { %v7693_v34 = vpop.f32.mrb[172].mxu1  ;;  %v7716_v5 = vpop.f32.mrb[177].mxu0 }
 0x302   : > { %v7694_v60 = vpop.f32.mrb[173].mxu1  ;;  %v7717_v12 = vadd.f32 %v7716_v5, %v7715_v38  ;;  %v7718_v59 = vpop.f32.mrb[178].mxu0 }
 0x303   : > { %8228 = vmatmul.mubr.bf16.vlgmr.msra.gmra.mrb[16].mxu1 %v9813_v13  ;;  %v7695_v4 = vadd.f32 %v7694_v60, %v7693_v34  ;;  %v7696_v25 = vpop.f32.mrb[174].mxu1  ;;  %v7719_v63 = vpop.f32.mrb[179].mxu0 }
 0x304   : > { %8231 = vmatprep.mubr.bf16.mxu1 %v9821_v58  ;;  %v4684_v43 = vadd.f32 %v7717_v12, %v9852_v48  ;;  %v7697_v22 = vpop.f32.mrb[175].mxu1  ;;  %v7720_v28 = vadd.f32 %v7719_v63, %v7718_v59 }
 0x305   : > { %v9902_v55 = vadd.f32 %v7695_v4, %v7631_v54  ;;  %v7698_v3 = vadd.f32 %v7697_v22, %v7696_v25  ;;  %6336 = vmatmul.mubr.bf16.gmra.mrb[28].mxu0 %v5235_v50 }
 0x306   : > { %v4687_v53 = vadd.f32 %v7720_v28, %v9856_v0 }
 0x307   : > { %v9905_v14 = vadd.f32 %v7698_v3, %v7634_v26 }
 0x308   : > { %v7721_v7 = vpop.f32.mrb[180].mxu0 }
 0x309   : > { %v7779_v16 = vpop.f32.mrb[176].mxu1  ;;  %v7722_v13 = vpop.f32.mrb[181].mxu0 }
 0x30a   : > { %v7723_v47 = vadd.f32 %v7722_v13, %v7721_v7  ;;  %v7780_v2 = vpop.f32.mrb[177].mxu1  ;;  %v7724_v44 = vpop.f32.mrb[182].mxu0 }
 0x30b   : > { %8232 = vmatmul.mubr.bf16.gmra.mrb[20].mxu1 %v9829_v1  ;;  %v7781_v58 = vadd.f32 %v7780_v2, %v7779_v16  ;;  %v7782_v48 = vpop.f32.mrb[178].mxu1  ;;  %v7725_v29 = vpop.f32.mrb[183].mxu0 }
 0x30c   : > { %8235 = vmatprep.mubr.bf16.mxu1 %v9837_v56  ;;  %v4692_v37 = vadd.f32 %v7723_v47, %v9860_v39  ;;  %v7726_v30 = vadd.f32 %v7725_v29, %v7724_v44  ;;  %v7783_v32 = vpop.f32.mrb[179].mxu1 }
 0x30d   : > { %v7784_v0 = vadd.f32 %v7783_v32, %v7782_v48  ;;  %v9910_v35 = vadd.f32 %v7781_v58, %v4684_v43 }
 0x30e   : > { %v4695_v62 = vadd.f32 %v7726_v30, %v9863_v15  ;;  %v5290_v15 = vld [vmem:[#allocation3 + $0x19a] sm:$0xff] }
 0x30f   : > { %v9913_v8 = vadd.f32 %v7784_v0, %v4687_v53  ;;  %v5299_v6 = vpack.c.bf16 %v5291_v31, %v5290_v15 }
 0x310   : > { %v7727_v40 = vpop.f32.mrb[184].mxu0 }
 0x311   : > { %v7785_v33 = vpop.f32.mrb[180].mxu1  ;;  %v7728_v42 = vpop.f32.mrb[185].mxu0 }
 0x312   : > { %v7729_v1 = vadd.f32 %v7728_v42, %v7727_v40  ;;  %v7786_v51 = vpop.f32.mrb[181].mxu1  ;;  %v7730_v54 = vpop.f32.mrb[186].mxu0 }
 0x313   : > { %8236 = vmatmul.mubr.bf16.gmra.mrb[24].mxu1 %v9845_v20  ;;  %v7787_v56 = vadd.f32 %v7786_v51, %v7785_v33  ;;  %v7788_v49 = vpop.f32.mrb[182].mxu1  ;;  %v7731_v39 = vpop.f32.mrb[187].mxu0 }
 0x314   : > { %8239 = vmatprep.mubr.bf16.mxu1 %v9885_v57  ;;  %v4700_v10 = vadd.f32 %v7729_v1, %v9866_v24  ;;  %v7732_v45 = vadd.f32 %v7731_v39, %v7730_v54  ;;  %v7789_v18 = vpop.f32.mrb[183].mxu1 }
 0x315   : > { %v7790_v9 = vadd.f32 %v7789_v18, %v7788_v49  ;;  %v9918_v26 = vadd.f32 %v7787_v56, %v4692_v37 }
 0x316   : > { %v4703_v36 = vadd.f32 %v7732_v45, %v9869_v46 }
 0x317   : > { %v9921_v38 = vadd.f32 %v7790_v9, %v4695_v62 }
 0x318   : > { %v7733_v20 = vpop.f32.mrb[188].mxu0 }
 0x319   : > { %v7791_v34 = vpop.f32.mrb[184].mxu1  ;;  %v7734_v5 = vpop.f32.mrb[189].mxu0 }
 0x31a   : > { %v7735_v61 = vadd.f32 %v7734_v5, %v7733_v20  ;;  %v7792_v50 = vpop.f32.mrb[185].mxu1  ;;  %v7736_v57 = vpop.f32.mrb[190].mxu0 }
 0x31b   : > { %8240 = vmatmul.mubr.bf16.gmra.mrb[28].mxu1 %v5299_v6  ;;  %v7793_v24 = vadd.f32 %v7792_v50, %v7791_v34  ;;  %v7794_v60 = vpop.f32.mrb[186].mxu1  ;;  %v7737_v12 = vpop.f32.mrb[191].mxu0 }
 0x31c   : > { %v4708_v59 = vadd.f32 %v7735_v61, %v9873_v21  ;;  %v7738_v4 = vadd.f32 %v7737_v12, %v7736_v57  ;;  %v7795_v25 = vpop.f32.mrb[187].mxu1 }
 0x31d   : > { %v7796_v63 = vadd.f32 %v7795_v25, %v7794_v60  ;;  %v9924_v43 = vadd.f32 %v7793_v24, %v4700_v10 }
 0x31e   : > { %v4711_v46 = vadd.f32 %v7738_v4, %v9876_v23 }
 0x31f   : > { %v9927_v22 = vadd.f32 %v7796_v63, %v4703_v36 }
 0x320   : > { %v7739_v28 = vpop.f32.mrb[192].mxu0 }
 0x321   : > { %v7797_v3 = vpop.f32.mrb[188].mxu1  ;;  %v7740_v53 = vpop.f32.mrb[193].mxu0 }
 0x322   : > { %v7741_v7 = vadd.f32 %v7740_v53, %v7739_v28  ;;  %v7798_v16 = vpop.f32.mrb[189].mxu1  ;;  %v7742_v13 = vpop.f32.mrb[194].mxu0 }
 0x323   : > { %v7799_v47 = vadd.f32 %v7798_v16, %v7797_v3  ;;  %v7800_v2 = vpop.f32.mrb[190].mxu1  ;;  %v7743_v44 = vpop.f32.mrb[195].mxu0 }
 0x324   : > { %v4716_v21 = vadd.f32 %v7741_v7, %v9879_v27  ;;  %v7744_v58 = vadd.f32 %v7743_v44, %v7742_v13  ;;  %v7801_v48 = vpop.f32.mrb[191].mxu1 }
 0x325   : > { %v7802_v29 = vadd.f32 %v7801_v48, %v7800_v2  ;;  %v9930_v37 = vadd.f32 %v7799_v47, %v4708_v59  ;;  %v9967_v48 = vld [vmem:[%s10232_s6] ss:$0 sm:$0xff] }
 0x326   : > { %v4719_v23 = vadd.f32 %v7744_v58, %v9882_v41 }
 0x327   : > { %v9933_v30 = vadd.f32 %v7802_v29, %v4711_v46 }
 0x328   : > { %v7745_v32 = vpop.f32.mrb[196].mxu0 }
 0x329   : > { %v7803_v0 = vpop.f32.mrb[192].mxu1  ;;  %v7746_v62 = vpop.f32.mrb[197].mxu0 }
 0x32a   : > { %v7747_v40 = vadd.f32 %v7746_v62, %v7745_v32  ;;  %v7804_v33 = vpop.f32.mrb[193].mxu1  ;;  %v7748_v42 = vpop.f32.mrb[198].mxu0 }
 0x32b   : > { %v7805_v1 = vadd.f32 %v7804_v33, %v7803_v0  ;;  %v7806_v51 = vpop.f32.mrb[194].mxu1  ;;  %v7749_v54 = vpop.f32.mrb[199].mxu0 }
 0x32c   : > { %v4724_v27 = vadd.f32 %v7747_v40, %v9888_v11  ;;  %v7750_v56 = vadd.f32 %v7749_v54, %v7748_v42  ;;  %v7807_v49 = vpop.f32.mrb[195].mxu1 }
 0x32d   : > { %v7808_v39 = vadd.f32 %v7807_v49, %v7806_v51  ;;  %v9936_v10 = vadd.f32 %v7805_v1, %v4716_v21  ;;  %v9961_v21 = vld [vmem:[%s10231_s5] ss:$0 sm:$0xff] }
 0x32e   : > { %v4727_v41 = vadd.f32 %v7750_v56, %v9891_v17 }
 0x32f   : > { %v9939_v45 = vadd.f32 %v7808_v39, %v4719_v23 }
 0x330   : > { %v7751_v18 = vpop.f32.mrb[200].mxu0 }
 0x331   : > { %v7809_v15 = vpop.f32.mrb[196].mxu1  ;;  %v7752_v31 = vpop.f32.mrb[201].mxu0 }
 0x332   : > { %v7753_v9 = vadd.f32 %v7752_v31, %v7751_v18  ;;  %v7810_v36 = vpop.f32.mrb[197].mxu1  ;;  %v7754_v6 = vpop.f32.mrb[202].mxu0 }
 0x333   : > { %v7811_v20 = vadd.f32 %v7810_v36, %v7809_v15  ;;  %v7812_v34 = vpop.f32.mrb[198].mxu1  ;;  %v7755_v5 = vpop.f32.mrb[203].mxu0 }
 0x334   : > { %v4732_v11 = vadd.f32 %v7753_v9, %v9894_v52  ;;  %v7756_v61 = vadd.f32 %v7755_v5, %v7754_v6  ;;  %v7813_v50 = vpop.f32.mrb[199].mxu1 }
 0x335   : > { %v7814_v57 = vadd.f32 %v7813_v50, %v7812_v34  ;;  %v9942_v24 = vadd.f32 %v7811_v20, %v4724_v27 }
 0x336   : > { %v4735_v17 = vadd.f32 %v7756_v61, %v9897_v19 }
 0x337   : > { %v9945_v60 = vadd.f32 %v7814_v57, %v4727_v41 }
 0x338   : > { %v7757_v12 = vpop.f32.mrb[204].mxu0 }
 0x339   : > { %v7815_v59 = vpop.f32.mrb[200].mxu1  ;;  %v7758_v4 = vpop.f32.mrb[205].mxu0 }
 0x33a   : > { %v7759_v25 = vadd.f32 %v7758_v4, %v7757_v12  ;;  %v7816_v63 = vpop.f32.mrb[201].mxu1  ;;  %v7760_v46 = vpop.f32.mrb[206].mxu0 }
 0x33b   : > { %v7817_v28 = vadd.f32 %v7816_v63, %v7815_v59  ;;  %v7818_v3 = vpop.f32.mrb[202].mxu1  ;;  %v7761_v53 = vpop.f32.mrb[207].mxu0 }
 0x33c   : > { %v9948_v52 = vadd.f32 %v7759_v25, %v9902_v55  ;;  %v7762_v7 = vadd.f32 %v7761_v53, %v7760_v46  ;;  %v7819_v16 = vpop.f32.mrb[203].mxu1 }
 0x33d   : > { %v7820_v13 = vadd.f32 %v7819_v16, %v7818_v3  ;;  %v9950_v19 = vadd.f32 %v7817_v28, %v4732_v11 }
 0x33e   : > { %v9953_v47 = vadd.f32 %v7762_v7, %v9905_v14 }
 0x33f   : > { %v9955_v2 = vadd.f32 %v7820_v13, %v4735_v17 }
 0x340   : > { %v8197_v44 = vpop.f32.mrb[208].mxu0 }
 0x341   : > { %v4886_v55 = vadd.f32 %v8197_v44, %v9918_v26  ;;  %v4877_v58 = vpop.f32.mrb[209].mxu0 }
 0x342   : > { %v4878_v14 = vadd.f32 %v4877_v58, %v9910_v35  ;;  %v8198_v29 = vpop.f32.mrb[210].mxu0 }
 0x343   : > { %v4949_v23 = vmul.f32 %v9961_v21, %v4886_v55  ;;  %v4889_v32 = vadd.f32 %v8198_v29, %v9921_v38  ;;  %v4880_v0 = vpop.f32.mrb[211].mxu0 }
 0x344   : > { %v4947_v62 = vmul.f32 %v9961_v21, %v4878_v14  ;;  %v4881_v26 = vadd.f32 %v4880_v0, %v9913_v8 }
 0x345   : > { %v4972_v40 = vadd.f32 %v9967_v48, %v4949_v23  ;;  %v4950_v33 = vmul.f32 %v9961_v21, %v4889_v32 }
 0x346   : > { %v4970_v42 = vadd.f32 %v9967_v48, %v4947_v62  ;;  %v4948_v35 = vmul.f32 %v9961_v21, %v4881_v26 }
 0x347   : > { %v4988_v1 = vmax.f32 %v4972_v40, 0.0  ;;  %v4973_v51 = vadd.f32 %v9967_v48, %v4950_v33 }
 0x348   : > { %v4986_v54 = vmax.f32 %v4970_v42, 0.0  ;;  %v4971_v27 = vadd.f32 %v9967_v48, %v4948_v35  ;;  %v8201_v38 = vpop.f32.mrb[212].mxu0 }
 0x349   : > { %5004 = vst [vmem:[%s9982_s17 + $0x10] sm:$0xff] %v4988_v1  ;;  %v4989_v8 = vmax.f32 %v4973_v51, 0.0  ;;  %v4902_v56 = vadd.f32 %v8201_v38, %v9930_v37  ;;  %v4893_v49 = vpop.f32.mrb[213].mxu0 }
 0x34a   : > { %5002 = vst [vmem:[%s9982_s17] sm:$0xff] %v4986_v54  ;;  %v4987_v39 = vmax.f32 %v4971_v27, 0.0  ;;  %v4894_v41 = vadd.f32 %v4893_v49, %v9924_v43  ;;  %v8202_v18 = vpop.f32.mrb[214].mxu0 }
 0x34b   : > { %5005 = vst [vmem:[%s9982_s17 + $0x18] sm:$0xff] %v4989_v8  ;;  %v4953_v15 = vmul.f32 %v9961_v21, %v4902_v56  ;;  %v4905_v31 = vadd.f32 %v8202_v18, %v9933_v30  ;;  %v4896_v9 = vpop.f32.mrb[215].mxu0 }
 0x34c   : > { %5003 = vst [vmem:[%s9982_s17 + $0x8] sm:$0xff] %v4987_v39  ;;  %v4951_v36 = vmul.f32 %v9961_v21, %v4894_v41  ;;  %v4897_v6 = vadd.f32 %v4896_v9, %v9927_v22 }
 0x34d   : > { %v4976_v37 = vadd.f32 %v9967_v48, %v4953_v15  ;;  %v4954_v20 = vmul.f32 %v9961_v21, %v4905_v31 }
 0x34e   : > { %v7821_v34 = vpop.f32.mrb[204].mxu1  ;;  %v4974_v43 = vadd.f32 %v9967_v48, %v4951_v36  ;;  %v4952_v5 = vmul.f32 %v9961_v21, %v4897_v6 }
 0x34f   : > { %v4992_v11 = vmax.f32 %v4976_v37, 0.0  ;;  %v7822_v61 = vpop.f32.mrb[205].mxu1  ;;  %v4977_v30 = vadd.f32 %v9967_v48, %v4954_v20 }
 0x350   : > { %v7823_v50 = vadd.f32 %v7822_v61, %v7821_v34  ;;  %v4990_v57 = vmax.f32 %v4974_v43, 0.0  ;;  %v7824_v17 = vpop.f32.mrb[206].mxu1  ;;  %v4975_v22 = vadd.f32 %v9967_v48, %v4952_v5  ;;  %v8205_v12 = vpop.f32.mrb[216].mxu0 }
 0x351   : > { %5008 = vst [vmem:[%s9982_s17 + $0x30] sm:$0xff] %v4992_v11  ;;  %v4993_v59 = vmax.f32 %v4977_v30, 0.0  ;;  %v7825_v4 = vpop.f32.mrb[207].mxu1  ;;  %v4918_v25 = vadd.f32 %v8205_v12, %v9942_v24  ;;  %v4909_v63 = vpop.f32.mrb[217].mxu0 }
 0x352   : > { %5006 = vst [vmem:[%s9982_s17 + $0x20] sm:$0xff] %v4990_v57  ;;  %v7826_v46 = vadd.f32 %v7825_v4, %v7824_v17  ;;  %v4991_v28 = vmax.f32 %v4975_v22, 0.0  ;;  %v4910_v3 = vadd.f32 %v4909_v63, %v9936_v10  ;;  %v8206_v53 = vpop.f32.mrb[218].mxu0  ;;  %v4837_v7 = vadd.f32 %v7823_v50, %v9948_v52 }
 0x353   : > { %5009 = vst [vmem:[%s9982_s17 + $0x38] sm:$0xff] %v4993_v59  ;;  %v4957_v16 = vmul.f32 %v9961_v21, %v4918_v25  ;;  %v4921_v13 = vadd.f32 %v8206_v53, %v9945_v60  ;;  %v4912_v44 = vpop.f32.mrb[219].mxu0 }
 0x354   : > { %5007 = vst [vmem:[%s9982_s17 + $0x28] sm:$0xff] %v4991_v28  ;;  %v4955_v55 = vmul.f32 %v9961_v21, %v4910_v3  ;;  %v4913_v24 = vadd.f32 %v4912_v44, %v9939_v45  ;;  %v4840_v58 = vadd.f32 %v7826_v46, %v9953_v47 }
 0x355   : > { %v4980_v14 = vadd.f32 %v9967_v48, %v4957_v16  ;;  %v4958_v10 = vmul.f32 %v9961_v21, %v4921_v13 }
 0x356   : > { %v7859_v29 = vpop.f32.mrb[208].mxu1  ;;  %v4978_v52 = vadd.f32 %v9967_v48, %v4955_v55  ;;  %v4956_v23 = vmul.f32 %v9961_v21, %v4913_v24 }
 0x357   : > { %v4996_v60 = vmax.f32 %v4980_v14, 0.0  ;;  %v7860_v32 = vpop.f32.mrb[209].mxu1  ;;  %v4981_v0 = vadd.f32 %v9967_v48, %v4958_v10 }
 0x358   : > { %v4994_v62 = vmax.f32 %v4978_v52, 0.0  ;;  %v7861_v26 = vadd.f32 %v7860_v32, %v7859_v29  ;;  %v7862_v45 = vpop.f32.mrb[210].mxu1  ;;  %v4979_v47 = vadd.f32 %v9967_v48, %v4956_v23  ;;  %v8209_v40 = vpop.f32.mrb[220].mxu0 }
 0x359   : > { %5012 = vst [vmem:[%s9982_s17 + $0x50] sm:$0xff] %v4996_v60  ;;  %v4997_v33 = vmax.f32 %v4981_v0, 0.0  ;;  %v7863_v42 = vpop.f32.mrb[211].mxu1  ;;  %v4934_v35 = vadd.f32 %v8209_v40, %v4837_v7  ;;  %v4925_v1 = vpop.f32.mrb[221].mxu0 }
 0x35a   : > { %5010 = vst [vmem:[%s9982_s17 + $0x40] sm:$0xff] %v4994_v62  ;;  %v4995_v51 = vmax.f32 %v4979_v47, 0.0  ;;  %v7864_v54 = vadd.f32 %v7863_v42, %v7862_v45  ;;  %v4926_v27 = vadd.f32 %v4925_v1, %v9950_v19  ;;  %v8210_v38 = vpop.f32.mrb[222].mxu0 }
 0x35b   : > { %5013 = vst [vmem:[%s9982_s17 + $0x58] sm:$0xff] %v4997_v33  ;;  %v4961_v8 = vmul.f32 %v9961_v21, %v4934_v35  ;;  %v4937_v56 = vadd.f32 %v8210_v38, %v4840_v58  ;;  %v4928_v49 = vpop.f32.mrb[223].mxu0 }
 0x35c   : > { %5011 = vst [vmem:[%s9982_s17 + $0x48] sm:$0xff] %v4995_v51  ;;  %v4959_v39 = vmul.f32 %v9961_v21, %v4926_v27  ;;  %v4929_v41 = vadd.f32 %v4928_v49, %v9955_v2 }
 0x35d   : > { %v4984_v18 = vadd.f32 %v9967_v48, %v4961_v8  ;;  %v4962_v15 = vmul.f32 %v9961_v21, %v4937_v56 }
 0x35e   : > { %v7865_v31 = vpop.f32.mrb[212].mxu1  ;;  %v4982_v19 = vadd.f32 %v9967_v48, %v4959_v39  ;;  %v4960_v9 = vmul.f32 %v9961_v21, %v4929_v41 }
 0x35f   : > { %v5000_v36 = vmax.f32 %v4984_v18, 0.0  ;;  %v7866_v6 = vpop.f32.mrb[213].mxu1  ;;  %v4985_v37 = vadd.f32 %v9967_v48, %v4962_v15 }
 0x360   : > { %v4998_v20 = vmax.f32 %v4982_v19, 0.0  ;;  %v7867_v34 = vadd.f32 %v7866_v6, %v7865_v31  ;;  %v7868_v43 = vpop.f32.mrb[214].mxu1  ;;  %v4983_v2 = vadd.f32 %v9967_v48, %v4960_v9  ;;  %v7923_v5 = vpop.f32.mrb[224].mxu0 }
 0x361   : > { %5016 = vst [vmem:[%s9982_s17 + $0x70] sm:$0xff] %v5000_v36  ;;  %v5001_v11 = vmax.f32 %v4985_v37, 0.0  ;;  %v7869_v61 = vpop.f32.mrb[215].mxu1  ;;  %v7924_v30 = vpop.f32.mrb[225].mxu0 }
 0x362   : > { %5014 = vst [vmem:[%s9982_s17 + $0x60] sm:$0xff] %v4998_v20  ;;  %v4999_v50 = vmax.f32 %v4983_v2, 0.0  ;;  %v7870_v57 = vadd.f32 %v7869_v61, %v7868_v43  ;;  %v7925_v17 = vadd.f32 %v7924_v30, %v7923_v5  ;;  %v7926_v22 = vpop.f32.mrb[226].mxu0 }
 0x363   : > { %5017 = vst [vmem:[%s9982_s17 + $0x78] sm:$0xff] %v5001_v11  ;;  %v7927_v12 = vpop.f32.mrb[227].mxu0 }
 0x364   : > { %5015 = vst [vmem:[%s9982_s17 + $0x68] sm:$0xff] %v4999_v50  ;;  %v10036_v59 = vadd.f32 %v7925_v17, %v7861_v26  ;;  %v7928_v4 = vadd.f32 %v7927_v12, %v7926_v22 }
 0x366   : > { %v7871_v25 = vpop.f32.mrb[216].mxu1  ;;  %v10038_v63 = vadd.f32 %v7928_v4, %v7864_v54 }
 0x367   : > { %v7872_v46 = vpop.f32.mrb[217].mxu1 }
 0x368   : > { %v7873_v28 = vadd.f32 %v7872_v46, %v7871_v25  ;;  %v7874_v3 = vpop.f32.mrb[218].mxu1  ;;  %v7929_v53 = vpop.f32.mrb[228].mxu0 }
 0x369   : > { %v7875_v7 = vpop.f32.mrb[219].mxu1  ;;  %v7930_v16 = vpop.f32.mrb[229].mxu0 }
 0x36a   : > { %v7876_v13 = vadd.f32 %v7875_v7, %v7874_v3  ;;  %v7931_v44 = vadd.f32 %v7930_v16, %v7929_v53  ;;  %v7932_v55 = vpop.f32.mrb[230].mxu0 }
 0x36b   : > { %v7933_v24 = vpop.f32.mrb[231].mxu0 }
 0x36c   : > { %v10040_v58 = vadd.f32 %v7931_v44, %v7867_v34  ;;  %v7934_v14 = vadd.f32 %v7933_v24, %v7932_v55 }
 0x36e   : > { %v7877_v10 = vpop.f32.mrb[220].mxu1  ;;  %v10042_v29 = vadd.f32 %v7934_v14, %v7870_v57 }
 0x36f   : > { %v7878_v52 = vpop.f32.mrb[221].mxu1 }
 0x370   : > { %v7879_v23 = vadd.f32 %v7878_v52, %v7877_v10  ;;  %v7880_v60 = vpop.f32.mrb[222].mxu1  ;;  %v7935_v32 = vpop.f32.mrb[232].mxu0 }
 0x371   : > { %v7881_v0 = vpop.f32.mrb[223].mxu1  ;;  %v7936_v62 = vpop.f32.mrb[233].mxu0 }
 0x372   : > { %v7882_v26 = vadd.f32 %v7881_v0, %v7880_v60  ;;  %v7937_v45 = vadd.f32 %v7936_v62, %v7935_v32  ;;  %v7938_v47 = vpop.f32.mrb[234].mxu0 }
 0x373   : > { %v7939_v40 = vpop.f32.mrb[235].mxu0 }
 0x374   : > { %v10044_v33 = vadd.f32 %v7937_v45, %v7873_v28  ;;  %v7940_v42 = vadd.f32 %v7939_v40, %v7938_v47 }
 0x376   : > { %v7883_v35 = vpop.f32.mrb[224].mxu1  ;;  %v10046_v1 = vadd.f32 %v7940_v42, %v7876_v13 }
 0x377   : > { %v7884_v51 = vpop.f32.mrb[225].mxu1 }
 0x378   : > { %v7885_v54 = vadd.f32 %v7884_v51, %v7883_v35  ;;  %v7886_v27 = vpop.f32.mrb[226].mxu1  ;;  %v7941_v38 = vpop.f32.mrb[236].mxu0 }
 0x379   : > { %v7887_v8 = vpop.f32.mrb[227].mxu1  ;;  %v7942_v56 = vpop.f32.mrb[237].mxu0 }
 0x37a   : > { %v7888_v49 = vadd.f32 %v7887_v8, %v7886_v27  ;;  %v7943_v39 = vadd.f32 %v7942_v56, %v7941_v38  ;;  %v7944_v41 = vpop.f32.mrb[238].mxu0 }
 0x37b   : > { %v7945_v18 = vpop.f32.mrb[239].mxu0 }
 0x37c   : > { %v10048_v15 = vadd.f32 %v7943_v39, %v7879_v23  ;;  %v7946_v31 = vadd.f32 %v7945_v18, %v7944_v41 }
 0x37e   : > { %v7889_v19 = vpop.f32.mrb[228].mxu1  ;;  %v10050_v9 = vadd.f32 %v7946_v31, %v7882_v26 }
 0x37f   : > { %v7890_v36 = vpop.f32.mrb[229].mxu1 }
 0x380   : > { %v7891_v6 = vadd.f32 %v7890_v36, %v7889_v19  ;;  %v7892_v37 = vpop.f32.mrb[230].mxu1  ;;  %v7947_v20 = vpop.f32.mrb[240].mxu0 }
 0x381   : > { %v7893_v34 = vpop.f32.mrb[231].mxu1  ;;  %v7948_v43 = vpop.f32.mrb[241].mxu0 }
 0x382   : > { %v7894_v2 = vadd.f32 %v7893_v34, %v7892_v37  ;;  %v7949_v5 = vadd.f32 %v7948_v43, %v7947_v20  ;;  %v7950_v11 = vpop.f32.mrb[242].mxu0 }
 0x383   : > { %v7951_v61 = vpop.f32.mrb[243].mxu0 }
 0x384   : > { %v10052_v30 = vadd.f32 %v7949_v5, %v7885_v54  ;;  %v7952_v50 = vadd.f32 %v7951_v61, %v7950_v11 }
 0x386   : > { %v7895_v57 = vpop.f32.mrb[232].mxu1  ;;  %v10054_v17 = vadd.f32 %v7952_v50, %v7888_v49 }
 0x387   : > { %v7896_v22 = vpop.f32.mrb[233].mxu1 }
 0x388   : > { %v7897_v12 = vadd.f32 %v7896_v22, %v7895_v57  ;;  %v7898_v4 = vpop.f32.mrb[234].mxu1  ;;  %v7953_v25 = vpop.f32.mrb[244].mxu0 }
 0x389   : > { %v7899_v46 = vpop.f32.mrb[235].mxu1  ;;  %v7954_v28 = vpop.f32.mrb[245].mxu0 }
 0x38a   : > { %v7900_v3 = vadd.f32 %v7899_v46, %v7898_v4  ;;  %v7955_v53 = vadd.f32 %v7954_v28, %v7953_v25  ;;  %v7956_v7 = vpop.f32.mrb[246].mxu0 }
 0x38b   : > { %v7957_v16 = vpop.f32.mrb[247].mxu0 }
 0x38c   : > { %v10056_v13 = vadd.f32 %v7955_v53, %v7891_v6  ;;  %v7958_v44 = vadd.f32 %v7957_v16, %v7956_v7 }
 0x38e   : > { %v7901_v55 = vpop.f32.mrb[236].mxu1  ;;  %v10058_v24 = vadd.f32 %v7958_v44, %v7894_v2 }
 0x38f   : > { %v7902_v14 = vpop.f32.mrb[237].mxu1 }
 0x390   : > { %v7903_v10 = vadd.f32 %v7902_v14, %v7901_v55  ;;  %v7904_v52 = vpop.f32.mrb[238].mxu1  ;;  %v7959_v23 = vpop.f32.mrb[248].mxu0 }
 0x391   : > { %v7905_v60 = vpop.f32.mrb[239].mxu1  ;;  %v7960_v32 = vpop.f32.mrb[249].mxu0 }
 0x392   : > { %v7906_v0 = vadd.f32 %v7905_v60, %v7904_v52  ;;  %v7961_v62 = vadd.f32 %v7960_v32, %v7959_v23  ;;  %v7962_v26 = vpop.f32.mrb[250].mxu0 }
 0x393   : > { %v7963_v45 = vpop.f32.mrb[251].mxu0 }
 0x394   : > { %v10060_v47 = vadd.f32 %v7961_v62, %v7897_v12  ;;  %v7964_v40 = vadd.f32 %v7963_v45, %v7962_v26 }
 0x396   : > { %v7987_v42 = vpop.f32.mrb[240].mxu1  ;;  %v10062_v35 = vadd.f32 %v7964_v40, %v7900_v3 }
 0x397   : > { %v7988_v51 = vpop.f32.mrb[241].mxu1 }
 0x398   : > { %v7989_v54 = vadd.f32 %v7988_v51, %v7987_v42  ;;  %v7990_v27 = vpop.f32.mrb[242].mxu1  ;;  %v7965_v38 = vpop.f32.mrb[252].mxu0 }
 0x399   : > { %v7991_v8 = vpop.f32.mrb[243].mxu1  ;;  %v7966_v56 = vpop.f32.mrb[253].mxu0 }
 0x39a   : > { %v6185_v49 = vadd.f32 %v7989_v54, %v10036_v59  ;;  %v7992_v39 = vadd.f32 %v7991_v8, %v7990_v27  ;;  %v7967_v41 = vadd.f32 %v7966_v56, %v7965_v38  ;;  %v7968_v18 = vpop.f32.mrb[254].mxu0 }
 0x39b   : > { %v7969_v31 = vpop.f32.mrb[255].mxu0 }
 0x39c   : > { %v6188_v19 = vadd.f32 %v7992_v39, %v10038_v63  ;;  %v10066_v36 = vadd.f32 %v7967_v41, %v7903_v10  ;;  %v7970_v6 = vadd.f32 %v7969_v31, %v7968_v18 }
 0x39e   : > { %v7993_v37 = vpop.f32.mrb[244].mxu1  ;;  %v10068_v20 = vadd.f32 %v7970_v6, %v7906_v0 }
 0x39f   : > { %v7994_v34 = vpop.f32.mrb[245].mxu1 }
 0x3a0   : > { %v7995_v43 = vadd.f32 %v7994_v34, %v7993_v37  ;;  %v7996_v2 = vpop.f32.mrb[246].mxu1  ;;  %v8051_v5 = vpop.f32.mrb[0].mxu0 }
 0x3a1   : > { %v7997_v11 = vpop.f32.mrb[247].mxu1  ;;  %v8052_v61 = vpop.f32.mrb[1].mxu0 }
 0x3a2   : > { %v6193_v59 = vadd.f32 %v7995_v43, %v10040_v58  ;;  %v7998_v50 = vadd.f32 %v7997_v11, %v7996_v2  ;;  %v8053_v57 = vadd.f32 %v8052_v61, %v8051_v5  ;;  %v8054_v22 = vpop.f32.mrb[2].mxu0 }
 0x3a3   : > { %v8055_v12 = vpop.f32.mrb[3].mxu0 }
 0x3a4   : > { %v6196_v63 = vadd.f32 %v7998_v50, %v10042_v29  ;;  %v8056_v4 = vadd.f32 %v8055_v12, %v8054_v22  ;;  %v10072_v25 = vadd.f32 %v8053_v57, %v6185_v49 }
 0x3a6   : > { %v7999_v46 = vpop.f32.mrb[248].mxu1  ;;  %v10074_v28 = vadd.f32 %v8056_v4, %v6188_v19 }
 0x3a7   : > { %v8000_v3 = vpop.f32.mrb[249].mxu1 }
 0x3a8   : > { %v8001_v53 = vadd.f32 %v8000_v3, %v7999_v46  ;;  %v8002_v7 = vpop.f32.mrb[250].mxu1  ;;  %v8057_v16 = vpop.f32.mrb[4].mxu0 }
 0x3a9   : > { %v8003_v44 = vpop.f32.mrb[251].mxu1  ;;  %v8058_v55 = vpop.f32.mrb[5].mxu0 }
 0x3aa   : > { %v6201_v58 = vadd.f32 %v8001_v53, %v10044_v33  ;;  %v8004_v14 = vadd.f32 %v8003_v44, %v8002_v7  ;;  %v8059_v10 = vadd.f32 %v8058_v55, %v8057_v16  ;;  %v8060_v52 = vpop.f32.mrb[6].mxu0 }
 0x3ab   : > { %v8061_v23 = vpop.f32.mrb[7].mxu0 }
 0x3ac   : > { %v6204_v29 = vadd.f32 %v8004_v14, %v10046_v1  ;;  %v8062_v60 = vadd.f32 %v8061_v23, %v8060_v52  ;;  %v10078_v32 = vadd.f32 %v8059_v10, %v6193_v59 }
 0x3ae   : > { %v8005_v0 = vpop.f32.mrb[252].mxu1  ;;  %v10080_v62 = vadd.f32 %v8062_v60, %v6196_v63 }
 0x3af   : > { %v8006_v26 = vpop.f32.mrb[253].mxu1 }
 0x3b0   : > { %v8007_v45 = vadd.f32 %v8006_v26, %v8005_v0  ;;  %v8008_v40 = vpop.f32.mrb[254].mxu1  ;;  %v8063_v42 = vpop.f32.mrb[8].mxu0 }
 0x3b1   : > { %v8009_v51 = vpop.f32.mrb[255].mxu1  ;;  %v8064_v54 = vpop.f32.mrb[9].mxu0 }
 0x3b2   : > { %v6209_v33 = vadd.f32 %v8007_v45, %v10048_v15  ;;  %v8010_v27 = vadd.f32 %v8009_v51, %v8008_v40  ;;  %v8065_v38 = vadd.f32 %v8064_v54, %v8063_v42  ;;  %v8066_v8 = vpop.f32.mrb[10].mxu0 }
 0x3b3   : > { %v8067_v56 = vpop.f32.mrb[11].mxu0 }
 0x3b4   : > { %v6212_v1 = vadd.f32 %v8010_v27, %v10050_v9  ;;  %v8068_v49 = vadd.f32 %v8067_v56, %v8066_v8  ;;  %v10084_v39 = vadd.f32 %v8065_v38, %v6201_v58 }
 0x3b6   : > { %v8011_v41 = vpop.f32.mrb[0].mxu1  ;;  %v10086_v18 = vadd.f32 %v8068_v49, %v6204_v29 }
 0x3b7   : > { %v8012_v31 = vpop.f32.mrb[1].mxu1 }
 0x3b8   : > { %v8013_v19 = vadd.f32 %v8012_v31, %v8011_v41  ;;  %v8014_v6 = vpop.f32.mrb[2].mxu1  ;;  %v8069_v37 = vpop.f32.mrb[12].mxu0 }
 0x3b9   : > { %v8015_v34 = vpop.f32.mrb[3].mxu1  ;;  %v8070_v43 = vpop.f32.mrb[13].mxu0 }
 0x3ba   : > { %v6217_v15 = vadd.f32 %v8013_v19, %v10052_v30  ;;  %v8016_v2 = vadd.f32 %v8015_v34, %v8014_v6  ;;  %v8071_v5 = vadd.f32 %v8070_v43, %v8069_v37  ;;  %v8072_v11 = vpop.f32.mrb[14].mxu0 }
 0x3bb   : > { %v8073_v61 = vpop.f32.mrb[15].mxu0 }
 0x3bc   : > { %v6220_v9 = vadd.f32 %v8016_v2, %v10054_v17  ;;  %v8074_v59 = vadd.f32 %v8073_v61, %v8072_v11  ;;  %v10090_v50 = vadd.f32 %v8071_v5, %v6209_v33 }
 0x3be   : > { %v8017_v57 = vpop.f32.mrb[4].mxu1  ;;  %v10092_v22 = vadd.f32 %v8074_v59, %v6212_v1 }
 0x3bf   : > { %v8018_v12 = vpop.f32.mrb[5].mxu1 }
 0x3c0   : > { %v8019_v63 = vadd.f32 %v8018_v12, %v8017_v57  ;;  %v8020_v4 = vpop.f32.mrb[6].mxu1  ;;  %v8075_v46 = vpop.f32.mrb[16].mxu0 }
 0x3c1   : > { %v8021_v3 = vpop.f32.mrb[7].mxu1  ;;  %v8076_v53 = vpop.f32.mrb[17].mxu0 }
 0x3c2   : > { %v6225_v30 = vadd.f32 %v8019_v63, %v10056_v13  ;;  %v8022_v7 = vadd.f32 %v8021_v3, %v8020_v4  ;;  %v8077_v16 = vadd.f32 %v8076_v53, %v8075_v46  ;;  %v8078_v44 = vpop.f32.mrb[18].mxu0 }
 0x3c3   : > { %v8079_v55 = vpop.f32.mrb[19].mxu0 }
 0x3c4   : > { %v6228_v17 = vadd.f32 %v8022_v7, %v10058_v24  ;;  %v8080_v58 = vadd.f32 %v8079_v55, %v8078_v44  ;;  %v10096_v14 = vadd.f32 %v8077_v16, %v6217_v15 }
 0x3c6   : > { %v8023_v10 = vpop.f32.mrb[8].mxu1  ;;  %v10098_v52 = vadd.f32 %v8080_v58, %v6220_v9 }
 0x3c7   : > { %v8024_v23 = vpop.f32.mrb[9].mxu1 }
 0x3c8   : > { %v8025_v29 = vadd.f32 %v8024_v23, %v8023_v10  ;;  %v8026_v60 = vpop.f32.mrb[10].mxu1  ;;  %v8081_v0 = vpop.f32.mrb[20].mxu0 }
 0x3c9   : > { %v8027_v26 = vpop.f32.mrb[11].mxu1  ;;  %v8082_v45 = vpop.f32.mrb[21].mxu0 }
 0x3ca   : > { %v6233_v13 = vadd.f32 %v8025_v29, %v10060_v47  ;;  %v8028_v40 = vadd.f32 %v8027_v26, %v8026_v60  ;;  %v8083_v42 = vadd.f32 %v8082_v45, %v8081_v0  ;;  %v8084_v51 = vpop.f32.mrb[22].mxu0 }
 0x3cb   : > { %v8085_v54 = vpop.f32.mrb[23].mxu0 }
 0x3cc   : > { %v6236_v24 = vadd.f32 %v8028_v40, %v10062_v35  ;;  %v8086_v33 = vadd.f32 %v8085_v54, %v8084_v51  ;;  %v10102_v27 = vadd.f32 %v8083_v42, %v6225_v30 }
 0x3ce   : > { %v8029_v38 = vpop.f32.mrb[12].mxu1  ;;  %v10104_v8 = vadd.f32 %v8086_v33, %v6228_v17 }
 0x3cf   : > { %v8030_v56 = vpop.f32.mrb[13].mxu1 }
 0x3d0   : > { %v8031_v1 = vadd.f32 %v8030_v56, %v8029_v38  ;;  %v8032_v49 = vpop.f32.mrb[14].mxu1  ;;  %v8087_v41 = vpop.f32.mrb[24].mxu0 }
 0x3d1   : > { %v8033_v31 = vpop.f32.mrb[15].mxu1  ;;  %v8088_v19 = vpop.f32.mrb[25].mxu0 }
 0x3d2   : > { %v6241_v47 = vadd.f32 %v8031_v1, %v10066_v36  ;;  %v8034_v6 = vadd.f32 %v8033_v31, %v8032_v49  ;;  %v8089_v37 = vadd.f32 %v8088_v19, %v8087_v41  ;;  %v8090_v34 = vpop.f32.mrb[26].mxu0 }
 0x3d3   : > { %v8091_v43 = vpop.f32.mrb[27].mxu0 }
 0x3d4   : > { %v6244_v35 = vadd.f32 %v8034_v6, %v10068_v20  ;;  %v8092_v15 = vadd.f32 %v8091_v43, %v8090_v34  ;;  %v10108_v2 = vadd.f32 %v8089_v37, %v6233_v13 }
 0x3d6   : > { %v8229_v5 = vpop.f32.mrb[16].mxu1  ;;  %v10110_v11 = vadd.f32 %v8092_v15, %v6236_v24 }
 0x3d7   : > { %v6387_v61 = vadd.f32 %v8229_v5, %v10078_v32  ;;  %v6378_v9 = vpop.f32.mrb[17].mxu1 }
 0x3d8   : > { %v6379_v59 = vadd.f32 %v6378_v9, %v10072_v25  ;;  %v8230_v57 = vpop.f32.mrb[18].mxu1  ;;  %v8093_v12 = vpop.f32.mrb[28].mxu0 }
 0x3d9   : > { %v6450_v36 = vmul.f32 %v9961_v21, %v6387_v61  ;;  %v6390_v63 = vadd.f32 %v8230_v57, %v10080_v62  ;;  %v6381_v4 = vpop.f32.mrb[19].mxu1  ;;  %v8094_v46 = vpop.f32.mrb[29].mxu0 }
 0x3da   : > { %v6448_v20 = vmul.f32 %v9961_v21, %v6379_v59  ;;  %v6382_v3 = vadd.f32 %v6381_v4, %v10074_v28  ;;  %v8095_v53 = vadd.f32 %v8094_v46, %v8093_v12  ;;  %v8096_v30 = vpop.f32.mrb[30].mxu0 }
 0x3db   : > { %v6473_v32 = vadd.f32 %v9967_v48, %v6450_v36  ;;  %v6451_v7 = vmul.f32 %v9961_v21, %v6390_v63  ;;  %v8097_v25 = vpop.f32.mrb[31].mxu0 }
 0x3dc   : > { %v6471_v16 = vadd.f32 %v9967_v48, %v6448_v20  ;;  %v6449_v44 = vmul.f32 %v9961_v21, %v6382_v3  ;;  %v8098_v62 = vadd.f32 %v8097_v25, %v8096_v30  ;;  %v6338_v55 = vadd.f32 %v8095_v53, %v6241_v47 }
 0x3dd   : > { %v6489_v17 = vmax.f32 %v6473_v32, 0.0  ;;  %v6474_v58 = vadd.f32 %v9967_v48, %v6451_v7 }
 0x3de   : > { %v6487_v28 = vmax.f32 %v6471_v16, 0.0  ;;  %v6472_v10 = vadd.f32 %v9967_v48, %v6449_v44  ;;  %v8233_v23 = vpop.f32.mrb[20].mxu1  ;;  %v6341_v29 = vadd.f32 %v8098_v62, %v6244_v35 }
 0x3df   : > { %6927 = vst [vmem:[%s9982_s17 + $0x90] sm:$0xff] %v6489_v17  ;;  %v6490_v60 = vmax.f32 %v6474_v58, 0.0  ;;  %v6403_v0 = vadd.f32 %v8233_v23, %v10090_v50  ;;  %v6394_v26 = vpop.f32.mrb[21].mxu1 }
 0x3e0   : > { %6925 = vst [vmem:[%s9982_s17 + $0x80] sm:$0xff] %v6487_v28  ;;  %v6488_v45 = vmax.f32 %v6472_v10, 0.0  ;;  %v6395_v13 = vadd.f32 %v6394_v26, %v10084_v39  ;;  %v8234_v40 = vpop.f32.mrb[22].mxu1 }
 0x3e1   : > { %6928 = vst [vmem:[%s9982_s17 + $0x98] sm:$0xff] %v6490_v60  ;;  %v6454_v42 = vmul.f32 %v9961_v21, %v6403_v0  ;;  %v6406_v51 = vadd.f32 %v8234_v40, %v10092_v22  ;;  %v6397_v54 = vpop.f32.mrb[23].mxu1 }
 0x3e2   : > { %6926 = vst [vmem:[%s9982_s17 + $0x88] sm:$0xff] %v6488_v45  ;;  %v6452_v24 = vmul.f32 %v9961_v21, %v6395_v13  ;;  %v6398_v33 = vadd.f32 %v6397_v54, %v10086_v18 }
 0x3e3   : > { %v6477_v50 = vadd.f32 %v9967_v48, %v6454_v42  ;;  %v6455_v38 = vmul.f32 %v9961_v21, %v6406_v51 }
 0x3e4   : > { %v6475_v39 = vadd.f32 %v9967_v48, %v6452_v24  ;;  %v6453_v56 = vmul.f32 %v9961_v21, %v6398_v33 }
 0x3e5   : > { %v6493_v1 = vmax.f32 %v6477_v50, 0.0  ;;  %v6478_v49 = vadd.f32 %v9967_v48, %v6455_v38 }
 0x3e6   : > { %v6491_v22 = vmax.f32 %v6475_v39, 0.0  ;;  %v6476_v41 = vadd.f32 %v9967_v48, %v6453_v56  ;;  %v8237_v31 = vpop.f32.mrb[24].mxu1 }
 0x3e7   : > { %6931 = vst [vmem:[%s9982_s17 + $0xb0] sm:$0xff] %v6493_v1  ;;  %v6494_v19 = vmax.f32 %v6478_v49, 0.0  ;;  %v6419_v18 = vadd.f32 %v8237_v31, %v10102_v27  ;;  %v6410_v47 = vpop.f32.mrb[25].mxu1 }
 0x3e8   : > { %6929 = vst [vmem:[%s9982_s17 + $0xa0] sm:$0xff] %v6491_v22  ;;  %v6492_v6 = vmax.f32 %v6476_v41, 0.0  ;;  %v6411_v37 = vadd.f32 %v6410_v47, %v10096_v14  ;;  %v8238_v34 = vpop.f32.mrb[26].mxu1 }
 0x3e9   : > { %6932 = vst [vmem:[%s9982_s17 + $0xb8] sm:$0xff] %v6494_v19  ;;  %v6458_v43 = vmul.f32 %v9961_v21, %v6419_v18  ;;  %v6422_v35 = vadd.f32 %v8238_v34, %v10104_v8  ;;  %v6413_v15 = vpop.f32.mrb[27].mxu1 }
 0x3ea   : > { %6930 = vst [vmem:[%s9982_s17 + $0xa8] sm:$0xff] %v6492_v6  ;;  %v6456_v5 = vmul.f32 %v9961_v21, %v6411_v37  ;;  %v6414_v61 = vadd.f32 %v6413_v15, %v10098_v52 }
 0x3eb   : > { %v6481_v27 = vadd.f32 %v9967_v48, %v6458_v43  ;;  %v6459_v9 = vmul.f32 %v9961_v21, %v6422_v35 }
 0x3ec   : > { %v6479_v14 = vadd.f32 %v9967_v48, %v6456_v5  ;;  %v6457_v59 = vmul.f32 %v9961_v21, %v6414_v61 }
 0x3ed   : > { %v6497_v57 = vmax.f32 %v6481_v27, 0.0  ;;  %v6482_v12 = vadd.f32 %v9967_v48, %v6459_v9 }
 0x3ee   : > { %v6495_v8 = vmax.f32 %v6479_v14, 0.0  ;;  %v6480_v36 = vadd.f32 %v9967_v48, %v6457_v59  ;;  %v8241_v63 = vpop.f32.mrb[28].mxu1 }
 0x3ef   : > { %6935 = vst [vmem:[%s9982_s17 + $0xd0] sm:$0xff] %v6497_v57  ;;  %v6498_v4 = vmax.f32 %v6482_v12, 0.0  ;;  %v6435_v52 = vadd.f32 %v8241_v63, %v6338_v55  ;;  %v6426_v46 = vpop.f32.mrb[29].mxu1 }
 0x3f0   : > { %6933 = vst [vmem:[%s9982_s17 + $0xc0] sm:$0xff] %v6495_v8  ;;  %v6496_v20 = vmax.f32 %v6480_v36, 0.0  ;;  %v6427_v3 = vadd.f32 %v6426_v46, %v10108_v2  ;;  %v8242_v53 = vpop.f32.mrb[30].mxu1 }
 0x3f1   : > { %6936 = vst [vmem:[%s9982_s17 + $0xd8] sm:$0xff] %v6498_v4  ;;  %v6462_v30 = vmul.f32 %v9961_v21, %v6435_v52  ;;  %v6438_v32 = vadd.f32 %v8242_v53, %v6341_v29  ;;  %v6429_v7 = vpop.f32.mrb[31].mxu1 }
 0x3f2   : > { %6934 = vst [vmem:[%s9982_s17 + $0xc8] sm:$0xff] %v6496_v20  ;;  %v6460_v25 = vmul.f32 %v9961_v21, %v6427_v3  ;;  %v6430_v16 = vadd.f32 %v6429_v7, %v10110_v11 }
 0x3f3   : > { %v6485_v44 = vadd.f32 %v9967_v48, %v6462_v30  ;;  %v6463_v62 = vmul.f32 %v9961_v21, %v6438_v32 }
 0x3f4   : > { %v6483_v2 = vadd.f32 %v9967_v48, %v6460_v25  ;;  %v6461_v55 = vmul.f32 %v9961_v21, %v6430_v16 }
 0x3f5   : > { %v6501_v17 = vmax.f32 %v6485_v44, 0.0  ;;  %v6486_v58 = vadd.f32 %v9967_v48, %v6463_v62 }
 0x3f6   : > { %v6499_v28 = vmax.f32 %v6483_v2, 0.0  ;;  %v6484_v11 = vadd.f32 %v9967_v48, %v6461_v55 }
 0x3f7   : > { %6939 = vst [vmem:[%s9982_s17 + $0xf0] sm:$0xff] %v6501_v17  ;;  %v6502_v10 = vmax.f32 %v6486_v58, 0.0 }
 0x3f8   : > { %6937 = vst [vmem:[%s9982_s17 + $0xe0] sm:$0xff] %v6499_v28  ;;  %v6500_v21 = vmax.f32 %v6484_v11, 0.0 }
 0x3f9   : > { %6940 = vst [vmem:[%s9982_s17 + $0xf8] sm:$0xff] %v6502_v10 }
 0x3fa   : > { %6938 = vst [vmem:[%s9982_s17 + $0xe8] sm:$0xff] %v6500_v21 }
 0x3fb   : > { %8667 = shalt.err (!%p8664_p11)
}
 0x3fc   : > { %s8668_s10 = scalar_lea.hbm %s10176_s29, 4096  ;;  %s8672_s18 = scalar_lea.hbm %s10233_s7, 8192 }
 0x3fd   : > { %p8669_p13 = scmp.ne.s32.totalorder %s10176_s29, %s8668_s10  ;;  %p8673_p6 = scmp.lt.u32.totalorder %s10176_s29, %s10233_s7 }
 0x3fe   : > { %p8674_p9 = scmp.lt.u32.totalorder %s8672_s18, %s8668_s10  ;;  %p8676_p10 = scmp.lt.u32.totalorder %s8668_s10, %s10176_s29 }
 0x3ff   : > { %p8670_p5 = pnand %p8669_p13, %p10247_p1 }
 0x400   : > { %p8675_p12 = por %p8674_p9, %p8673_p6 }
 0x401   : > { %p8671_p0 = pneg %p8670_p5 }
 0x402   : > { %p8677_p2 = por %p8676_p10, %p8675_p12 }
 0x404   : > { %p8678_p3 = pnand %p8677_p2, %p8671_p0 }
 0x406   : > { %8681 = shalt.err (!%p8678_p3)
}
 0x407   : > { %s8733_s20 = smov 128   ;;  %s8734_s22 = smov 8  }
 0x408   : > { %8251 = dma.vmem_to_hbm [thread:$0]  (%p10247_p1), %s10178_s21, 4096, %s10176_s29, %s10185_s28, %s8733_s20, %s8733_s20, %s8734_s22  }
 0x409 PF: > { %p8268_p4 = scmp.ge.s32.totalorder %s8724_s27, 2  ;;  %s6549_s23 = sand.u32 1, %s8712_s24  }
 0x40a   : > { %p10248_p7 = scmp.ne.s32.totalorder %s10239_s12, 0  ;;  %s6550_s8 = scalar_lea.sflag [#allocation7], %s6549_s23 }
 0x40c   : > { %p8261_p8 = pnand %p8268_p4, %p10248_p7 }
 0x40e   : > { %8707 = dma.done.wait (!%p8261_p8), %s6550_s8, 4096  }
 0x40f   : > { %8709 = vsyncadd (!%p8261_p8), %s6550_s8, 4294963200  ;;  %s10249_s9 = sld [smem:[#allocation14_spill]]  ;;  %p19_p11 = scmp.ge.s32.totalorder %s8800_s30, 4  }
 0x410   : > { %s10250_s24 = smov %s8716_s25  ;;  %s10251_s25 = smov %s8720_s26 }
 0x411   : > { %s10253_s27 = smov %s8800_s30  ;;  %21 = sbr.rel (!%p19_p11) target bundleno = 5 (0x5), region = 103 }
 0x415   : > { %s10252_s26 = smov %s10249_s9 }
 0x418   :  { %6555 = vsyncpa [#allocation6], 1 }
 0x419   :  { %6557 = vsyncpa [#allocation6 + $0x1], 1 }
 0x41a   :  { %6558 = vsyncpa [#allocation9], 1 }
 0x41b   :  { %6559 = vsyncpa [#allocation7], 1 }
 0x41c   :  { %6561 = vsyncpa [#allocation7 + $0x1], 1 }

</bundles_post_ra>
